<compile_context>
chip_gen: v7x
topology: tpu7x:2x2x1
jax: 0.10.0
libtpu: 0.0.40
codegen_flags: <defaults>
</compile_context>

<pallas_src>
import functools

import numpy as np
import jax
import jax.numpy as jnp
from jax.experimental import pallas as pl
from jax.experimental.pallas import tpu as pltpu

MXU_DTYPE = jnp.float32  # set to jnp.bfloat16 on v6e/v7x for the MXU fast path


# ------------------------------ fused kernel -------------------------------

def _fused_lenet_kernel(
    patches_ref,                       # [1, OH1*OH1, 9]   conv1 im2col (per sample)
    wc1_ref, bc1_ref,                  # [9, 32], [1, 32]
    wc2_ref, bc2_ref,                  # [288, 64], [1, 64]
    w1p_ref, b1_ref,                   # [fc_in, h1] (HWC row order), [1, h1]
    w2_ref, b2_ref,                    # [h1, h2], [1, h2]
    w3_ref, b3_ref,                    # [h2, out], [1, out]
    out_ref,                           # [1, 1, out]
    y1_ref,                            # [oh1*oh1, c1]   conv1 out (flat rows)
    ta_ref,                            # [pw1, oh1, c1]  pool1 row stage
    p1s_ref,                           # [pw1, pw1, c1]  pool1 out (3-D)
    p1f_ref,                           # [pw1*pw1, c1]   pool1 out (flat, h-major)
    full_ref,                          # [9, pw1*pw1, c2] per-tap full matmuls
    y2_ref,                            # [oh2, oh2, c2]  conv2 out
    tb_ref,                            # [pw2, oh2, c2]  pool2 row stage
    p2s_ref,                           # [pw2, pw2, c2]  pool2 out
    *, oh1, pw1, oh2, pw2, c1, c2,
):
    f32 = jnp.float32

    def mdot(a, b):
        return jnp.dot(a.astype(MXU_DTYPE), b.astype(MXU_DTYPE),
                       preferred_element_type=f32)

    # ---- conv1 (im2col matmul) + bias + ReLU -------------------------------
    pk = patches_ref[0]                                   # [oh1*oh1, 9]
    y1 = mdot(pk, wc1_ref[...]) + bc1_ref[...]            # [oh1*oh1, c1]
    y1_ref[...] = jnp.maximum(y1, 0.0)

    # ---- maxpool1 2x2/2 (VPU epilogue in VMEM) ------------------------------
    for i in range(pw1):                                  # pool rows
        r0 = y1_ref[pl.ds((2 * i) * oh1, oh1), :]         # [oh1, c1]
        r1 = y1_ref[pl.ds((2 * i + 1) * oh1, oh1), :]
        ta_ref[i] = jnp.maximum(r0, r1)
    for j in range(pw1):                                  # pool cols
        p1s_ref[:, j, :] = jnp.maximum(ta_ref[:, 2 * j, :], ta_ref[:, 2 * j + 1, :])
    # contiguous flat (h-major) copy for the conv2 full-image matmuls
    for h in range(pw1):
        p1f_ref[pl.ds(h * pw1, pw1), :] = p1s_ref[h]      # [pw1, c1]

    # ---- conv2: 9 full-image MXU dots + shifted-slice accumulation ----------
    wc2 = wc2_ref[...]                                    # [9*c1, c2]
    bc2 = bc2_ref[...]                                    # [1, c2]
    p1f = p1f_ref[...]                                    # [pw1*pw1, c1]
    for t in range(9):                                    # one dot per tap
        full_ref[t] = mdot(p1f, wc2[t * c1:(t + 1) * c1, :])   # [pw1*pw1, c2]
    for oh in range(oh2):                                 # window = 9 shifted slices
        acc = jnp.zeros((oh2, c2), f32)
        for dy in range(3):
            base = (oh + dy) * pw1
            for dx in range(3):
                acc = acc + full_ref[dy * 3 + dx, pl.ds(base + dx, oh2), :]
        y2_ref[oh] = jnp.maximum(acc + bc2, 0.0)          # [oh2, c2]

    # ---- maxpool2 2x2/2 ------------------------------------------------------
    for i in range(pw2):
        tb_ref[i] = jnp.maximum(y2_ref[2 * i], y2_ref[2 * i + 1])      # [oh2, c2]
    for j in range(pw2):
        p2s_ref[:, j, :] = jnp.maximum(tb_ref[:, 2 * j, :], tb_ref[:, 2 * j + 1, :])

    # ---- FC stack (NCHW flatten folded into w1 row permutation) -------------
    w1p = w1p_ref[...]                                    # [pw2*pw2*c2, h1]
    acc1 = b1_ref[...].astype(f32)                        # [1, h1]
    for hh in range(pw2):
        slab = p2s_ref[hh]                                # [pw2, c2]
        for ww in range(pw2):
            t = hh * pw2 + ww
            acc1 = acc1 + mdot(slab[ww:ww + 1, :], w1p[t * c2:(t + 1) * c2, :])
    h1 = jnp.maximum(acc1, 0.0)                           # [1, h1]
    h2 = jnp.maximum(mdot(h1, w2_ref[...]) + b2_ref[...], 0.0)
    out = mdot(h2, w3_ref[...]) + b3_ref[...]             # [1, out]
    out_ref[0] = out.astype(out_ref.dtype)


# ------------------------------ wrapper -------------------------------------

def make_lenet_forward(in_dim, hidden1, hidden2, out_features):
    oh1 = in_dim - 2          # conv1 output spatial
    pw1 = oh1 // 2            # pool1 output spatial
    oh2 = pw1 - 2             # conv2 output spatial
    pw2 = oh2 // 2            # pool2 output spatial (== final_dim)
    c1, c2 = 32, 64
    fc_in = c2 * pw2 * pw2

    kernel = functools.partial(
        _fused_lenet_kernel,
        oh1=oh1, pw1=pw1, oh2=oh2, pw2=pw2, c1=c1, c2=c2)

    # fc1 row permutation: row (h*pw2 + w)*c2 + c of the permuted weight must be
    # row c*pw2*pw2 + h*pw2 + w of the PyTorch (CHW-flatten) weight.
    perm = np.array(
        [c * pw2 * pw2 + hh * pw2 + ww
         for hh in range(pw2) for ww in range(pw2) for c in range(c2)],
        dtype=np.int32)

    def full2(shape):  # whole-array, VMEM-resident across the grid
        return pl.BlockSpec(shape, lambda b: (0, 0))

    def fwd(x_nchw, params):
        B = x_nchw.shape[0]
        x = x_nchw[:, 0, :, :].astype(jnp.float32)                  # [B, H, W]
        # conv1 im2col on the raw (tiny) input; everything else is in-kernel.
        patches = jnp.stack(
            [x[:, dy:dy + oh1, dx:dx + oh1] for dy in range(3) for dx in range(3)],
            axis=-1).reshape(B, oh1 * oh1, 9)
        w1p = params["w1"][perm, :]

        out = pl.pallas_call(
            kernel,
            out_shape=jax.ShapeDtypeStruct((B, 1, out_features), jnp.float32),
            grid=(B,),
            in_specs=[
                pl.BlockSpec((1, oh1 * oh1, 9), lambda b: (b, 0, 0)),
                full2((9, c1)), full2((1, c1)),
                full2((9 * c1, c2)), full2((1, c2)),
                full2((fc_in, hidden1)), full2((1, hidden1)),
                full2((hidden1, hidden2)), full2((1, hidden2)),
                full2((hidden2, out_features)), full2((1, out_features)),
            ],
            out_specs=pl.BlockSpec((1, 1, out_features), lambda b: (b, 0, 0)),
            scratch_shapes=[
                pltpu.VMEM((oh1 * oh1, c1), jnp.float32),     # conv1 out (flat)
                pltpu.VMEM((pw1, oh1, c1), jnp.float32),      # pool1 row stage
                pltpu.VMEM((pw1, pw1, c1), jnp.float32),      # pool1 out (3-D)
                pltpu.VMEM((pw1 * pw1, c1), jnp.float32),     # pool1 out (flat)
                pltpu.VMEM((9, pw1 * pw1, c2), jnp.float32),  # conv2 per-tap dots
                pltpu.VMEM((oh2, oh2, c2), jnp.float32),      # conv2 out
                pltpu.VMEM((pw2, oh2, c2), jnp.float32),      # pool2 row stage
                pltpu.VMEM((pw2, pw2, c2), jnp.float32),      # pool2 out
            ],
            compiler_params=pltpu.CompilerParams(
                dimension_semantics=("parallel",)),
        )(patches,
          params["wc1"], params["bc1"].reshape(1, c1),
          params["wc2"], params["bc2"].reshape(1, c2),
          w1p, params["b1"].reshape(1, hidden1),
          params["w2"], params["b2"].reshape(1, hidden2),
          params["w3"], params["b3"].reshape(1, out_features))
        return out.reshape(B, out_features)

    return fwd, fc_in


# ------------------------- pure-JAX reference -------------------------------

def _im2col_nhwc(x, k=3):
    B, H, W, C = x.shape
    OH, OW = H - k + 1, W - k + 1
    patches = jnp.stack(
        [x[:, dy:dy + OH, dx:dx + OW, :] for dy in range(k) for dx in range(k)],
        axis=3)                                           # [B, OH, OW, k*k, C]
    return patches.reshape(B * OH * OW, k * k * C), (B, OH, OW)


def lenet_forward_ref(x_nchw, params, fc_in):
    def lin(x, w, b, relu):
        y = x @ w + b[None, :]
        return jnp.maximum(y, 0.0) if relu else y

    def pool(x):
        B, H, W, C = x.shape
        H2, W2 = H // 2, W // 2
        xc = x[:, :H2 * 2, :W2 * 2, :].reshape(B, H2, 2, W2, 2, C)
        return jnp.max(xc, axis=(2, 4))

    x = jnp.transpose(x_nchw, (0, 2, 3, 1))               # NCHW -> NHWC
    p, (B, OH, OW) = _im2col_nhwc(x, 3)
    y = lin(p, params["wc1"], params["bc1"], True).reshape(B, OH, OW, 32)
    y = pool(y)
    p, (B, OH, OW) = _im2col_nhwc(y, 3)
    y = lin(p, params["wc2"], params["bc2"], True).reshape(B, OH, OW, 64)
    y = pool(y)
    y = jnp.transpose(y, (0, 3, 1, 2)).reshape(B, fc_in)  # NCHW flatten
    y = lin(y, params["w1"], params["b1"], True)
    y = lin(y, params["w2"], params["b2"], True)
    y = lin(y, params["w3"], params["b3"], False)
    return y


# --------------------------------- init -------------------------------------

def _uniform(key, shape, bound):
    return jax.random.uniform(key, shape, jnp.float32, -bound, bound)


def init_params(key, in_dim, hidden1, hidden2, out_features):
    final_dim = ((in_dim - 2) // 2 - 2) // 2
    fc_in = 64 * final_dim * final_dim
    ks = jax.random.split(key, 10)
    # Conv2d default init: U(+-1/sqrt(fan_in)), fan_in = cin*k*k (weights & bias).
    # FC params follow the module's explicit kaiming_uniform_(fan_in, relu),
    # which for [in, out]-shaped tensors uses size(1) as fan_in (bound sqrt(6/size1)).
    params = {
        "wc1": _uniform(ks[0], (9 * 1, 32), (1.0 / (9 * 1)) ** 0.5),
        "bc1": _uniform(ks[1], (32,), (1.0 / (9 * 1)) ** 0.5),
        "wc2": _uniform(ks[2], (9 * 32, 64), (1.0 / (9 * 32)) ** 0.5),
        "bc2": _uniform(ks[3], (64,), (1.0 / (9 * 32)) ** 0.5),
        "w1": _uniform(ks[4], (fc_in, hidden1), (6.0 / hidden1) ** 0.5),
        "b1": _uniform(ks[5], (hidden1,), (6.0 / hidden1) ** 0.5),
        "w2": _uniform(ks[6], (hidden1, hidden2), (6.0 / hidden2) ** 0.5),
        "b2": _uniform(ks[7], (hidden2,), (6.0 / hidden2) ** 0.5),
        "w3": _uniform(ks[8], (hidden2, out_features), (6.0 / out_features) ** 0.5),
        "b3": _uniform(ks[9], (out_features,), (6.0 / out_features) ** 0.5),
    }
    return params, fc_in


# --------------------------------- main --------------------------------------

if __name__ == "__main__":
    B, in_dim = 2, 16
    hidden1, hidden2, out_features = 32, 32, 10

    key = jax.random.PRNGKey(0)
    k_params, k_x = jax.random.split(key)
    params, fc_in = init_params(k_params, in_dim, hidden1, hidden2, out_features)
    x = jax.random.normal(k_x, (B, 1, in_dim, in_dim), jnp.float32)  # NCHW

    fwd, fc_in_k = make_lenet_forward(in_dim, hidden1, hidden2, out_features)
    assert fc_in_k == fc_in
    fwd_jit = jax.jit(fwd)

    out = jax.block_until_ready(fwd_jit(x, params))
    ref = jax.block_until_ready(lenet_forward_ref(x, params, fc_in))

    assert out.shape == (B, out_features)
    assert jnp.allclose(out, ref, atol=1e-3, rtol=1e-3), (
        float(jnp.max(jnp.abs(out - ref))))

    print("KERNEL_OK")
</pallas_src>

<mosaic_0001>
module attributes {stable_mosaic.version = 11 : i64} {
  func.func @_fused_lenet_kernel(%arg0: i32, %arg1: memref<1x196x9xf32, #tpu.memory_space<vmem>>, %arg2: memref<9x32xf32, #tpu.memory_space<vmem>>, %arg3: memref<1x32xf32, #tpu.memory_space<vmem>>, %arg4: memref<288x64xf32, #tpu.memory_space<vmem>>, %arg5: memref<1x64xf32, #tpu.memory_space<vmem>>, %arg6: memref<256x32xf32, #tpu.memory_space<vmem>>, %arg7: memref<1x32xf32, #tpu.memory_space<vmem>>, %arg8: memref<32x32xf32, #tpu.memory_space<vmem>>, %arg9: memref<1x32xf32, #tpu.memory_space<vmem>>, %arg10: memref<32x10xf32, #tpu.memory_space<vmem>>, %arg11: memref<1x10xf32, #tpu.memory_space<vmem>>, %arg12: memref<1x1x10xf32, #tpu.memory_space<vmem>>, %arg13: memref<196x32xf32, #tpu.memory_space<vmem>>, %arg14: memref<7x14x32xf32, #tpu.memory_space<vmem>>, %arg15: memref<7x7x32xf32, #tpu.memory_space<vmem>>, %arg16: memref<49x32xf32, #tpu.memory_space<vmem>>, %arg17: memref<9x49x64xf32, #tpu.memory_space<vmem>>, %arg18: memref<5x5x64xf32, #tpu.memory_space<vmem>>, %arg19: memref<2x5x64xf32, #tpu.memory_space<vmem>>, %arg20: memref<2x2x64xf32, #tpu.memory_space<vmem>>) attributes {dimension_semantics = [#tpu.dimension_semantics<parallel>], iteration_bounds = array<i64: 2>, scalar_prefetch = 0 : i64, scratch_operands = 8 : i64, tpu.core_type = #tpu.core_type<tc>, window_params = [{transform_indices = @transform_0, window_bounds = array<i64: 1, 196, 9>}, {pipeline_mode = #tpu.pipeline_mode<synchronous>, transform_indices = @transform_1, window_bounds = array<i64: 9, 32>}, {pipeline_mode = #tpu.pipeline_mode<synchronous>, transform_indices = @transform_2, window_bounds = array<i64: 1, 32>}, {pipeline_mode = #tpu.pipeline_mode<synchronous>, transform_indices = @transform_3, window_bounds = array<i64: 288, 64>}, {pipeline_mode = #tpu.pipeline_mode<synchronous>, transform_indices = @transform_4, window_bounds = array<i64: 1, 64>}, {pipeline_mode = #tpu.pipeline_mode<synchronous>, transform_indices = @transform_5, window_bounds = array<i64: 256, 32>}, {pipeline_mode = #tpu.pipeline_mode<synchronous>, transform_indices = @transform_6, window_bounds = array<i64: 1, 32>}, {pipeline_mode = #tpu.pipeline_mode<synchronous>, transform_indices = @transform_7, window_bounds = array<i64: 32, 32>}, {pipeline_mode = #tpu.pipeline_mode<synchronous>, transform_indices = @transform_8, window_bounds = array<i64: 1, 32>}, {pipeline_mode = #tpu.pipeline_mode<synchronous>, transform_indices = @transform_9, window_bounds = array<i64: 32, 10>}, {pipeline_mode = #tpu.pipeline_mode<synchronous>, transform_indices = @transform_10, window_bounds = array<i64: 1, 10>}, {transform_indices = @transform_11, window_bounds = array<i64: 1, 1, 10>}]} {
    %c0 = arith.constant 0 : index
    %c0_0 = arith.constant 0 : index
    %c0_1 = arith.constant 0 : index
    %0 = vector.load %arg1[%c0, %c0_0, %c0_1] : memref<1x196x9xf32, #tpu.memory_space<vmem>>, vector<1x196x9xf32>
    %1 = vector.shape_cast %0 : vector<1x196x9xf32> to vector<196x9xf32>
    %c0_2 = arith.constant 0 : index
    %c0_3 = arith.constant 0 : index
    %2 = vector.load %arg2[%c0_2, %c0_3] : memref<9x32xf32, #tpu.memory_space<vmem>>, vector<9x32xf32>
    %cst = arith.constant dense<0.000000e+00> : vector<196x32xf32>
    %3 = tpu.matmul %1, %2, %cst {dimension_numbers = #tpu.dot_dimension_numbers<[1], [0], [0], [1], [0, 0, 1, 1], [], []>} : vector<196x9xf32>, vector<9x32xf32>, vector<196x32xf32> -> vector<196x32xf32>
    %c0_4 = arith.constant 0 : index
    %c0_5 = arith.constant 0 : index
    %4 = vector.load %arg3[%c0_4, %c0_5] : memref<1x32xf32, #tpu.memory_space<vmem>>, vector<1x32xf32>
    %5 = vector.broadcast %4 : vector<1x32xf32> to vector<196x32xf32>
    %6 = arith.addf %3, %5 : vector<196x32xf32>
    %cst_6 = arith.constant 0.000000e+00 : f32
    %7 = vector.broadcast %cst_6 : f32 to vector<196x32xf32>
    %8 = arith.maximumf %6, %7 : vector<196x32xf32>
    %c0_7 = arith.constant 0 : index
    %c0_8 = arith.constant 0 : index
    %9 = vector.load %arg13[%c0_7, %c0_8] : memref<196x32xf32, #tpu.memory_space<vmem>>, vector<196x32xf32>
    tpu.vector_store %arg13[%c0_7, %c0_8], %8 {strides = array<i32>} : memref<196x32xf32, #tpu.memory_space<vmem>>, vector<196x32xf32>,
    %c0_9 = arith.constant 0 : index
    %c0_10 = arith.constant 0 : index
    %10 = vector.load %arg13[%c0_9, %c0_10] : memref<196x32xf32, #tpu.memory_space<vmem>>, vector<14x32xf32>
    %c14 = arith.constant 14 : index
    %c0_11 = arith.constant 0 : index
    %11 = vector.load %arg13[%c14, %c0_11] : memref<196x32xf32, #tpu.memory_space<vmem>>, vector<14x32xf32>
    %12 = arith.maximumf %10, %11 : vector<14x32xf32>
    %c0_12 = arith.constant 0 : index
    %c0_13 = arith.constant 0 : index
    %c0_14 = arith.constant 0 : index
    %13 = vector.load %arg14[%c0_12, %c0_13, %c0_14] : memref<7x14x32xf32, #tpu.memory_space<vmem>>, vector<1x14x32xf32>
    %14 = vector.shape_cast %13 : vector<1x14x32xf32> to vector<14x32xf32>
    %15 = vector.shape_cast %12 : vector<14x32xf32> to vector<1x14x32xf32>
    tpu.vector_store %arg14[%c0_12, %c0_13, %c0_14], %15 {strides = array<i32>} : memref<7x14x32xf32, #tpu.memory_space<vmem>>, vector<1x14x32xf32>,
    %c28 = arith.constant 28 : index
    %c0_15 = arith.constant 0 : index
    %16 = vector.load %arg13[%c28, %c0_15] : memref<196x32xf32, #tpu.memory_space<vmem>>, vector<14x32xf32>
    %c42 = arith.constant 42 : index
    %c0_16 = arith.constant 0 : index
    %17 = vector.load %arg13[%c42, %c0_16] : memref<196x32xf32, #tpu.memory_space<vmem>>, vector<14x32xf32>
    %18 = arith.maximumf %16, %17 : vector<14x32xf32>
    %c1 = arith.constant 1 : index
    %c0_17 = arith.constant 0 : index
    %c0_18 = arith.constant 0 : index
    %19 = vector.load %arg14[%c1, %c0_17, %c0_18] : memref<7x14x32xf32, #tpu.memory_space<vmem>>, vector<1x14x32xf32>
    %20 = vector.shape_cast %19 : vector<1x14x32xf32> to vector<14x32xf32>
    %21 = vector.shape_cast %18 : vector<14x32xf32> to vector<1x14x32xf32>
    tpu.vector_store %arg14[%c1, %c0_17, %c0_18], %21 {strides = array<i32>} : memref<7x14x32xf32, #tpu.memory_space<vmem>>, vector<1x14x32xf32>,
    %c56 = arith.constant 56 : index
    %c0_19 = arith.constant 0 : index
    %22 = vector.load %arg13[%c56, %c0_19] : memref<196x32xf32, #tpu.memory_space<vmem>>, vector<14x32xf32>
    %c70 = arith.constant 70 : index
    %c0_20 = arith.constant 0 : index
    %23 = vector.load %arg13[%c70, %c0_20] : memref<196x32xf32, #tpu.memory_space<vmem>>, vector<14x32xf32>
    %24 = arith.maximumf %22, %23 : vector<14x32xf32>
    %c2 = arith.constant 2 : index
    %c0_21 = arith.constant 0 : index
    %c0_22 = arith.constant 0 : index
    %25 = vector.load %arg14[%c2, %c0_21, %c0_22] : memref<7x14x32xf32, #tpu.memory_space<vmem>>, vector<1x14x32xf32>
    %26 = vector.shape_cast %25 : vector<1x14x32xf32> to vector<14x32xf32>
    %27 = vector.shape_cast %24 : vector<14x32xf32> to vector<1x14x32xf32>
    tpu.vector_store %arg14[%c2, %c0_21, %c0_22], %27 {strides = array<i32>} : memref<7x14x32xf32, #tpu.memory_space<vmem>>, vector<1x14x32xf32>,
    %c84 = arith.constant 84 : index
    %c0_23 = arith.constant 0 : index
    %28 = vector.load %arg13[%c84, %c0_23] : memref<196x32xf32, #tpu.memory_space<vmem>>, vector<14x32xf32>
    %c98 = arith.constant 98 : index
    %c0_24 = arith.constant 0 : index
    %29 = vector.load %arg13[%c98, %c0_24] : memref<196x32xf32, #tpu.memory_space<vmem>>, vector<14x32xf32>
    %30 = arith.maximumf %28, %29 : vector<14x32xf32>
    %c3 = arith.constant 3 : index
    %c0_25 = arith.constant 0 : index
    %c0_26 = arith.constant 0 : index
    %31 = vector.load %arg14[%c3, %c0_25, %c0_26] : memref<7x14x32xf32, #tpu.memory_space<vmem>>, vector<1x14x32xf32>
    %32 = vector.shape_cast %31 : vector<1x14x32xf32> to vector<14x32xf32>
    %33 = vector.shape_cast %30 : vector<14x32xf32> to vector<1x14x32xf32>
    tpu.vector_store %arg14[%c3, %c0_25, %c0_26], %33 {strides = array<i32>} : memref<7x14x32xf32, #tpu.memory_space<vmem>>, vector<1x14x32xf32>,
    %c112 = arith.constant 112 : index
    %c0_27 = arith.constant 0 : index
    %34 = vector.load %arg13[%c112, %c0_27] : memref<196x32xf32, #tpu.memory_space<vmem>>, vector<14x32xf32>
    %c126 = arith.constant 126 : index
    %c0_28 = arith.constant 0 : index
    %35 = vector.load %arg13[%c126, %c0_28] : memref<196x32xf32, #tpu.memory_space<vmem>>, vector<14x32xf32>
    %36 = arith.maximumf %34, %35 : vector<14x32xf32>
    %c4 = arith.constant 4 : index
    %c0_29 = arith.constant 0 : index
    %c0_30 = arith.constant 0 : index
    %37 = vector.load %arg14[%c4, %c0_29, %c0_30] : memref<7x14x32xf32, #tpu.memory_space<vmem>>, vector<1x14x32xf32>
    %38 = vector.shape_cast %37 : vector<1x14x32xf32> to vector<14x32xf32>
    %39 = vector.shape_cast %36 : vector<14x32xf32> to vector<1x14x32xf32>
    tpu.vector_store %arg14[%c4, %c0_29, %c0_30], %39 {strides = array<i32>} : memref<7x14x32xf32, #tpu.memory_space<vmem>>, vector<1x14x32xf32>,
    %c140 = arith.constant 140 : index
    %c0_31 = arith.constant 0 : index
    %40 = vector.load %arg13[%c140, %c0_31] : memref<196x32xf32, #tpu.memory_space<vmem>>, vector<14x32xf32>
    %c154 = arith.constant 154 : index
    %c0_32 = arith.constant 0 : index
    %41 = vector.load %arg13[%c154, %c0_32] : memref<196x32xf32, #tpu.memory_space<vmem>>, vector<14x32xf32>
    %42 = arith.maximumf %40, %41 : vector<14x32xf32>
    %c5 = arith.constant 5 : index
    %c0_33 = arith.constant 0 : index
    %c0_34 = arith.constant 0 : index
    %43 = vector.load %arg14[%c5, %c0_33, %c0_34] : memref<7x14x32xf32, #tpu.memory_space<vmem>>, vector<1x14x32xf32>
    %44 = vector.shape_cast %43 : vector<1x14x32xf32> to vector<14x32xf32>
    %45 = vector.shape_cast %42 : vector<14x32xf32> to vector<1x14x32xf32>
    tpu.vector_store %arg14[%c5, %c0_33, %c0_34], %45 {strides = array<i32>} : memref<7x14x32xf32, #tpu.memory_space<vmem>>, vector<1x14x32xf32>,
    %c168 = arith.constant 168 : index
    %c0_35 = arith.constant 0 : index
    %46 = vector.load %arg13[%c168, %c0_35] : memref<196x32xf32, #tpu.memory_space<vmem>>, vector<14x32xf32>
    %c182 = arith.constant 182 : index
    %c0_36 = arith.constant 0 : index
    %47 = vector.load %arg13[%c182, %c0_36] : memref<196x32xf32, #tpu.memory_space<vmem>>, vector<14x32xf32>
    %48 = arith.maximumf %46, %47 : vector<14x32xf32>
    %c6 = arith.constant 6 : index
    %c0_37 = arith.constant 0 : index
    %c0_38 = arith.constant 0 : index
    %49 = vector.load %arg14[%c6, %c0_37, %c0_38] : memref<7x14x32xf32, #tpu.memory_space<vmem>>, vector<1x14x32xf32>
    %50 = vector.shape_cast %49 : vector<1x14x32xf32> to vector<14x32xf32>
    %51 = vector.shape_cast %48 : vector<14x32xf32> to vector<1x14x32xf32>
    tpu.vector_store %arg14[%c6, %c0_37, %c0_38], %51 {strides = array<i32>} : memref<7x14x32xf32, #tpu.memory_space<vmem>>, vector<1x14x32xf32>,
    %c0_39 = arith.constant 0 : index
    %c0_40 = arith.constant 0 : index
    %c0_41 = arith.constant 0 : index
    %52 = vector.load %arg14[%c0_39, %c0_40, %c0_41] : memref<7x14x32xf32, #tpu.memory_space<vmem>>, vector<7x1x32xf32>
    %53 = vector.shape_cast %52 : vector<7x1x32xf32> to vector<7x32xf32>
    %c0_42 = arith.constant 0 : index
    %c1_43 = arith.constant 1 : index
    %c0_44 = arith.constant 0 : index
    %54 = vector.load %arg14[%c0_42, %c1_43, %c0_44] : memref<7x14x32xf32, #tpu.memory_space<vmem>>, vector<7x1x32xf32>
    %55 = vector.shape_cast %54 : vector<7x1x32xf32> to vector<7x32xf32>
    %56 = arith.maximumf %53, %55 : vector<7x32xf32>
    %c0_45 = arith.constant 0 : index
    %c0_46 = arith.constant 0 : index
    %c0_47 = arith.constant 0 : index
    %57 = vector.load %arg15[%c0_45, %c0_46, %c0_47] : memref<7x7x32xf32, #tpu.memory_space<vmem>>, vector<7x1x32xf32>
    %58 = vector.shape_cast %57 : vector<7x1x32xf32> to vector<7x32xf32>
    %59 = vector.shape_cast %56 : vector<7x32xf32> to vector<7x1x32xf32>
    tpu.vector_store %arg15[%c0_45, %c0_46, %c0_47], %59 {strides = array<i32>} : memref<7x7x32xf32, #tpu.memory_space<vmem>>, vector<7x1x32xf32>,
    %c0_48 = arith.constant 0 : index
    %c2_49 = arith.constant 2 : index
    %c0_50 = arith.constant 0 : index
    %60 = vector.load %arg14[%c0_48, %c2_49, %c0_50] : memref<7x14x32xf32, #tpu.memory_space<vmem>>, vector<7x1x32xf32>
    %61 = vector.shape_cast %60 : vector<7x1x32xf32> to vector<7x32xf32>
    %c0_51 = arith.constant 0 : index
    %c3_52 = arith.constant 3 : index
    %c0_53 = arith.constant 0 : index
    %62 = vector.load %arg14[%c0_51, %c3_52, %c0_53] : memref<7x14x32xf32, #tpu.memory_space<vmem>>, vector<7x1x32xf32>
    %63 = vector.shape_cast %62 : vector<7x1x32xf32> to vector<7x32xf32>
    %64 = arith.maximumf %61, %63 : vector<7x32xf32>
    %c0_54 = arith.constant 0 : index
    %c1_55 = arith.constant 1 : index
    %c0_56 = arith.constant 0 : index
    %65 = vector.load %arg15[%c0_54, %c1_55, %c0_56] : memref<7x7x32xf32, #tpu.memory_space<vmem>>, vector<7x1x32xf32>
    %66 = vector.shape_cast %65 : vector<7x1x32xf32> to vector<7x32xf32>
    %67 = vector.shape_cast %64 : vector<7x32xf32> to vector<7x1x32xf32>
    tpu.vector_store %arg15[%c0_54, %c1_55, %c0_56], %67 {strides = array<i32>} : memref<7x7x32xf32, #tpu.memory_space<vmem>>, vector<7x1x32xf32>,
    %c0_57 = arith.constant 0 : index
    %c4_58 = arith.constant 4 : index
    %c0_59 = arith.constant 0 : index
    %68 = vector.load %arg14[%c0_57, %c4_58, %c0_59] : memref<7x14x32xf32, #tpu.memory_space<vmem>>, vector<7x1x32xf32>
    %69 = vector.shape_cast %68 : vector<7x1x32xf32> to vector<7x32xf32>
    %c0_60 = arith.constant 0 : index
    %c5_61 = arith.constant 5 : index
    %c0_62 = arith.constant 0 : index
    %70 = vector.load %arg14[%c0_60, %c5_61, %c0_62] : memref<7x14x32xf32, #tpu.memory_space<vmem>>, vector<7x1x32xf32>
    %71 = vector.shape_cast %70 : vector<7x1x32xf32> to vector<7x32xf32>
    %72 = arith.maximumf %69, %71 : vector<7x32xf32>
    %c0_63 = arith.constant 0 : index
    %c2_64 = arith.constant 2 : index
    %c0_65 = arith.constant 0 : index
    %73 = vector.load %arg15[%c0_63, %c2_64, %c0_65] : memref<7x7x32xf32, #tpu.memory_space<vmem>>, vector<7x1x32xf32>
    %74 = vector.shape_cast %73 : vector<7x1x32xf32> to vector<7x32xf32>
    %75 = vector.shape_cast %72 : vector<7x32xf32> to vector<7x1x32xf32>
    tpu.vector_store %arg15[%c0_63, %c2_64, %c0_65], %75 {strides = array<i32>} : memref<7x7x32xf32, #tpu.memory_space<vmem>>, vector<7x1x32xf32>,
    %c0_66 = arith.constant 0 : index
    %c6_67 = arith.constant 6 : index
    %c0_68 = arith.constant 0 : index
    %76 = vector.load %arg14[%c0_66, %c6_67, %c0_68] : memref<7x14x32xf32, #tpu.memory_space<vmem>>, vector<7x1x32xf32>
    %77 = vector.shape_cast %76 : vector<7x1x32xf32> to vector<7x32xf32>
    %c0_69 = arith.constant 0 : index
    %c7 = arith.constant 7 : index
    %c0_70 = arith.constant 0 : index
    %78 = vector.load %arg14[%c0_69, %c7, %c0_70] : memref<7x14x32xf32, #tpu.memory_space<vmem>>, vector<7x1x32xf32>
    %79 = vector.shape_cast %78 : vector<7x1x32xf32> to vector<7x32xf32>
    %80 = arith.maximumf %77, %79 : vector<7x32xf32>
    %c0_71 = arith.constant 0 : index
    %c3_72 = arith.constant 3 : index
    %c0_73 = arith.constant 0 : index
    %81 = vector.load %arg15[%c0_71, %c3_72, %c0_73] : memref<7x7x32xf32, #tpu.memory_space<vmem>>, vector<7x1x32xf32>
    %82 = vector.shape_cast %81 : vector<7x1x32xf32> to vector<7x32xf32>
    %83 = vector.shape_cast %80 : vector<7x32xf32> to vector<7x1x32xf32>
    tpu.vector_store %arg15[%c0_71, %c3_72, %c0_73], %83 {strides = array<i32>} : memref<7x7x32xf32, #tpu.memory_space<vmem>>, vector<7x1x32xf32>,
    %c0_74 = arith.constant 0 : index
    %c8 = arith.constant 8 : index
    %c0_75 = arith.constant 0 : index
    %84 = vector.load %arg14[%c0_74, %c8, %c0_75] : memref<7x14x32xf32, #tpu.memory_space<vmem>>, vector<7x1x32xf32>
    %85 = vector.shape_cast %84 : vector<7x1x32xf32> to vector<7x32xf32>
    %c0_76 = arith.constant 0 : index
    %c9 = arith.constant 9 : index
    %c0_77 = arith.constant 0 : index
    %86 = vector.load %arg14[%c0_76, %c9, %c0_77] : memref<7x14x32xf32, #tpu.memory_space<vmem>>, vector<7x1x32xf32>
    %87 = vector.shape_cast %86 : vector<7x1x32xf32> to vector<7x32xf32>
    %88 = arith.maximumf %85, %87 : vector<7x32xf32>
    %c0_78 = arith.constant 0 : index
    %c4_79 = arith.constant 4 : index
    %c0_80 = arith.constant 0 : index
    %89 = vector.load %arg15[%c0_78, %c4_79, %c0_80] : memref<7x7x32xf32, #tpu.memory_space<vmem>>, vector<7x1x32xf32>
    %90 = vector.shape_cast %89 : vector<7x1x32xf32> to vector<7x32xf32>
    %91 = vector.shape_cast %88 : vector<7x32xf32> to vector<7x1x32xf32>
    tpu.vector_store %arg15[%c0_78, %c4_79, %c0_80], %91 {strides = array<i32>} : memref<7x7x32xf32, #tpu.memory_space<vmem>>, vector<7x1x32xf32>,
    %c0_81 = arith.constant 0 : index
    %c10 = arith.constant 10 : index
    %c0_82 = arith.constant 0 : index
    %92 = vector.load %arg14[%c0_81, %c10, %c0_82] : memref<7x14x32xf32, #tpu.memory_space<vmem>>, vector<7x1x32xf32>
    %93 = vector.shape_cast %92 : vector<7x1x32xf32> to vector<7x32xf32>
    %c0_83 = arith.constant 0 : index
    %c11 = arith.constant 11 : index
    %c0_84 = arith.constant 0 : index
    %94 = vector.load %arg14[%c0_83, %c11, %c0_84] : memref<7x14x32xf32, #tpu.memory_space<vmem>>, vector<7x1x32xf32>
    %95 = vector.shape_cast %94 : vector<7x1x32xf32> to vector<7x32xf32>
    %96 = arith.maximumf %93, %95 : vector<7x32xf32>
    %c0_85 = arith.constant 0 : index
    %c5_86 = arith.constant 5 : index
    %c0_87 = arith.constant 0 : index
    %97 = vector.load %arg15[%c0_85, %c5_86, %c0_87] : memref<7x7x32xf32, #tpu.memory_space<vmem>>, vector<7x1x32xf32>
    %98 = vector.shape_cast %97 : vector<7x1x32xf32> to vector<7x32xf32>
    %99 = vector.shape_cast %96 : vector<7x32xf32> to vector<7x1x32xf32>
    tpu.vector_store %arg15[%c0_85, %c5_86, %c0_87], %99 {strides = array<i32>} : memref<7x7x32xf32, #tpu.memory_space<vmem>>, vector<7x1x32xf32>,
    %c0_88 = arith.constant 0 : index
    %c12 = arith.constant 12 : index
    %c0_89 = arith.constant 0 : index
    %100 = vector.load %arg14[%c0_88, %c12, %c0_89] : memref<7x14x32xf32, #tpu.memory_space<vmem>>, vector<7x1x32xf32>
    %101 = vector.shape_cast %100 : vector<7x1x32xf32> to vector<7x32xf32>
    %c0_90 = arith.constant 0 : index
    %c13 = arith.constant 13 : index
    %c0_91 = arith.constant 0 : index
    %102 = vector.load %arg14[%c0_90, %c13, %c0_91] : memref<7x14x32xf32, #tpu.memory_space<vmem>>, vector<7x1x32xf32>
    %103 = vector.shape_cast %102 : vector<7x1x32xf32> to vector<7x32xf32>
    %104 = arith.maximumf %101, %103 : vector<7x32xf32>
    %c0_92 = arith.constant 0 : index
    %c6_93 = arith.constant 6 : index
    %c0_94 = arith.constant 0 : index
    %105 = vector.load %arg15[%c0_92, %c6_93, %c0_94] : memref<7x7x32xf32, #tpu.memory_space<vmem>>, vector<7x1x32xf32>
    %106 = vector.shape_cast %105 : vector<7x1x32xf32> to vector<7x32xf32>
    %107 = vector.shape_cast %104 : vector<7x32xf32> to vector<7x1x32xf32>
    tpu.vector_store %arg15[%c0_92, %c6_93, %c0_94], %107 {strides = array<i32>} : memref<7x7x32xf32, #tpu.memory_space<vmem>>, vector<7x1x32xf32>,
    %c0_95 = arith.constant 0 : index
    %c0_96 = arith.constant 0 : index
    %c0_97 = arith.constant 0 : index
    %108 = vector.load %arg15[%c0_95, %c0_96, %c0_97] : memref<7x7x32xf32, #tpu.memory_space<vmem>>, vector<1x7x32xf32>
    %109 = vector.shape_cast %108 : vector<1x7x32xf32> to vector<7x32xf32>
    %c0_98 = arith.constant 0 : index
    %c0_99 = arith.constant 0 : index
    %110 = vector.load %arg16[%c0_98, %c0_99] : memref<49x32xf32, #tpu.memory_space<vmem>>, vector<7x32xf32>
    tpu.vector_store %arg16[%c0_98, %c0_99], %109 {strides = array<i32>} : memref<49x32xf32, #tpu.memory_space<vmem>>, vector<7x32xf32>,
    %c1_100 = arith.constant 1 : index
    %c0_101 = arith.constant 0 : index
    %c0_102 = arith.constant 0 : index
    %111 = vector.load %arg15[%c1_100, %c0_101, %c0_102] : memref<7x7x32xf32, #tpu.memory_space<vmem>>, vector<1x7x32xf32>
    %112 = vector.shape_cast %111 : vector<1x7x32xf32> to vector<7x32xf32>
    %c7_103 = arith.constant 7 : index
    %c0_104 = arith.constant 0 : index
    %113 = vector.load %arg16[%c7_103, %c0_104] : memref<49x32xf32, #tpu.memory_space<vmem>>, vector<7x32xf32>
    tpu.vector_store %arg16[%c7_103, %c0_104], %112 {strides = array<i32>} : memref<49x32xf32, #tpu.memory_space<vmem>>, vector<7x32xf32>,
    %c2_105 = arith.constant 2 : index
    %c0_106 = arith.constant 0 : index
    %c0_107 = arith.constant 0 : index
    %114 = vector.load %arg15[%c2_105, %c0_106, %c0_107] : memref<7x7x32xf32, #tpu.memory_space<vmem>>, vector<1x7x32xf32>
    %115 = vector.shape_cast %114 : vector<1x7x32xf32> to vector<7x32xf32>
    %c14_108 = arith.constant 14 : index
    %c0_109 = arith.constant 0 : index
    %116 = vector.load %arg16[%c14_108, %c0_109] : memref<49x32xf32, #tpu.memory_space<vmem>>, vector<7x32xf32>
    tpu.vector_store %arg16[%c14_108, %c0_109], %115 {strides = array<i32>} : memref<49x32xf32, #tpu.memory_space<vmem>>, vector<7x32xf32>,
    %c3_110 = arith.constant 3 : index
    %c0_111 = arith.constant 0 : index
    %c0_112 = arith.constant 0 : index
    %117 = vector.load %arg15[%c3_110, %c0_111, %c0_112] : memref<7x7x32xf32, #tpu.memory_space<vmem>>, vector<1x7x32xf32>
    %118 = vector.shape_cast %117 : vector<1x7x32xf32> to vector<7x32xf32>
    %c21 = arith.constant 21 : index
    %c0_113 = arith.constant 0 : index
    %119 = vector.load %arg16[%c21, %c0_113] : memref<49x32xf32, #tpu.memory_space<vmem>>, vector<7x32xf32>
    tpu.vector_store %arg16[%c21, %c0_113], %118 {strides = array<i32>} : memref<49x32xf32, #tpu.memory_space<vmem>>, vector<7x32xf32>,
    %c4_114 = arith.constant 4 : index
    %c0_115 = arith.constant 0 : index
    %c0_116 = arith.constant 0 : index
    %120 = vector.load %arg15[%c4_114, %c0_115, %c0_116] : memref<7x7x32xf32, #tpu.memory_space<vmem>>, vector<1x7x32xf32>
    %121 = vector.shape_cast %120 : vector<1x7x32xf32> to vector<7x32xf32>
    %c28_117 = arith.constant 28 : index
    %c0_118 = arith.constant 0 : index
    %122 = vector.load %arg16[%c28_117, %c0_118] : memref<49x32xf32, #tpu.memory_space<vmem>>, vector<7x32xf32>
    tpu.vector_store %arg16[%c28_117, %c0_118], %121 {strides = array<i32>} : memref<49x32xf32, #tpu.memory_space<vmem>>, vector<7x32xf32>,
    %c5_119 = arith.constant 5 : index
    %c0_120 = arith.constant 0 : index
    %c0_121 = arith.constant 0 : index
    %123 = vector.load %arg15[%c5_119, %c0_120, %c0_121] : memref<7x7x32xf32, #tpu.memory_space<vmem>>, vector<1x7x32xf32>
    %124 = vector.shape_cast %123 : vector<1x7x32xf32> to vector<7x32xf32>
    %c35 = arith.constant 35 : index
    %c0_122 = arith.constant 0 : index
    %125 = vector.load %arg16[%c35, %c0_122] : memref<49x32xf32, #tpu.memory_space<vmem>>, vector<7x32xf32>
    tpu.vector_store %arg16[%c35, %c0_122], %124 {strides = array<i32>} : memref<49x32xf32, #tpu.memory_space<vmem>>, vector<7x32xf32>,
    %c6_123 = arith.constant 6 : index
    %c0_124 = arith.constant 0 : index
    %c0_125 = arith.constant 0 : index
    %126 = vector.load %arg15[%c6_123, %c0_124, %c0_125] : memref<7x7x32xf32, #tpu.memory_space<vmem>>, vector<1x7x32xf32>
    %127 = vector.shape_cast %126 : vector<1x7x32xf32> to vector<7x32xf32>
    %c42_126 = arith.constant 42 : index
    %c0_127 = arith.constant 0 : index
    %128 = vector.load %arg16[%c42_126, %c0_127] : memref<49x32xf32, #tpu.memory_space<vmem>>, vector<7x32xf32>
    tpu.vector_store %arg16[%c42_126, %c0_127], %127 {strides = array<i32>} : memref<49x32xf32, #tpu.memory_space<vmem>>, vector<7x32xf32>,
    %c0_128 = arith.constant 0 : index
    %c0_129 = arith.constant 0 : index
    %129 = vector.load %arg4[%c0_128, %c0_129] : memref<288x64xf32, #tpu.memory_space<vmem>>, vector<288x64xf32>
    %c0_130 = arith.constant 0 : index
    %c0_131 = arith.constant 0 : index
    %130 = vector.load %arg5[%c0_130, %c0_131] : memref<1x64xf32, #tpu.memory_space<vmem>>, vector<1x64xf32>
    %c0_132 = arith.constant 0 : index
    %c0_133 = arith.constant 0 : index
    %131 = vector.load %arg16[%c0_132, %c0_133] : memref<49x32xf32, #tpu.memory_space<vmem>>, vector<49x32xf32>
    %132 = vector.extract_strided_slice %129 {offsets = [0, 0], sizes = [32, 64], strides = [1, 1]} : vector<288x64xf32> to vector<32x64xf32>
    %cst_134 = arith.constant dense<0.000000e+00> : vector<49x64xf32>
    %133 = tpu.matmul %131, %132, %cst_134 {dimension_numbers = #tpu.dot_dimension_numbers<[1], [0], [0], [1], [0, 0, 1, 1], [], []>} : vector<49x32xf32>, vector<32x64xf32>, vector<49x64xf32> -> vector<49x64xf32>
    %c0_135 = arith.constant 0 : index
    %c0_136 = arith.constant 0 : index
    %c0_137 = arith.constant 0 : index
    %134 = vector.load %arg17[%c0_135, %c0_136, %c0_137] : memref<9x49x64xf32, #tpu.memory_space<vmem>>, vector<1x49x64xf32>
    %135 = vector.shape_cast %134 : vector<1x49x64xf32> to vector<49x64xf32>
    %136 = vector.shape_cast %133 : vector<49x64xf32> to vector<1x49x64xf32>
    tpu.vector_store %arg17[%c0_135, %c0_136, %c0_137], %136 {strides = array<i32>} : memref<9x49x64xf32, #tpu.memory_space<vmem>>, vector<1x49x64xf32>,
    %137 = vector.extract_strided_slice %129 {offsets = [32, 0], sizes = [32, 64], strides = [1, 1]} : vector<288x64xf32> to vector<32x64xf32>
    %cst_138 = arith.constant dense<0.000000e+00> : vector<49x64xf32>
    %138 = tpu.matmul %131, %137, %cst_138 {dimension_numbers = #tpu.dot_dimension_numbers<[1], [0], [0], [1], [0, 0, 1, 1], [], []>} : vector<49x32xf32>, vector<32x64xf32>, vector<49x64xf32> -> vector<49x64xf32>
    %c1_139 = arith.constant 1 : index
    %c0_140 = arith.constant 0 : index
    %c0_141 = arith.constant 0 : index
    %139 = vector.load %arg17[%c1_139, %c0_140, %c0_141] : memref<9x49x64xf32, #tpu.memory_space<vmem>>, vector<1x49x64xf32>
    %140 = vector.shape_cast %139 : vector<1x49x64xf32> to vector<49x64xf32>
    %141 = vector.shape_cast %138 : vector<49x64xf32> to vector<1x49x64xf32>
    tpu.vector_store %arg17[%c1_139, %c0_140, %c0_141], %141 {strides = array<i32>} : memref<9x49x64xf32, #tpu.memory_space<vmem>>, vector<1x49x64xf32>,
    %142 = vector.extract_strided_slice %129 {offsets = [64, 0], sizes = [32, 64], strides = [1, 1]} : vector<288x64xf32> to vector<32x64xf32>
    %cst_142 = arith.constant dense<0.000000e+00> : vector<49x64xf32>
    %143 = tpu.matmul %131, %142, %cst_142 {dimension_numbers = #tpu.dot_dimension_numbers<[1], [0], [0], [1], [0, 0, 1, 1], [], []>} : vector<49x32xf32>, vector<32x64xf32>, vector<49x64xf32> -> vector<49x64xf32>
    %c2_143 = arith.constant 2 : index
    %c0_144 = arith.constant 0 : index
    %c0_145 = arith.constant 0 : index
    %144 = vector.load %arg17[%c2_143, %c0_144, %c0_145] : memref<9x49x64xf32, #tpu.memory_space<vmem>>, vector<1x49x64xf32>
    %145 = vector.shape_cast %144 : vector<1x49x64xf32> to vector<49x64xf32>
    %146 = vector.shape_cast %143 : vector<49x64xf32> to vector<1x49x64xf32>
    tpu.vector_store %arg17[%c2_143, %c0_144, %c0_145], %146 {strides = array<i32>} : memref<9x49x64xf32, #tpu.memory_space<vmem>>, vector<1x49x64xf32>,
    %147 = vector.extract_strided_slice %129 {offsets = [96, 0], sizes = [32, 64], strides = [1, 1]} : vector<288x64xf32> to vector<32x64xf32>
    %cst_146 = arith.constant dense<0.000000e+00> : vector<49x64xf32>
    %148 = tpu.matmul %131, %147, %cst_146 {dimension_numbers = #tpu.dot_dimension_numbers<[1], [0], [0], [1], [0, 0, 1, 1], [], []>} : vector<49x32xf32>, vector<32x64xf32>, vector<49x64xf32> -> vector<49x64xf32>
    %c3_147 = arith.constant 3 : index
    %c0_148 = arith.constant 0 : index
    %c0_149 = arith.constant 0 : index
    %149 = vector.load %arg17[%c3_147, %c0_148, %c0_149] : memref<9x49x64xf32, #tpu.memory_space<vmem>>, vector<1x49x64xf32>
    %150 = vector.shape_cast %149 : vector<1x49x64xf32> to vector<49x64xf32>
    %151 = vector.shape_cast %148 : vector<49x64xf32> to vector<1x49x64xf32>
    tpu.vector_store %arg17[%c3_147, %c0_148, %c0_149], %151 {strides = array<i32>} : memref<9x49x64xf32, #tpu.memory_space<vmem>>, vector<1x49x64xf32>,
    %152 = vector.extract_strided_slice %129 {offsets = [128, 0], sizes = [32, 64], strides = [1, 1]} : vector<288x64xf32> to vector<32x64xf32>
    %cst_150 = arith.constant dense<0.000000e+00> : vector<49x64xf32>
    %153 = tpu.matmul %131, %152, %cst_150 {dimension_numbers = #tpu.dot_dimension_numbers<[1], [0], [0], [1], [0, 0, 1, 1], [], []>} : vector<49x32xf32>, vector<32x64xf32>, vector<49x64xf32> -> vector<49x64xf32>
    %c4_151 = arith.constant 4 : index
    %c0_152 = arith.constant 0 : index
    %c0_153 = arith.constant 0 : index
    %154 = vector.load %arg17[%c4_151, %c0_152, %c0_153] : memref<9x49x64xf32, #tpu.memory_space<vmem>>, vector<1x49x64xf32>
    %155 = vector.shape_cast %154 : vector<1x49x64xf32> to vector<49x64xf32>
    %156 = vector.shape_cast %153 : vector<49x64xf32> to vector<1x49x64xf32>
    tpu.vector_store %arg17[%c4_151, %c0_152, %c0_153], %156 {strides = array<i32>} : memref<9x49x64xf32, #tpu.memory_space<vmem>>, vector<1x49x64xf32>,
    %157 = vector.extract_strided_slice %129 {offsets = [160, 0], sizes = [32, 64], strides = [1, 1]} : vector<288x64xf32> to vector<32x64xf32>
    %cst_154 = arith.constant dense<0.000000e+00> : vector<49x64xf32>
    %158 = tpu.matmul %131, %157, %cst_154 {dimension_numbers = #tpu.dot_dimension_numbers<[1], [0], [0], [1], [0, 0, 1, 1], [], []>} : vector<49x32xf32>, vector<32x64xf32>, vector<49x64xf32> -> vector<49x64xf32>
    %c5_155 = arith.constant 5 : index
    %c0_156 = arith.constant 0 : index
    %c0_157 = arith.constant 0 : index
    %159 = vector.load %arg17[%c5_155, %c0_156, %c0_157] : memref<9x49x64xf32, #tpu.memory_space<vmem>>, vector<1x49x64xf32>
    %160 = vector.shape_cast %159 : vector<1x49x64xf32> to vector<49x64xf32>
    %161 = vector.shape_cast %158 : vector<49x64xf32> to vector<1x49x64xf32>
    tpu.vector_store %arg17[%c5_155, %c0_156, %c0_157], %161 {strides = array<i32>} : memref<9x49x64xf32, #tpu.memory_space<vmem>>, vector<1x49x64xf32>,
    %162 = vector.extract_strided_slice %129 {offsets = [192, 0], sizes = [32, 64], strides = [1, 1]} : vector<288x64xf32> to vector<32x64xf32>
    %cst_158 = arith.constant dense<0.000000e+00> : vector<49x64xf32>
    %163 = tpu.matmul %131, %162, %cst_158 {dimension_numbers = #tpu.dot_dimension_numbers<[1], [0], [0], [1], [0, 0, 1, 1], [], []>} : vector<49x32xf32>, vector<32x64xf32>, vector<49x64xf32> -> vector<49x64xf32>
    %c6_159 = arith.constant 6 : index
    %c0_160 = arith.constant 0 : index
    %c0_161 = arith.constant 0 : index
    %164 = vector.load %arg17[%c6_159, %c0_160, %c0_161] : memref<9x49x64xf32, #tpu.memory_space<vmem>>, vector<1x49x64xf32>
    %165 = vector.shape_cast %164 : vector<1x49x64xf32> to vector<49x64xf32>
    %166 = vector.shape_cast %163 : vector<49x64xf32> to vector<1x49x64xf32>
    tpu.vector_store %arg17[%c6_159, %c0_160, %c0_161], %166 {strides = array<i32>} : memref<9x49x64xf32, #tpu.memory_space<vmem>>, vector<1x49x64xf32>,
    %167 = vector.extract_strided_slice %129 {offsets = [224, 0], sizes = [32, 64], strides = [1, 1]} : vector<288x64xf32> to vector<32x64xf32>
    %cst_162 = arith.constant dense<0.000000e+00> : vector<49x64xf32>
    %168 = tpu.matmul %131, %167, %cst_162 {dimension_numbers = #tpu.dot_dimension_numbers<[1], [0], [0], [1], [0, 0, 1, 1], [], []>} : vector<49x32xf32>, vector<32x64xf32>, vector<49x64xf32> -> vector<49x64xf32>
    %c7_163 = arith.constant 7 : index
    %c0_164 = arith.constant 0 : index
    %c0_165 = arith.constant 0 : index
    %169 = vector.load %arg17[%c7_163, %c0_164, %c0_165] : memref<9x49x64xf32, #tpu.memory_space<vmem>>, vector<1x49x64xf32>
    %170 = vector.shape_cast %169 : vector<1x49x64xf32> to vector<49x64xf32>
    %171 = vector.shape_cast %168 : vector<49x64xf32> to vector<1x49x64xf32>
    tpu.vector_store %arg17[%c7_163, %c0_164, %c0_165], %171 {strides = array<i32>} : memref<9x49x64xf32, #tpu.memory_space<vmem>>, vector<1x49x64xf32>,
    %172 = vector.extract_strided_slice %129 {offsets = [256, 0], sizes = [32, 64], strides = [1, 1]} : vector<288x64xf32> to vector<32x64xf32>
    %cst_166 = arith.constant dense<0.000000e+00> : vector<49x64xf32>
    %173 = tpu.matmul %131, %172, %cst_166 {dimension_numbers = #tpu.dot_dimension_numbers<[1], [0], [0], [1], [0, 0, 1, 1], [], []>} : vector<49x32xf32>, vector<32x64xf32>, vector<49x64xf32> -> vector<49x64xf32>
    %c8_167 = arith.constant 8 : index
    %c0_168 = arith.constant 0 : index
    %c0_169 = arith.constant 0 : index
    %174 = vector.load %arg17[%c8_167, %c0_168, %c0_169] : memref<9x49x64xf32, #tpu.memory_space<vmem>>, vector<1x49x64xf32>
    %175 = vector.shape_cast %174 : vector<1x49x64xf32> to vector<49x64xf32>
    %176 = vector.shape_cast %173 : vector<49x64xf32> to vector<1x49x64xf32>
    tpu.vector_store %arg17[%c8_167, %c0_168, %c0_169], %176 {strides = array<i32>} : memref<9x49x64xf32, #tpu.memory_space<vmem>>, vector<1x49x64xf32>,
    %cst_170 = arith.constant 0.000000e+00 : f32
    %177 = vector.broadcast %cst_170 : f32 to vector<5x64xf32>
    %c0_171 = arith.constant 0 : index
    %c0_172 = arith.constant 0 : index
    %c0_173 = arith.constant 0 : index
    %178 = vector.load %arg17[%c0_171, %c0_172, %c0_173] : memref<9x49x64xf32, #tpu.memory_space<vmem>>, vector<1x5x64xf32>
    %179 = vector.shape_cast %178 : vector<1x5x64xf32> to vector<5x64xf32>
    %180 = arith.addf %177, %179 : vector<5x64xf32>
    %c1_174 = arith.constant 1 : index
    %c1_175 = arith.constant 1 : index
    %c0_176 = arith.constant 0 : index
    %181 = vector.load %arg17[%c1_174, %c1_175, %c0_176] : memref<9x49x64xf32, #tpu.memory_space<vmem>>, vector<1x5x64xf32>
    %182 = vector.shape_cast %181 : vector<1x5x64xf32> to vector<5x64xf32>
    %183 = arith.addf %180, %182 : vector<5x64xf32>
    %c2_177 = arith.constant 2 : index
    %c2_178 = arith.constant 2 : index
    %c0_179 = arith.constant 0 : index
    %184 = vector.load %arg17[%c2_177, %c2_178, %c0_179] : memref<9x49x64xf32, #tpu.memory_space<vmem>>, vector<1x5x64xf32>
    %185 = vector.shape_cast %184 : vector<1x5x64xf32> to vector<5x64xf32>
    %186 = arith.addf %183, %185 : vector<5x64xf32>
    %c3_180 = arith.constant 3 : index
    %c7_181 = arith.constant 7 : index
    %c0_182 = arith.constant 0 : index
    %187 = vector.load %arg17[%c3_180, %c7_181, %c0_182] : memref<9x49x64xf32, #tpu.memory_space<vmem>>, vector<1x5x64xf32>
    %188 = vector.shape_cast %187 : vector<1x5x64xf32> to vector<5x64xf32>
    %189 = arith.addf %186, %188 : vector<5x64xf32>
    %c4_183 = arith.constant 4 : index
    %c8_184 = arith.constant 8 : index
    %c0_185 = arith.constant 0 : index
    %190 = vector.load %arg17[%c4_183, %c8_184, %c0_185] : memref<9x49x64xf32, #tpu.memory_space<vmem>>, vector<1x5x64xf32>
    %191 = vector.shape_cast %190 : vector<1x5x64xf32> to vector<5x64xf32>
    %192 = arith.addf %189, %191 : vector<5x64xf32>
    %c5_186 = arith.constant 5 : index
    %c9_187 = arith.constant 9 : index
    %c0_188 = arith.constant 0 : index
    %193 = vector.load %arg17[%c5_186, %c9_187, %c0_188] : memref<9x49x64xf32, #tpu.memory_space<vmem>>, vector<1x5x64xf32>
    %194 = vector.shape_cast %193 : vector<1x5x64xf32> to vector<5x64xf32>
    %195 = arith.addf %192, %194 : vector<5x64xf32>
    %c6_189 = arith.constant 6 : index
    %c14_190 = arith.constant 14 : index
    %c0_191 = arith.constant 0 : index
    %196 = vector.load %arg17[%c6_189, %c14_190, %c0_191] : memref<9x49x64xf32, #tpu.memory_space<vmem>>, vector<1x5x64xf32>
    %197 = vector.shape_cast %196 : vector<1x5x64xf32> to vector<5x64xf32>
    %198 = arith.addf %195, %197 : vector<5x64xf32>
    %c7_192 = arith.constant 7 : index
    %c15 = arith.constant 15 : index
    %c0_193 = arith.constant 0 : index
    %199 = vector.load %arg17[%c7_192, %c15, %c0_193] : memref<9x49x64xf32, #tpu.memory_space<vmem>>, vector<1x5x64xf32>
    %200 = vector.shape_cast %199 : vector<1x5x64xf32> to vector<5x64xf32>
    %201 = arith.addf %198, %200 : vector<5x64xf32>
    %c8_194 = arith.constant 8 : index
    %c16 = arith.constant 16 : index
    %c0_195 = arith.constant 0 : index
    %202 = vector.load %arg17[%c8_194, %c16, %c0_195] : memref<9x49x64xf32, #tpu.memory_space<vmem>>, vector<1x5x64xf32>
    %203 = vector.shape_cast %202 : vector<1x5x64xf32> to vector<5x64xf32>
    %204 = arith.addf %201, %203 : vector<5x64xf32>
    %205 = vector.broadcast %130 : vector<1x64xf32> to vector<5x64xf32>
    %206 = arith.addf %204, %205 : vector<5x64xf32>
    %cst_196 = arith.constant 0.000000e+00 : f32
    %207 = vector.broadcast %cst_196 : f32 to vector<5x64xf32>
    %208 = arith.maximumf %206, %207 : vector<5x64xf32>
    %c0_197 = arith.constant 0 : index
    %c0_198 = arith.constant 0 : index
    %c0_199 = arith.constant 0 : index
    %209 = vector.load %arg18[%c0_197, %c0_198, %c0_199] : memref<5x5x64xf32, #tpu.memory_space<vmem>>, vector<1x5x64xf32>
    %210 = vector.shape_cast %209 : vector<1x5x64xf32> to vector<5x64xf32>
    %211 = vector.shape_cast %208 : vector<5x64xf32> to vector<1x5x64xf32>
    tpu.vector_store %arg18[%c0_197, %c0_198, %c0_199], %211 {strides = array<i32>} : memref<5x5x64xf32, #tpu.memory_space<vmem>>, vector<1x5x64xf32>,
    %cst_200 = arith.constant 0.000000e+00 : f32
    %212 = vector.broadcast %cst_200 : f32 to vector<5x64xf32>
    %c0_201 = arith.constant 0 : index
    %c7_202 = arith.constant 7 : index
    %c0_203 = arith.constant 0 : index
    %213 = vector.load %arg17[%c0_201, %c7_202, %c0_203] : memref<9x49x64xf32, #tpu.memory_space<vmem>>, vector<1x5x64xf32>
    %214 = vector.shape_cast %213 : vector<1x5x64xf32> to vector<5x64xf32>
    %215 = arith.addf %212, %214 : vector<5x64xf32>
    %c1_204 = arith.constant 1 : index
    %c8_205 = arith.constant 8 : index
    %c0_206 = arith.constant 0 : index
    %216 = vector.load %arg17[%c1_204, %c8_205, %c0_206] : memref<9x49x64xf32, #tpu.memory_space<vmem>>, vector<1x5x64xf32>
    %217 = vector.shape_cast %216 : vector<1x5x64xf32> to vector<5x64xf32>
    %218 = arith.addf %215, %217 : vector<5x64xf32>
    %c2_207 = arith.constant 2 : index
    %c9_208 = arith.constant 9 : index
    %c0_209 = arith.constant 0 : index
    %219 = vector.load %arg17[%c2_207, %c9_208, %c0_209] : memref<9x49x64xf32, #tpu.memory_space<vmem>>, vector<1x5x64xf32>
    %220 = vector.shape_cast %219 : vector<1x5x64xf32> to vector<5x64xf32>
    %221 = arith.addf %218, %220 : vector<5x64xf32>
    %c3_210 = arith.constant 3 : index
    %c14_211 = arith.constant 14 : index
    %c0_212 = arith.constant 0 : index
    %222 = vector.load %arg17[%c3_210, %c14_211, %c0_212] : memref<9x49x64xf32, #tpu.memory_space<vmem>>, vector<1x5x64xf32>
    %223 = vector.shape_cast %222 : vector<1x5x64xf32> to vector<5x64xf32>
    %224 = arith.addf %221, %223 : vector<5x64xf32>
    %c4_213 = arith.constant 4 : index
    %c15_214 = arith.constant 15 : index
    %c0_215 = arith.constant 0 : index
    %225 = vector.load %arg17[%c4_213, %c15_214, %c0_215] : memref<9x49x64xf32, #tpu.memory_space<vmem>>, vector<1x5x64xf32>
    %226 = vector.shape_cast %225 : vector<1x5x64xf32> to vector<5x64xf32>
    %227 = arith.addf %224, %226 : vector<5x64xf32>
    %c5_216 = arith.constant 5 : index
    %c16_217 = arith.constant 16 : index
    %c0_218 = arith.constant 0 : index
    %228 = vector.load %arg17[%c5_216, %c16_217, %c0_218] : memref<9x49x64xf32, #tpu.memory_space<vmem>>, vector<1x5x64xf32>
    %229 = vector.shape_cast %228 : vector<1x5x64xf32> to vector<5x64xf32>
    %230 = arith.addf %227, %229 : vector<5x64xf32>
    %c6_219 = arith.constant 6 : index
    %c21_220 = arith.constant 21 : index
    %c0_221 = arith.constant 0 : index
    %231 = vector.load %arg17[%c6_219, %c21_220, %c0_221] : memref<9x49x64xf32, #tpu.memory_space<vmem>>, vector<1x5x64xf32>
    %232 = vector.shape_cast %231 : vector<1x5x64xf32> to vector<5x64xf32>
    %233 = arith.addf %230, %232 : vector<5x64xf32>
    %c7_222 = arith.constant 7 : index
    %c22 = arith.constant 22 : index
    %c0_223 = arith.constant 0 : index
    %234 = vector.load %arg17[%c7_222, %c22, %c0_223] : memref<9x49x64xf32, #tpu.memory_space<vmem>>, vector<1x5x64xf32>
    %235 = vector.shape_cast %234 : vector<1x5x64xf32> to vector<5x64xf32>
    %236 = arith.addf %233, %235 : vector<5x64xf32>
    %c8_224 = arith.constant 8 : index
    %c23 = arith.constant 23 : index
    %c0_225 = arith.constant 0 : index
    %237 = vector.load %arg17[%c8_224, %c23, %c0_225] : memref<9x49x64xf32, #tpu.memory_space<vmem>>, vector<1x5x64xf32>
    %238 = vector.shape_cast %237 : vector<1x5x64xf32> to vector<5x64xf32>
    %239 = arith.addf %236, %238 : vector<5x64xf32>
    %240 = vector.broadcast %130 : vector<1x64xf32> to vector<5x64xf32>
    %241 = arith.addf %239, %240 : vector<5x64xf32>
    %cst_226 = arith.constant 0.000000e+00 : f32
    %242 = vector.broadcast %cst_226 : f32 to vector<5x64xf32>
    %243 = arith.maximumf %241, %242 : vector<5x64xf32>
    %c1_227 = arith.constant 1 : index
    %c0_228 = arith.constant 0 : index
    %c0_229 = arith.constant 0 : index
    %244 = vector.load %arg18[%c1_227, %c0_228, %c0_229] : memref<5x5x64xf32, #tpu.memory_space<vmem>>, vector<1x5x64xf32>
    %245 = vector.shape_cast %244 : vector<1x5x64xf32> to vector<5x64xf32>
    %246 = vector.shape_cast %243 : vector<5x64xf32> to vector<1x5x64xf32>
    tpu.vector_store %arg18[%c1_227, %c0_228, %c0_229], %246 {strides = array<i32>} : memref<5x5x64xf32, #tpu.memory_space<vmem>>, vector<1x5x64xf32>,
    %cst_230 = arith.constant 0.000000e+00 : f32
    %247 = vector.broadcast %cst_230 : f32 to vector<5x64xf32>
    %c0_231 = arith.constant 0 : index
    %c14_232 = arith.constant 14 : index
    %c0_233 = arith.constant 0 : index
    %248 = vector.load %arg17[%c0_231, %c14_232, %c0_233] : memref<9x49x64xf32, #tpu.memory_space<vmem>>, vector<1x5x64xf32>
    %249 = vector.shape_cast %248 : vector<1x5x64xf32> to vector<5x64xf32>
    %250 = arith.addf %247, %249 : vector<5x64xf32>
    %c1_234 = arith.constant 1 : index
    %c15_235 = arith.constant 15 : index
    %c0_236 = arith.constant 0 : index
    %251 = vector.load %arg17[%c1_234, %c15_235, %c0_236] : memref<9x49x64xf32, #tpu.memory_space<vmem>>, vector<1x5x64xf32>
    %252 = vector.shape_cast %251 : vector<1x5x64xf32> to vector<5x64xf32>
    %253 = arith.addf %250, %252 : vector<5x64xf32>
    %c2_237 = arith.constant 2 : index
    %c16_238 = arith.constant 16 : index
    %c0_239 = arith.constant 0 : index
    %254 = vector.load %arg17[%c2_237, %c16_238, %c0_239] : memref<9x49x64xf32, #tpu.memory_space<vmem>>, vector<1x5x64xf32>
    %255 = vector.shape_cast %254 : vector<1x5x64xf32> to vector<5x64xf32>
    %256 = arith.addf %253, %255 : vector<5x64xf32>
    %c3_240 = arith.constant 3 : index
    %c21_241 = arith.constant 21 : index
    %c0_242 = arith.constant 0 : index
    %257 = vector.load %arg17[%c3_240, %c21_241, %c0_242] : memref<9x49x64xf32, #tpu.memory_space<vmem>>, vector<1x5x64xf32>
    %258 = vector.shape_cast %257 : vector<1x5x64xf32> to vector<5x64xf32>
    %259 = arith.addf %256, %258 : vector<5x64xf32>
    %c4_243 = arith.constant 4 : index
    %c22_244 = arith.constant 22 : index
    %c0_245 = arith.constant 0 : index
    %260 = vector.load %arg17[%c4_243, %c22_244, %c0_245] : memref<9x49x64xf32, #tpu.memory_space<vmem>>, vector<1x5x64xf32>
    %261 = vector.shape_cast %260 : vector<1x5x64xf32> to vector<5x64xf32>
    %262 = arith.addf %259, %261 : vector<5x64xf32>
    %c5_246 = arith.constant 5 : index
    %c23_247 = arith.constant 23 : index
    %c0_248 = arith.constant 0 : index
    %263 = vector.load %arg17[%c5_246, %c23_247, %c0_248] : memref<9x49x64xf32, #tpu.memory_space<vmem>>, vector<1x5x64xf32>
    %264 = vector.shape_cast %263 : vector<1x5x64xf32> to vector<5x64xf32>
    %265 = arith.addf %262, %264 : vector<5x64xf32>
    %c6_249 = arith.constant 6 : index
    %c28_250 = arith.constant 28 : index
    %c0_251 = arith.constant 0 : index
    %266 = vector.load %arg17[%c6_249, %c28_250, %c0_251] : memref<9x49x64xf32, #tpu.memory_space<vmem>>, vector<1x5x64xf32>
    %267 = vector.shape_cast %266 : vector<1x5x64xf32> to vector<5x64xf32>
    %268 = arith.addf %265, %267 : vector<5x64xf32>
    %c7_252 = arith.constant 7 : index
    %c29 = arith.constant 29 : index
    %c0_253 = arith.constant 0 : index
    %269 = vector.load %arg17[%c7_252, %c29, %c0_253] : memref<9x49x64xf32, #tpu.memory_space<vmem>>, vector<1x5x64xf32>
    %270 = vector.shape_cast %269 : vector<1x5x64xf32> to vector<5x64xf32>
    %271 = arith.addf %268, %270 : vector<5x64xf32>
    %c8_254 = arith.constant 8 : index
    %c30 = arith.constant 30 : index
    %c0_255 = arith.constant 0 : index
    %272 = vector.load %arg17[%c8_254, %c30, %c0_255] : memref<9x49x64xf32, #tpu.memory_space<vmem>>, vector<1x5x64xf32>
    %273 = vector.shape_cast %272 : vector<1x5x64xf32> to vector<5x64xf32>
    %274 = arith.addf %271, %273 : vector<5x64xf32>
    %275 = vector.broadcast %130 : vector<1x64xf32> to vector<5x64xf32>
    %276 = arith.addf %274, %275 : vector<5x64xf32>
    %cst_256 = arith.constant 0.000000e+00 : f32
    %277 = vector.broadcast %cst_256 : f32 to vector<5x64xf32>
    %278 = arith.maximumf %276, %277 : vector<5x64xf32>
    %c2_257 = arith.constant 2 : index
    %c0_258 = arith.constant 0 : index
    %c0_259 = arith.constant 0 : index
    %279 = vector.load %arg18[%c2_257, %c0_258, %c0_259] : memref<5x5x64xf32, #tpu.memory_space<vmem>>, vector<1x5x64xf32>
    %280 = vector.shape_cast %279 : vector<1x5x64xf32> to vector<5x64xf32>
    %281 = vector.shape_cast %278 : vector<5x64xf32> to vector<1x5x64xf32>
    tpu.vector_store %arg18[%c2_257, %c0_258, %c0_259], %281 {strides = array<i32>} : memref<5x5x64xf32, #tpu.memory_space<vmem>>, vector<1x5x64xf32>,
    %cst_260 = arith.constant 0.000000e+00 : f32
    %282 = vector.broadcast %cst_260 : f32 to vector<5x64xf32>
    %c0_261 = arith.constant 0 : index
    %c21_262 = arith.constant 21 : index
    %c0_263 = arith.constant 0 : index
    %283 = vector.load %arg17[%c0_261, %c21_262, %c0_263] : memref<9x49x64xf32, #tpu.memory_space<vmem>>, vector<1x5x64xf32>
    %284 = vector.shape_cast %283 : vector<1x5x64xf32> to vector<5x64xf32>
    %285 = arith.addf %282, %284 : vector<5x64xf32>
    %c1_264 = arith.constant 1 : index
    %c22_265 = arith.constant 22 : index
    %c0_266 = arith.constant 0 : index
    %286 = vector.load %arg17[%c1_264, %c22_265, %c0_266] : memref<9x49x64xf32, #tpu.memory_space<vmem>>, vector<1x5x64xf32>
    %287 = vector.shape_cast %286 : vector<1x5x64xf32> to vector<5x64xf32>
    %288 = arith.addf %285, %287 : vector<5x64xf32>
    %c2_267 = arith.constant 2 : index
    %c23_268 = arith.constant 23 : index
    %c0_269 = arith.constant 0 : index
    %289 = vector.load %arg17[%c2_267, %c23_268, %c0_269] : memref<9x49x64xf32, #tpu.memory_space<vmem>>, vector<1x5x64xf32>
    %290 = vector.shape_cast %289 : vector<1x5x64xf32> to vector<5x64xf32>
    %291 = arith.addf %288, %290 : vector<5x64xf32>
    %c3_270 = arith.constant 3 : index
    %c28_271 = arith.constant 28 : index
    %c0_272 = arith.constant 0 : index
    %292 = vector.load %arg17[%c3_270, %c28_271, %c0_272] : memref<9x49x64xf32, #tpu.memory_space<vmem>>, vector<1x5x64xf32>
    %293 = vector.shape_cast %292 : vector<1x5x64xf32> to vector<5x64xf32>
    %294 = arith.addf %291, %293 : vector<5x64xf32>
    %c4_273 = arith.constant 4 : index
    %c29_274 = arith.constant 29 : index
    %c0_275 = arith.constant 0 : index
    %295 = vector.load %arg17[%c4_273, %c29_274, %c0_275] : memref<9x49x64xf32, #tpu.memory_space<vmem>>, vector<1x5x64xf32>
    %296 = vector.shape_cast %295 : vector<1x5x64xf32> to vector<5x64xf32>
    %297 = arith.addf %294, %296 : vector<5x64xf32>
    %c5_276 = arith.constant 5 : index
    %c30_277 = arith.constant 30 : index
    %c0_278 = arith.constant 0 : index
    %298 = vector.load %arg17[%c5_276, %c30_277, %c0_278] : memref<9x49x64xf32, #tpu.memory_space<vmem>>, vector<1x5x64xf32>
    %299 = vector.shape_cast %298 : vector<1x5x64xf32> to vector<5x64xf32>
    %300 = arith.addf %297, %299 : vector<5x64xf32>
    %c6_279 = arith.constant 6 : index
    %c35_280 = arith.constant 35 : index
    %c0_281 = arith.constant 0 : index
    %301 = vector.load %arg17[%c6_279, %c35_280, %c0_281] : memref<9x49x64xf32, #tpu.memory_space<vmem>>, vector<1x5x64xf32>
    %302 = vector.shape_cast %301 : vector<1x5x64xf32> to vector<5x64xf32>
    %303 = arith.addf %300, %302 : vector<5x64xf32>
    %c7_282 = arith.constant 7 : index
    %c36 = arith.constant 36 : index
    %c0_283 = arith.constant 0 : index
    %304 = vector.load %arg17[%c7_282, %c36, %c0_283] : memref<9x49x64xf32, #tpu.memory_space<vmem>>, vector<1x5x64xf32>
    %305 = vector.shape_cast %304 : vector<1x5x64xf32> to vector<5x64xf32>
    %306 = arith.addf %303, %305 : vector<5x64xf32>
    %c8_284 = arith.constant 8 : index
    %c37 = arith.constant 37 : index
    %c0_285 = arith.constant 0 : index
    %307 = vector.load %arg17[%c8_284, %c37, %c0_285] : memref<9x49x64xf32, #tpu.memory_space<vmem>>, vector<1x5x64xf32>
    %308 = vector.shape_cast %307 : vector<1x5x64xf32> to vector<5x64xf32>
    %309 = arith.addf %306, %308 : vector<5x64xf32>
    %310 = vector.broadcast %130 : vector<1x64xf32> to vector<5x64xf32>
    %311 = arith.addf %309, %310 : vector<5x64xf32>
    %cst_286 = arith.constant 0.000000e+00 : f32
    %312 = vector.broadcast %cst_286 : f32 to vector<5x64xf32>
    %313 = arith.maximumf %311, %312 : vector<5x64xf32>
    %c3_287 = arith.constant 3 : index
    %c0_288 = arith.constant 0 : index
    %c0_289 = arith.constant 0 : index
    %314 = vector.load %arg18[%c3_287, %c0_288, %c0_289] : memref<5x5x64xf32, #tpu.memory_space<vmem>>, vector<1x5x64xf32>
    %315 = vector.shape_cast %314 : vector<1x5x64xf32> to vector<5x64xf32>
    %316 = vector.shape_cast %313 : vector<5x64xf32> to vector<1x5x64xf32>
    tpu.vector_store %arg18[%c3_287, %c0_288, %c0_289], %316 {strides = array<i32>} : memref<5x5x64xf32, #tpu.memory_space<vmem>>, vector<1x5x64xf32>,
    %cst_290 = arith.constant 0.000000e+00 : f32
    %317 = vector.broadcast %cst_290 : f32 to vector<5x64xf32>
    %c0_291 = arith.constant 0 : index
    %c28_292 = arith.constant 28 : index
    %c0_293 = arith.constant 0 : index
    %318 = vector.load %arg17[%c0_291, %c28_292, %c0_293] : memref<9x49x64xf32, #tpu.memory_space<vmem>>, vector<1x5x64xf32>
    %319 = vector.shape_cast %318 : vector<1x5x64xf32> to vector<5x64xf32>
    %320 = arith.addf %317, %319 : vector<5x64xf32>
    %c1_294 = arith.constant 1 : index
    %c29_295 = arith.constant 29 : index
    %c0_296 = arith.constant 0 : index
    %321 = vector.load %arg17[%c1_294, %c29_295, %c0_296] : memref<9x49x64xf32, #tpu.memory_space<vmem>>, vector<1x5x64xf32>
    %322 = vector.shape_cast %321 : vector<1x5x64xf32> to vector<5x64xf32>
    %323 = arith.addf %320, %322 : vector<5x64xf32>
    %c2_297 = arith.constant 2 : index
    %c30_298 = arith.constant 30 : index
    %c0_299 = arith.constant 0 : index
    %324 = vector.load %arg17[%c2_297, %c30_298, %c0_299] : memref<9x49x64xf32, #tpu.memory_space<vmem>>, vector<1x5x64xf32>
    %325 = vector.shape_cast %324 : vector<1x5x64xf32> to vector<5x64xf32>
    %326 = arith.addf %323, %325 : vector<5x64xf32>
    %c3_300 = arith.constant 3 : index
    %c35_301 = arith.constant 35 : index
    %c0_302 = arith.constant 0 : index
    %327 = vector.load %arg17[%c3_300, %c35_301, %c0_302] : memref<9x49x64xf32, #tpu.memory_space<vmem>>, vector<1x5x64xf32>
    %328 = vector.shape_cast %327 : vector<1x5x64xf32> to vector<5x64xf32>
    %329 = arith.addf %326, %328 : vector<5x64xf32>
    %c4_303 = arith.constant 4 : index
    %c36_304 = arith.constant 36 : index
    %c0_305 = arith.constant 0 : index
    %330 = vector.load %arg17[%c4_303, %c36_304, %c0_305] : memref<9x49x64xf32, #tpu.memory_space<vmem>>, vector<1x5x64xf32>
    %331 = vector.shape_cast %330 : vector<1x5x64xf32> to vector<5x64xf32>
    %332 = arith.addf %329, %331 : vector<5x64xf32>
    %c5_306 = arith.constant 5 : index
    %c37_307 = arith.constant 37 : index
    %c0_308 = arith.constant 0 : index
    %333 = vector.load %arg17[%c5_306, %c37_307, %c0_308] : memref<9x49x64xf32, #tpu.memory_space<vmem>>, vector<1x5x64xf32>
    %334 = vector.shape_cast %333 : vector<1x5x64xf32> to vector<5x64xf32>
    %335 = arith.addf %332, %334 : vector<5x64xf32>
    %c6_309 = arith.constant 6 : index
    %c42_310 = arith.constant 42 : index
    %c0_311 = arith.constant 0 : index
    %336 = vector.load %arg17[%c6_309, %c42_310, %c0_311] : memref<9x49x64xf32, #tpu.memory_space<vmem>>, vector<1x5x64xf32>
    %337 = vector.shape_cast %336 : vector<1x5x64xf32> to vector<5x64xf32>
    %338 = arith.addf %335, %337 : vector<5x64xf32>
    %c7_312 = arith.constant 7 : index
    %c43 = arith.constant 43 : index
    %c0_313 = arith.constant 0 : index
    %339 = vector.load %arg17[%c7_312, %c43, %c0_313] : memref<9x49x64xf32, #tpu.memory_space<vmem>>, vector<1x5x64xf32>
    %340 = vector.shape_cast %339 : vector<1x5x64xf32> to vector<5x64xf32>
    %341 = arith.addf %338, %340 : vector<5x64xf32>
    %c8_314 = arith.constant 8 : index
    %c44 = arith.constant 44 : index
    %c0_315 = arith.constant 0 : index
    %342 = vector.load %arg17[%c8_314, %c44, %c0_315] : memref<9x49x64xf32, #tpu.memory_space<vmem>>, vector<1x5x64xf32>
    %343 = vector.shape_cast %342 : vector<1x5x64xf32> to vector<5x64xf32>
    %344 = arith.addf %341, %343 : vector<5x64xf32>
    %345 = vector.broadcast %130 : vector<1x64xf32> to vector<5x64xf32>
    %346 = arith.addf %344, %345 : vector<5x64xf32>
    %cst_316 = arith.constant 0.000000e+00 : f32
    %347 = vector.broadcast %cst_316 : f32 to vector<5x64xf32>
    %348 = arith.maximumf %346, %347 : vector<5x64xf32>
    %c4_317 = arith.constant 4 : index
    %c0_318 = arith.constant 0 : index
    %c0_319 = arith.constant 0 : index
    %349 = vector.load %arg18[%c4_317, %c0_318, %c0_319] : memref<5x5x64xf32, #tpu.memory_space<vmem>>, vector<1x5x64xf32>
    %350 = vector.shape_cast %349 : vector<1x5x64xf32> to vector<5x64xf32>
    %351 = vector.shape_cast %348 : vector<5x64xf32> to vector<1x5x64xf32>
    tpu.vector_store %arg18[%c4_317, %c0_318, %c0_319], %351 {strides = array<i32>} : memref<5x5x64xf32, #tpu.memory_space<vmem>>, vector<1x5x64xf32>,
    %c0_320 = arith.constant 0 : index
    %c0_321 = arith.constant 0 : index
    %c0_322 = arith.constant 0 : index
    %352 = vector.load %arg18[%c0_320, %c0_321, %c0_322] : memref<5x5x64xf32, #tpu.memory_space<vmem>>, vector<1x5x64xf32>
    %353 = vector.shape_cast %352 : vector<1x5x64xf32> to vector<5x64xf32>
    %c1_323 = arith.constant 1 : index
    %c0_324 = arith.constant 0 : index
    %c0_325 = arith.constant 0 : index
    %354 = vector.load %arg18[%c1_323, %c0_324, %c0_325] : memref<5x5x64xf32, #tpu.memory_space<vmem>>, vector<1x5x64xf32>
    %355 = vector.shape_cast %354 : vector<1x5x64xf32> to vector<5x64xf32>
    %356 = arith.maximumf %353, %355 : vector<5x64xf32>
    %c0_326 = arith.constant 0 : index
    %c0_327 = arith.constant 0 : index
    %c0_328 = arith.constant 0 : index
    %357 = vector.load %arg19[%c0_326, %c0_327, %c0_328] : memref<2x5x64xf32, #tpu.memory_space<vmem>>, vector<1x5x64xf32>
    %358 = vector.shape_cast %357 : vector<1x5x64xf32> to vector<5x64xf32>
    %359 = vector.shape_cast %356 : vector<5x64xf32> to vector<1x5x64xf32>
    tpu.vector_store %arg19[%c0_326, %c0_327, %c0_328], %359 {strides = array<i32>} : memref<2x5x64xf32, #tpu.memory_space<vmem>>, vector<1x5x64xf32>,
    %c2_329 = arith.constant 2 : index
    %c0_330 = arith.constant 0 : index
    %c0_331 = arith.constant 0 : index
    %360 = vector.load %arg18[%c2_329, %c0_330, %c0_331] : memref<5x5x64xf32, #tpu.memory_space<vmem>>, vector<1x5x64xf32>
    %361 = vector.shape_cast %360 : vector<1x5x64xf32> to vector<5x64xf32>
    %c3_332 = arith.constant 3 : index
    %c0_333 = arith.constant 0 : index
    %c0_334 = arith.constant 0 : index
    %362 = vector.load %arg18[%c3_332, %c0_333, %c0_334] : memref<5x5x64xf32, #tpu.memory_space<vmem>>, vector<1x5x64xf32>
    %363 = vector.shape_cast %362 : vector<1x5x64xf32> to vector<5x64xf32>
    %364 = arith.maximumf %361, %363 : vector<5x64xf32>
    %c1_335 = arith.constant 1 : index
    %c0_336 = arith.constant 0 : index
    %c0_337 = arith.constant 0 : index
    %365 = vector.load %arg19[%c1_335, %c0_336, %c0_337] : memref<2x5x64xf32, #tpu.memory_space<vmem>>, vector<1x5x64xf32>
    %366 = vector.shape_cast %365 : vector<1x5x64xf32> to vector<5x64xf32>
    %367 = vector.shape_cast %364 : vector<5x64xf32> to vector<1x5x64xf32>
    tpu.vector_store %arg19[%c1_335, %c0_336, %c0_337], %367 {strides = array<i32>} : memref<2x5x64xf32, #tpu.memory_space<vmem>>, vector<1x5x64xf32>,
    %c0_338 = arith.constant 0 : index
    %c0_339 = arith.constant 0 : index
    %c0_340 = arith.constant 0 : index
    %368 = vector.load %arg19[%c0_338, %c0_339, %c0_340] : memref<2x5x64xf32, #tpu.memory_space<vmem>>, vector<2x1x64xf32>
    %369 = vector.shape_cast %368 : vector<2x1x64xf32> to vector<2x64xf32>
    %c0_341 = arith.constant 0 : index
    %c1_342 = arith.constant 1 : index
    %c0_343 = arith.constant 0 : index
    %370 = vector.load %arg19[%c0_341, %c1_342, %c0_343] : memref<2x5x64xf32, #tpu.memory_space<vmem>>, vector<2x1x64xf32>
    %371 = vector.shape_cast %370 : vector<2x1x64xf32> to vector<2x64xf32>
    %372 = arith.maximumf %369, %371 : vector<2x64xf32>
    %c0_344 = arith.constant 0 : index
    %c0_345 = arith.constant 0 : index
    %c0_346 = arith.constant 0 : index
    %373 = vector.load %arg20[%c0_344, %c0_345, %c0_346] : memref<2x2x64xf32, #tpu.memory_space<vmem>>, vector<2x1x64xf32>
    %374 = vector.shape_cast %373 : vector<2x1x64xf32> to vector<2x64xf32>
    %375 = vector.shape_cast %372 : vector<2x64xf32> to vector<2x1x64xf32>
    tpu.vector_store %arg20[%c0_344, %c0_345, %c0_346], %375 {strides = array<i32>} : memref<2x2x64xf32, #tpu.memory_space<vmem>>, vector<2x1x64xf32>,
    %c0_347 = arith.constant 0 : index
    %c2_348 = arith.constant 2 : index
    %c0_349 = arith.constant 0 : index
    %376 = vector.load %arg19[%c0_347, %c2_348, %c0_349] : memref<2x5x64xf32, #tpu.memory_space<vmem>>, vector<2x1x64xf32>
    %377 = vector.shape_cast %376 : vector<2x1x64xf32> to vector<2x64xf32>
    %c0_350 = arith.constant 0 : index
    %c3_351 = arith.constant 3 : index
    %c0_352 = arith.constant 0 : index
    %378 = vector.load %arg19[%c0_350, %c3_351, %c0_352] : memref<2x5x64xf32, #tpu.memory_space<vmem>>, vector<2x1x64xf32>
    %379 = vector.shape_cast %378 : vector<2x1x64xf32> to vector<2x64xf32>
    %380 = arith.maximumf %377, %379 : vector<2x64xf32>
    %c0_353 = arith.constant 0 : index
    %c1_354 = arith.constant 1 : index
    %c0_355 = arith.constant 0 : index
    %381 = vector.load %arg20[%c0_353, %c1_354, %c0_355] : memref<2x2x64xf32, #tpu.memory_space<vmem>>, vector<2x1x64xf32>
    %382 = vector.shape_cast %381 : vector<2x1x64xf32> to vector<2x64xf32>
    %383 = vector.shape_cast %380 : vector<2x64xf32> to vector<2x1x64xf32>
    tpu.vector_store %arg20[%c0_353, %c1_354, %c0_355], %383 {strides = array<i32>} : memref<2x2x64xf32, #tpu.memory_space<vmem>>, vector<2x1x64xf32>,
    %c0_356 = arith.constant 0 : index
    %c0_357 = arith.constant 0 : index
    %384 = vector.load %arg6[%c0_356, %c0_357] : memref<256x32xf32, #tpu.memory_space<vmem>>, vector<256x32xf32>
    %c0_358 = arith.constant 0 : index
    %c0_359 = arith.constant 0 : index
    %385 = vector.load %arg7[%c0_358, %c0_359] : memref<1x32xf32, #tpu.memory_space<vmem>>, vector<1x32xf32>
    %c0_360 = arith.constant 0 : index
    %c0_361 = arith.constant 0 : index
    %c0_362 = arith.constant 0 : index
    %386 = vector.load %arg20[%c0_360, %c0_361, %c0_362] : memref<2x2x64xf32, #tpu.memory_space<vmem>>, vector<1x2x64xf32>
    %387 = vector.shape_cast %386 : vector<1x2x64xf32> to vector<2x64xf32>
    %388 = vector.extract_strided_slice %387 {offsets = [0, 0], sizes = [1, 64], strides = [1, 1]} : vector<2x64xf32> to vector<1x64xf32>
    %389 = vector.extract_strided_slice %384 {offsets = [0, 0], sizes = [64, 32], strides = [1, 1]} : vector<256x32xf32> to vector<64x32xf32>
    %cst_363 = arith.constant dense<0.000000e+00> : vector<1x32xf32>
    %390 = tpu.matmul %388, %389, %cst_363 {dimension_numbers = #tpu.dot_dimension_numbers<[1], [0], [0], [1], [0, 0, 1, 1], [], []>} : vector<1x64xf32>, vector<64x32xf32>, vector<1x32xf32> -> vector<1x32xf32>
    %391 = arith.addf %385, %390 : vector<1x32xf32>
    %392 = vector.extract_strided_slice %387 {offsets = [1, 0], sizes = [1, 64], strides = [1, 1]} : vector<2x64xf32> to vector<1x64xf32>
    %393 = vector.extract_strided_slice %384 {offsets = [64, 0], sizes = [64, 32], strides = [1, 1]} : vector<256x32xf32> to vector<64x32xf32>
    %cst_364 = arith.constant dense<0.000000e+00> : vector<1x32xf32>
    %394 = tpu.matmul %392, %393, %cst_364 {dimension_numbers = #tpu.dot_dimension_numbers<[1], [0], [0], [1], [0, 0, 1, 1], [], []>} : vector<1x64xf32>, vector<64x32xf32>, vector<1x32xf32> -> vector<1x32xf32>
    %395 = arith.addf %391, %394 : vector<1x32xf32>
    %c1_365 = arith.constant 1 : index
    %c0_366 = arith.constant 0 : index
    %c0_367 = arith.constant 0 : index
    %396 = vector.load %arg20[%c1_365, %c0_366, %c0_367] : memref<2x2x64xf32, #tpu.memory_space<vmem>>, vector<1x2x64xf32>
    %397 = vector.shape_cast %396 : vector<1x2x64xf32> to vector<2x64xf32>
    %398 = vector.extract_strided_slice %397 {offsets = [0, 0], sizes = [1, 64], strides = [1, 1]} : vector<2x64xf32> to vector<1x64xf32>
    %399 = vector.extract_strided_slice %384 {offsets = [128, 0], sizes = [64, 32], strides = [1, 1]} : vector<256x32xf32> to vector<64x32xf32>
    %cst_368 = arith.constant dense<0.000000e+00> : vector<1x32xf32>
    %400 = tpu.matmul %398, %399, %cst_368 {dimension_numbers = #tpu.dot_dimension_numbers<[1], [0], [0], [1], [0, 0, 1, 1], [], []>} : vector<1x64xf32>, vector<64x32xf32>, vector<1x32xf32> -> vector<1x32xf32>
    %401 = arith.addf %395, %400 : vector<1x32xf32>
    %402 = vector.extract_strided_slice %397 {offsets = [1, 0], sizes = [1, 64], strides = [1, 1]} : vector<2x64xf32> to vector<1x64xf32>
    %403 = vector.extract_strided_slice %384 {offsets = [192, 0], sizes = [64, 32], strides = [1, 1]} : vector<256x32xf32> to vector<64x32xf32>
    %cst_369 = arith.constant dense<0.000000e+00> : vector<1x32xf32>
    %404 = tpu.matmul %402, %403, %cst_369 {dimension_numbers = #tpu.dot_dimension_numbers<[1], [0], [0], [1], [0, 0, 1, 1], [], []>} : vector<1x64xf32>, vector<64x32xf32>, vector<1x32xf32> -> vector<1x32xf32>
    %405 = arith.addf %401, %404 : vector<1x32xf32>
    %cst_370 = arith.constant 0.000000e+00 : f32
    %406 = vector.broadcast %cst_370 : f32 to vector<1x32xf32>
    %407 = arith.maximumf %405, %406 : vector<1x32xf32>
    %c0_371 = arith.constant 0 : index
    %c0_372 = arith.constant 0 : index
    %408 = vector.load %arg8[%c0_371, %c0_372] : memref<32x32xf32, #tpu.memory_space<vmem>>, vector<32x32xf32>
    %cst_373 = arith.constant dense<0.000000e+00> : vector<1x32xf32>
    %409 = tpu.matmul %407, %408, %cst_373 {dimension_numbers = #tpu.dot_dimension_numbers<[1], [0], [0], [1], [0, 0, 1, 1], [], []>} : vector<1x32xf32>, vector<32x32xf32>, vector<1x32xf32> -> vector<1x32xf32>
    %c0_374 = arith.constant 0 : index
    %c0_375 = arith.constant 0 : index
    %410 = vector.load %arg9[%c0_374, %c0_375] : memref<1x32xf32, #tpu.memory_space<vmem>>, vector<1x32xf32>
    %411 = arith.addf %409, %410 : vector<1x32xf32>
    %cst_376 = arith.constant 0.000000e+00 : f32
    %412 = vector.broadcast %cst_376 : f32 to vector<1x32xf32>
    %413 = arith.maximumf %411, %412 : vector<1x32xf32>
    %c0_377 = arith.constant 0 : index
    %c0_378 = arith.constant 0 : index
    %414 = vector.load %arg10[%c0_377, %c0_378] : memref<32x10xf32, #tpu.memory_space<vmem>>, vector<32x10xf32>
    %cst_379 = arith.constant dense<0.000000e+00> : vector<1x10xf32>
    %415 = tpu.matmul %413, %414, %cst_379 {dimension_numbers = #tpu.dot_dimension_numbers<[1], [0], [0], [1], [0, 0, 1, 1], [], []>} : vector<1x32xf32>, vector<32x10xf32>, vector<1x10xf32> -> vector<1x10xf32>
    %c0_380 = arith.constant 0 : index
    %c0_381 = arith.constant 0 : index
    %416 = vector.load %arg11[%c0_380, %c0_381] : memref<1x10xf32, #tpu.memory_space<vmem>>, vector<1x10xf32>
    %417 = arith.addf %415, %416 : vector<1x10xf32>
    %c0_382 = arith.constant 0 : index
    %c0_383 = arith.constant 0 : index
    %c0_384 = arith.constant 0 : index
    %418 = vector.load %arg12[%c0_382, %c0_383, %c0_384] : memref<1x1x10xf32, #tpu.memory_space<vmem>>, vector<1x1x10xf32>
    %419 = vector.shape_cast %418 : vector<1x1x10xf32> to vector<1x10xf32>
    %420 = vector.shape_cast %417 : vector<1x10xf32> to vector<1x1x10xf32>
    tpu.vector_store %arg12[%c0_382, %c0_383, %c0_384], %420 {strides = array<i32>} : memref<1x1x10xf32, #tpu.memory_space<vmem>>, vector<1x1x10xf32>,
    return
  }
  func.func @transform_0(%arg0: i32) -> (i32, i32, i32) {
    %c0_i32 = arith.constant 0 : i32
    %c0_i32_0 = arith.constant 0 : i32
    %c0_i32_1 = arith.constant 0 : i32
    return %arg0, %c0_i32, %c0_i32_0 : i32, i32, i32
  }
  func.func @transform_1(%arg0: i32) -> (i32, i32) {
    %c0_i32 = arith.constant 0 : i32
    %c0_i32_0 = arith.constant 0 : i32
    %c0_i32_1 = arith.constant 0 : i32
    return %c0_i32, %c0_i32_0 : i32, i32
  }
  func.func @transform_2(%arg0: i32) -> (i32, i32) {
    %c0_i32 = arith.constant 0 : i32
    %c0_i32_0 = arith.constant 0 : i32
    %c0_i32_1 = arith.constant 0 : i32
    return %c0_i32, %c0_i32_0 : i32, i32
  }
  func.func @transform_3(%arg0: i32) -> (i32, i32) {
    %c0_i32 = arith.constant 0 : i32
    %c0_i32_0 = arith.constant 0 : i32
    %c0_i32_1 = arith.constant 0 : i32
    return %c0_i32, %c0_i32_0 : i32, i32
  }
  func.func @transform_4(%arg0: i32) -> (i32, i32) {
    %c0_i32 = arith.constant 0 : i32
    %c0_i32_0 = arith.constant 0 : i32
    %c0_i32_1 = arith.constant 0 : i32
    return %c0_i32, %c0_i32_0 : i32, i32
  }
  func.func @transform_5(%arg0: i32) -> (i32, i32) {
    %c0_i32 = arith.constant 0 : i32
    %c0_i32_0 = arith.constant 0 : i32
    %c0_i32_1 = arith.constant 0 : i32
    return %c0_i32, %c0_i32_0 : i32, i32
  }
  func.func @transform_6(%arg0: i32) -> (i32, i32) {
    %c0_i32 = arith.constant 0 : i32
    %c0_i32_0 = arith.constant 0 : i32
    %c0_i32_1 = arith.constant 0 : i32
    return %c0_i32, %c0_i32_0 : i32, i32
  }
  func.func @transform_7(%arg0: i32) -> (i32, i32) {
    %c0_i32 = arith.constant 0 : i32
    %c0_i32_0 = arith.constant 0 : i32
    %c0_i32_1 = arith.constant 0 : i32
    return %c0_i32, %c0_i32_0 : i32, i32
  }
  func.func @transform_8(%arg0: i32) -> (i32, i32) {
    %c0_i32 = arith.constant 0 : i32
    %c0_i32_0 = arith.constant 0 : i32
    %c0_i32_1 = arith.constant 0 : i32
    return %c0_i32, %c0_i32_0 : i32, i32
  }
  func.func @transform_9(%arg0: i32) -> (i32, i32) {
    %c0_i32 = arith.constant 0 : i32
    %c0_i32_0 = arith.constant 0 : i32
    %c0_i32_1 = arith.constant 0 : i32
    return %c0_i32, %c0_i32_0 : i32, i32
  }
  func.func @transform_10(%arg0: i32) -> (i32, i32) {
    %c0_i32 = arith.constant 0 : i32
    %c0_i32_0 = arith.constant 0 : i32
    %c0_i32_1 = arith.constant 0 : i32
    return %c0_i32, %c0_i32_0 : i32, i32
  }
  func.func @transform_11(%arg0: i32) -> (i32, i32, i32) {
    %c0_i32 = arith.constant 0 : i32
    %c0_i32_0 = arith.constant 0 : i32
    %c0_i32_1 = arith.constant 0 : i32
    return %arg0, %c0_i32, %c0_i32_0 : i32, i32, i32
  }
}

</mosaic_0001>

<bundles_post_ra>
// kernel: fwd.1
= control target key start
LH: loop header
LB: loop body
LE: loop exit
PB: predicated region body
PF: predicated region fallthrough
CT: control target
= control target key end

     0   :  { %s4722_s0 = inlined_call_operand.vmem [shape: f32[2,196,9], index: 0, kind: input, shape index: {}]   ;;  %s4723_s1 = inlined_call_operand.vmem [shape: f32[9,32], index: 1, kind: input, shape index: {}]   ;;  %s4724_s2 = inlined_call_operand.vmem [shape: f32[1,32], index: 2, kind: input, shape index: {}]   ;;  %s4725_s3 = inlined_call_operand.vmem [shape: f32[288,64], index: 3, kind: input, shape index: {}]   ;;  %s4726_s4 = inlined_call_operand.vmem [shape: f32[1,64], index: 4, kind: input, shape index: {}]   ;;  %s4727_s5 = inlined_call_operand.vmem [shape: f32[256,32], index: 5, kind: input, shape index: {}]   ;;  %s4728_s6 = inlined_call_operand.vmem [shape: f32[1,32], index: 6, kind: input, shape index: {}]   ;;  %s4729_s7 = inlined_call_operand.vmem [shape: f32[32,32], index: 7, kind: input, shape index: {}]   ;;  %s4730_s8 = inlined_call_operand.vmem [shape: f32[1,32], index: 8, kind: input, shape index: {}]   ;;  %s4731_s9 = inlined_call_operand.vmem [shape: f32[32,10], index: 9, kind: input, shape index: {}]   ;;  %s4732_s10 = inlined_call_operand.vmem [shape: f32[1,10], index: 10, kind: input, shape index: {}]   ;;  %s4733_s11 = inlined_call_operand.hbm [shape: f32[2,1,10], index: 11, kind: output, shape index: {}]  }
   0x1   :  { %4734 = sst [smem:[#allocation13_spill]] %s4722_s0 }
   0x2   :  { %16 = vsyncpa [#allocation11], 0 }
   0x3   :  { %18 = vsyncpa [#allocation11 + $0x1], 0  ;;  %s3772_s17 = smov 0   ;;  %s3774_s18 = smov 0  }
   0x4   :  { %s3776_s19 = smov 0   ;;  %s3778_s20 = smov 0  }
   0x5 LB: > { %s3793_s21 = sadd.s32 4294967295, %s3705_s20   ;;  %s2760_s22 = sadd.s32 4294967294, %s3705_s20   ;;  %s3705_s20 = sphi %s3778_s20, %s4741_s20   ;;  %s3701_s19 = sphi %s3776_s19, %s4740_s19   ;;  %s3697_s18 = sphi %s3774_s18, %s4739_s18   ;;  %s3693_s17 = sphi %s3772_s17, %s4738_s17  }
   0x6   : > { %s3797_s23 = sadd.s32 1, %s3705_s20   ;;  %s267_s24 = sadd.s32 1, %s3701_s19 }
   0x7   : > { %s264_s25 = ssub.s32 %s3705_s20, %s3797_s23  ;;  %p277_p0 = scmp.ne.s32.totalorder %s3701_s19, %s3697_s18 }
   0x8   : > { %p265_p1 = scmp.eq.s32.totalorder %s264_s25, 0  ;;  %p278_p2 = scmp.eq.s32.totalorder %s3793_s21, 1 }
   0x9   : > { %p283_p3 = scmp.ne.s32.totalorder %s3697_s18, %s3693_s17  ;;  %p284_p4 = scmp.eq.s32.totalorder %s2760_s22, 1 }
   0xa   : > { %s3808_s26 = scalar_select %p265_p1, %s3701_s19, %s267_s24  }
   0xb   : > { %p3810_p5 = por %p278_p2, %p277_p0  ;;  %p3814_p6 = por %p284_p4, %p283_p3 }
   0xc   : > { %p2763_p7 = scmp.ge.s32.totalorder %s3705_s20, 1  ;;  %p340_p8 = scmp.lt.s32.totalorder %s3705_s20, 3 }
   0xe   : > { %p341_p9 = pnand %p2763_p7, %p340_p8 }
   0xf   : > { %v409_v0 = vld [vmem:[%s4723_s1] sm:$0xff] (!%p341_p9)  ;;  %v410_v1 = vld [vmem:[%s4723_s1 + $0x8] sm:$0x1] (!%p341_p9)  ;;  %vm494_vm0 = vcmask (!%p341_p9), 1040384   ;;  %v3707_v2 = vmov (!%p341_p9), 0.0|0.0   ;;  %vm3708_vm1 = vmmov (!%p341_p9), 1  }
  0x10   : > { %344 = sbr.rel (%p341_p9) target bundleno = 1476 (0x5c4), region = 64  ;;  %3475 = vmatprep.subr.bf16.mxu0 (!%p341_p9), %v3707_v2  ;;  %v3476_v3 = vpack.c.bf16 (!%p341_p9), %v410_v1, %v409_v0  ;;  %vm3477_vm2 = vmpackc.low (!%p341_p9), %vm494_vm0, %vm3708_vm1  ;;  %p379_p10 = scmp.lt.s32.totalorder (!%p341_p9), %s3793_s21, 1  ;;  %3479 = vmatprep.subr.bf16.mxu1 (!%p341_p9), %v3707_v2  ;;  %vm3709_vm3 = vmmov (!%p341_p9), 0   ;;  %v3710_v4 = vmov (!%p341_p9), 0.0   ;;  %vm418_vm4 = vcmask (!%p341_p9), 72704   ;;  %v1021_v30 = vld [vmem:[%s4725_s3] sm:$0xff] (!%p341_p9) }
  0x11   : > { %3041 = vmatprep.mubr.msk.f32.mxu0 (!%p341_p9), %vm3709_vm3, %v3710_v4  ;;  %3124 = vmatprep.mubr.msk.f32.mxu1 (!%p341_p9), %vm3709_vm3, %v3710_v4  ;;  %s4737_s0 = sld [smem:[#allocation13_spill]] (!%p341_p9)  ;;  %v1022_v31 = vld [vmem:[%s4725_s3 + $0x8] sm:$0xff] (!%p341_p9)  ;;  %v1037_v32 = vld [vmem:[%s4725_s3 + $0x80] sm:$0xff] (!%p341_p9)  ;;  %v1023_v36 = vld [vmem:[%s4725_s3 + $0x10] sm:$0xff] (!%p341_p9)  ;;  %vm713_vm5 = vcmask (!%p341_p9), 261120   ;;  %vm747_vm6 = vcmask (!%p341_p9), 259072  }
  0x12   : > { %3478 = vmatpush3.bf16.msk.msra.mxu0 (!%p341_p9), %vm3477_vm2, %v3476_v3  ;;  %v3480_v33 = vpack.c.bf16 (!%p341_p9), %v1022_v31, %v1021_v30  ;;  %v1038_v34 = vld [vmem:[%s4725_s3 + $0x88] sm:$0xff] (!%p341_p9)  ;;  %v1024_v37 = vld [vmem:[%s4725_s3 + $0x18] sm:$0xff] (!%p341_p9)  ;;  %v1039_v38 = vld [vmem:[%s4725_s3 + $0x90] sm:$0xff] (!%p341_p9)  ;;  %vm824_vm7 = vcmask (!%p341_p9), 253952   ;;  %vm1001_vm8 = vcmask (!%p341_p9), 260096   ;;  %vm738_vm9 = vcmask (!%p341_p9), 257024  }
  0x13   : > { %3503 = vmatprep.subr.bf16.mxu0 (!%p341_p9), %v3707_v2  ;;  %v3504_v35 = vpack.c.bf16 (!%p341_p9), %v1038_v34, %v1037_v32  ;;  %v3483_v39 = vpack.c.bf16 (!%p341_p9), %v1024_v37, %v1023_v36  ;;  %v1040_v40 = vld [vmem:[%s4725_s3 + $0x98] sm:$0xff] (!%p341_p9)  ;;  %v3971_v42 = vld [vmem:[%s4724_s2] ss:$0 sm:$0xff] (!%p341_p9)  ;;  %vm1186_vm10 = vcmask (!%p341_p9), 523264   ;;  %vm1193_vm11 = vcmask (!%p341_p9), 516096   ;;  %s377_s25 = sand.u32 (!%p341_p9), 1, %s3697_s18  }
  0x14   : > { %3481 = vmatpush3.bf16.msra.mxu1 (!%p341_p9), %v3480_v33  ;;  %v3507_v41 = vpack.c.bf16 (!%p341_p9), %v1040_v40, %v1039_v38  ;;  %vm2085_vm12 = vcmask (!%p341_p9), 520192   ;;  %s2862_s12 = sshll.u32 (!%p341_p9), %s3793_s21, 4  ;;  %s378_s13 = scalar_lea.vmem (!%p341_p9), [#allocation10], %s377_s25  ;;  %vm2690_vm13 = vcmask (!%p341_p9), 73728  }
  0x15   : > { %3482 = vmatprep.subr.bf16.mxu1 (!%p341_p9), %v3707_v2  ;;  %s4680_s22 = scalar_lea.hbm (!%p341_p9), %s4733_s11, %s2862_s12 }
  0x17   : > { %s380_s14 = scalar_select %p379_p10, %s3793_s21, 1 }
  0x18   : > { %3484 = vmatpush3.bf16.msra.mxu1 %v3483_v39  ;;  %s3711_s21 = smov [#allocation10]  }
  0x19   : > { %s3599_s15 = smul.u32 200, %s380_s14  ;;  %3485 = vmatprep.subr.bf16.mxu1 %v3707_v2  ;;  %s2705_s14 = sshll.u32 %s378_s13, 4  ;;  %s4682_s14 = int_to_ptr.vmem [resolvable:$true] %s2705_s14 }
  0x1a   : > { %s3643_s29 = scalar_lea.vmem %s4682_s14, 16  ;;  %s3647_s30 = sshll.u32 %s3711_s21, 4  ;;  %s3648_s30 = int_to_ptr.vmem [resolvable:$false] %s3647_s30 }
  0x1b   : > { %s3838_s24 = scalar_lea.vmem %s4737_s0, %s3599_s15  ;;  %p3644_p11 = scmp.ne.s32.totalorder %s4682_s14, %s3643_s29 }
  0x1c   : > { %v384_v5 = vld [vmem:[%s3838_s24] sm:$0xff]  ;;  %v385_v6 = vld [vmem:[%s3838_s24 + $0x8] sm:$0xff]  ;;  %v386_v7 = vld [vmem:[%s3838_s24 + $0x10] sm:$0xff]  ;;  %s3649_s0 = scalar_lea.vmem %s3648_s30, 32  ;;  %p3650_p0 = scmp.lt.s32.totalorder %s4682_s14, %s3648_s30 }
  0x1d   : > { %3042 = vmatmul.mubr.msk.f32.vlgmr.msra.gmra.mrb[0].mxu0 %vm418_vm4, %v384_v5  ;;  %v387_v8 = vld [vmem:[%s3838_s24 + $0x18] sm:$0xff]  ;;  %v388_v9 = vld [vmem:[%s3838_s24 + $0x20] sm:$0xff]  ;;  %v389_v10 = vld [vmem:[%s3838_s24 + $0x28] sm:$0xff]  ;;  %p3645_p12 = pnand %p3644_p11, %p3810_p5  ;;  %p3651_p1 = scmp.lt.s32.totalorder %s3649_s0, %s3643_s29 }
  0x1e   : > { %3044 = vmatprep.mubr.msk.f32.mxu0 %vm3709_vm3, %v3710_v4  ;;  %v390_v11 = vld [vmem:[%s3838_s24 + $0x30] sm:$0xff]  ;;  %v391_v12 = vld [vmem:[%s3838_s24 + $0x38] sm:$0xff]  ;;  %v392_v13 = vld [vmem:[%s3838_s24 + $0x40] sm:$0xff]  ;;  %3505 = vmatpush3.bf16.msra.mxu0 %v3504_v35 }
  0x1f   : > { %v393_v14 = vld [vmem:[%s3838_s24 + $0x48] sm:$0xff]  ;;  %v394_v15 = vld [vmem:[%s3838_s24 + $0x50] sm:$0xff]  ;;  %v395_v16 = vld [vmem:[%s3838_s24 + $0x58] sm:$0xff]  ;;  %3506 = vmatprep.subr.bf16.mxu0 %v3707_v2  ;;  %p3646_p13 = pneg %p3645_p12  ;;  %p3652_p2 = por %p3651_p1, %p3650_p0 }
  0x20   : > { %v396_v17 = vld [vmem:[%s3838_s24 + $0x60] sm:$0xff]  ;;  %v397_v18 = vld [vmem:[%s3838_s24 + $0x68] sm:$0xff]  ;;  %v398_v19 = vld [vmem:[%s3838_s24 + $0x70] sm:$0xff] }
  0x21   : > { %3045 = vmatmul.mubr.msk.f32.gmra.mrb[2].mxu0 %vm418_vm4, %v385_v6  ;;  %v399_v20 = vld [vmem:[%s3838_s24 + $0x78] sm:$0xff]  ;;  %v400_v21 = vld [vmem:[%s3838_s24 + $0x80] sm:$0xff]  ;;  %v401_v22 = vld [vmem:[%s3838_s24 + $0x88] sm:$0xff]  ;;  %p3653_p3 = pnand %p3652_p2, %p3646_p13 }
  0x22   : > { %3047 = vmatprep.mubr.msk.f32.mxu0 %vm3709_vm3, %v3710_v4  ;;  %v402_v23 = vld [vmem:[%s3838_s24 + $0x90] sm:$0xff]  ;;  %v403_v24 = vld [vmem:[%s3838_s24 + $0x98] sm:$0xff]  ;;  %v404_v25 = vld [vmem:[%s3838_s24 + $0xa0] sm:$0xff]  ;;  %3508 = vmatpush3.bf16.msra.mxu0 %v3507_v41 }
  0x23   : > { %v405_v26 = vld [vmem:[%s3838_s24 + $0xa8] sm:$0xff]  ;;  %v406_v27 = vld [vmem:[%s3838_s24 + $0xb0] sm:$0xff]  ;;  %v407_v28 = vld [vmem:[%s3838_s24 + $0xb8] sm:$0xff]  ;;  %3515 = vmatprep.subr.bf16.mxu0 %v3707_v2 }
  0x24   : > { %v408_v29 = vld [vmem:[%s3838_s24 + $0xc0] sm:$0xf]  ;;  %s2693_s24 = scalar_lea.sflag [#allocation11], %s377_s25 }
  0x25   : > { %3048 = vmatmul.mubr.msk.f32.gmra.mrb[4].mxu0 %vm418_vm4, %v386_v7 }
  0x26   : > { %3050 = vmatprep.mubr.msk.f32.mxu0 %vm3709_vm3, %v3710_v4 }
  0x29   : > { %3051 = vmatmul.mubr.msk.f32.gmra.mrb[6].mxu0 %vm418_vm4, %v387_v8 }
  0x2a   : > { %3053 = vmatprep.mubr.msk.f32.mxu0 %vm3709_vm3, %v3710_v4 }
  0x2d   : > { %3054 = vmatmul.mubr.msk.f32.gmra.mrb[8].mxu0 %vm418_vm4, %v388_v9 }
  0x2e   : > { %3056 = vmatprep.mubr.msk.f32.mxu0 %vm3709_vm3, %v3710_v4 }
  0x31   : > { %3057 = vmatmul.mubr.msk.f32.gmra.mrb[10].mxu0 %vm418_vm4, %v389_v10 }
  0x32   : > { %3059 = vmatprep.mubr.msk.f32.mxu0 %vm3709_vm3, %v3710_v4 }
  0x35   : > { %3060 = vmatmul.mubr.msk.f32.gmra.mrb[12].mxu0 %vm418_vm4, %v390_v11 }
  0x36   : > { %3062 = vmatprep.mubr.msk.f32.mxu0 %vm3709_vm3, %v3710_v4 }
  0x39   : > { %3063 = vmatmul.mubr.msk.f32.gmra.mrb[14].mxu0 %vm418_vm4, %v391_v12 }
  0x3a   : > { %3065 = vmatprep.mubr.msk.f32.mxu0 %vm3709_vm3, %v3710_v4 }
  0x3d   : > { %3066 = vmatmul.mubr.msk.f32.gmra.mrb[16].mxu0 %vm418_vm4, %v392_v13 }
  0x3e   : > { %3068 = vmatprep.mubr.msk.f32.mxu0 %vm3709_vm3, %v3710_v4 }
  0x41   : > { %3069 = vmatmul.mubr.msk.f32.gmra.mrb[18].mxu0 %vm418_vm4, %v393_v14 }
  0x42   : > { %3071 = vmatprep.mubr.msk.f32.mxu0 %vm3709_vm3, %v3710_v4 }
  0x45   : > { %3072 = vmatmul.mubr.msk.f32.gmra.mrb[20].mxu0 %vm418_vm4, %v394_v15 }
  0x46   : > { %3074 = vmatprep.mubr.msk.f32.mxu0 %vm3709_vm3, %v3710_v4 }
  0x49   : > { %3075 = vmatmul.mubr.msk.f32.gmra.mrb[22].mxu0 %vm418_vm4, %v395_v16 }
  0x4a   : > { %3077 = vmatprep.mubr.msk.f32.mxu0 %vm3709_vm3, %v3710_v4 }
  0x4d   : > { %3078 = vmatmul.mubr.msk.f32.gmra.mrb[24].mxu0 %vm418_vm4, %v396_v17 }
  0x4e   : > { %3080 = vmatprep.mubr.msk.f32.mxu0 %vm3709_vm3, %v3710_v4 }
  0x51   : > { %3081 = vmatmul.mubr.msk.f32.gmra.mrb[26].mxu0 %vm418_vm4, %v397_v18 }
  0x52   : > { %3083 = vmatprep.mubr.msk.f32.mxu0 %vm3709_vm3, %v3710_v4 }
  0x55   : > { %3084 = vmatmul.mubr.msk.f32.gmra.mrb[28].mxu0 %vm418_vm4, %v398_v19 }
  0x56   : > { %3086 = vmatprep.mubr.msk.f32.mxu0 %vm3709_vm3, %v3710_v4 }
  0x59   : > { %3087 = vmatmul.mubr.msk.f32.gmra.mrb[30].mxu0 %vm418_vm4, %v399_v20 }
  0x5a   : > { %3089 = vmatprep.mubr.msk.f32.mxu0 %vm3709_vm3, %v3710_v4 }
  0x5d   : > { %3090 = vmatmul.mubr.msk.f32.gmra.mrb[32].mxu0 %vm418_vm4, %v400_v21 }
  0x5e   : > { %3092 = vmatprep.mubr.msk.f32.mxu0 %vm3709_vm3, %v3710_v4 }
  0x61   : > { %3093 = vmatmul.mubr.msk.f32.gmra.mrb[34].mxu0 %vm418_vm4, %v401_v22 }
  0x62   : > { %3095 = vmatprep.mubr.msk.f32.mxu0 %vm3709_vm3, %v3710_v4 }
  0x65   : > { %3096 = vmatmul.mubr.msk.f32.gmra.mrb[36].mxu0 %vm418_vm4, %v402_v23 }
  0x66   : > { %3098 = vmatprep.mubr.msk.f32.mxu0 %vm3709_vm3, %v3710_v4 }
  0x69   : > { %3099 = vmatmul.mubr.msk.f32.gmra.mrb[38].mxu0 %vm418_vm4, %v403_v24 }
  0x6a   : > { %3101 = vmatprep.mubr.msk.f32.mxu0 %vm3709_vm3, %v3710_v4 }
  0x6d   : > { %3102 = vmatmul.mubr.msk.f32.gmra.mrb[40].mxu0 %vm418_vm4, %v404_v25 }
  0x6e   : > { %3104 = vmatprep.mubr.msk.f32.mxu0 %vm3709_vm3, %v3710_v4 }
  0x71   : > { %3105 = vmatmul.mubr.msk.f32.gmra.mrb[42].mxu0 %vm418_vm4, %v405_v26 }
  0x72   : > { %3107 = vmatprep.mubr.msk.f32.mxu0 %vm3709_vm3, %v3710_v4 }
  0x75   : > { %3108 = vmatmul.mubr.msk.f32.gmra.mrb[44].mxu0 %vm418_vm4, %v406_v27 }
  0x76   : > { %3110 = vmatprep.mubr.msk.f32.mxu0 %vm3709_vm3, %v3710_v4 }
  0x79   : > { %3111 = vmatmul.mubr.msk.f32.gmra.mrb[46].mxu0 %vm418_vm4, %v407_v28 }
  0x7a   : > { %3113 = vmatprep.mubr.msk.f32.mxu0 %vm3709_vm3, %v3710_v4 }
  0x7d   : > { %3114 = vmatmul.mubr.msk.f32.gmra.mrb[48].mxu0 %vm418_vm4, %v408_v29 }
  0x7e   : > { %3240 = vmatprep.mubr.msk.f32.mxu0 %vm3709_vm3, %v3710_v4 }
  0xf0   : > { %v564_v43 = vpop.f32.mrb[0].mxu0 }
  0xf1   : > { %v565_v44 = vadd.f32 %v3971_v42, %v564_v43  ;;  %v3043_v45 = vpop.f32.mrb[1].mxu0 }
  0xf3   : > { %v688_v46 = vmax.f32 %v565_v44, 0.0 }
  0xf4   : > { %v569_v47 = vpop.f32.mrb[2].mxu0 }
  0xf5   : > { %714 = vst.msk [vmem:[#allocation2] sm:$0xff] %vm713_vm5, %v688_v46  ;;  %v570_v48 = vadd.f32 %v3971_v42, %v569_v47  ;;  %v3046_v49 = vpop.f32.mrb[3].mxu0 }
  0xf7   : > { %v689_v50 = vmax.f32 %v570_v48, 0.0 }
  0xf8   : > { %v574_v51 = vpop.f32.mrb[4].mxu0 }
  0xf9   : > { %715 = vst.msk [vmem:[#allocation2 + $0x8] sm:$0xff] %vm713_vm5, %v689_v50  ;;  %v575_v52 = vadd.f32 %v3971_v42, %v574_v51  ;;  %v3049_v53 = vpop.f32.mrb[5].mxu0 }
  0xfb   : > { %v690_v54 = vmax.f32 %v575_v52, 0.0 }
  0xfc   : > { %v579_v55 = vpop.f32.mrb[6].mxu0  ;;  %v740_v63 = vld [vmem:[#allocation2] sm:$0xff] }
  0xfd   : > { %716 = vst.msk [vmem:[#allocation2 + $0x10] sm:$0xff] %vm713_vm5, %v690_v54  ;;  %v580_v56 = vadd.f32 %v3971_v42, %v579_v55  ;;  %v3052_v57 = vpop.f32.mrb[7].mxu0 }
  0xff   : > { %v691_v58 = vmax.f32 %v580_v56, 0.0 }
 0x100   : > { %v584_v59 = vpop.f32.mrb[8].mxu0  ;;  %v741_v8 = vld [vmem:[#allocation2 + $0x8] sm:$0x3f] }
 0x101   : > { %717 = vst.msk [vmem:[#allocation2 + $0x18] sm:$0xff] %vm713_vm5, %v691_v58  ;;  %v585_v60 = vadd.f32 %v3971_v42, %v584_v59  ;;  %v3055_v61 = vpop.f32.mrb[9].mxu0 }
 0x103   : > { %v692_v62 = vmax.f32 %v585_v60, 0.0 }
 0x104   : > { %v742_v0 = vld [vmem:[#allocation2 + $0xe] sm:$0xff]  ;;  %v589_v1 = vpop.f32.mrb[10].mxu0 }
 0x105   : > { %v744_v3 = vmax.f32 %v740_v63, %v742_v0  ;;  %718 = vst.msk [vmem:[#allocation2 + $0x20] sm:$0xff] %vm713_vm5, %v692_v62  ;;  %v590_v5 = vadd.f32 %v3971_v42, %v589_v1  ;;  %v3058_v6 = vpop.f32.mrb[11].mxu0 }
 0x107   : > { %746 = vst.msk [vmem:[#allocation3] sm:$0xff] %vm713_vm5, %v744_v3  ;;  %v693_v7 = vmax.f32 %v590_v5, 0.0 }
 0x108   : > { %v743_v9 = vld [vmem:[#allocation2 + $0x16] sm:$0x3f]  ;;  %v594_v10 = vpop.f32.mrb[12].mxu0 }
 0x109   : > { %v745_v11 = vmax.f32 %v741_v8, %v743_v9  ;;  %719 = vst.msk [vmem:[#allocation2 + $0x28] sm:$0xff] %vm713_vm5, %v693_v7  ;;  %v595_v12 = vadd.f32 %v3971_v42, %v594_v10  ;;  %v3061_v13 = vpop.f32.mrb[13].mxu0 }
 0x10b   : > { %748 = vst.msk [vmem:[#allocation3 + $0x8] sm:$0x3f] %vm747_vm6, %v745_v11  ;;  %v694_v14 = vmax.f32 %v595_v12, 0.0 }
 0x10c   : > { %v599_v15 = vpop.f32.mrb[14].mxu0  ;;  %v749_v44 = vld [vmem:[#allocation2 + $0x1c] sm:$0xff] }
 0x10d   : > { %720 = vst.msk [vmem:[#allocation2 + $0x30] sm:$0xff] %vm713_vm5, %v694_v14  ;;  %v600_v16 = vadd.f32 %v3971_v42, %v599_v15  ;;  %v3064_v17 = vpop.f32.mrb[15].mxu0 }
 0x10e   : > { %v803_v18 = vld [vmem:[#allocation3] sm:$0x1]  ;;  %v810_v19 = vld [vmem:[#allocation3 + $0x1] sm:$0x1]  ;;  %v832_v20 = vld [vmem:[#allocation3 + $0x2] sm:$0x1] }
 0x10f   : > { %v817_v21 = vmax.f32 %v803_v18, %v810_v19  ;;  %v839_v22 = vld [vmem:[#allocation3 + $0x3] sm:$0x1]  ;;  %v860_v23 = vld [vmem:[#allocation3 + $0x4] sm:$0x1]  ;;  %v867_v24 = vld [vmem:[#allocation3 + $0x5] sm:$0x1] }
 0x110   : > { %v846_v25 = vmax.f32 %v832_v20, %v839_v22  ;;  %v874_v26 = vmax.f32 %v860_v23, %v867_v24  ;;  %v888_v27 = vld [vmem:[#allocation3 + $0x6] sm:$0x1]  ;;  %v895_v28 = vld [vmem:[#allocation3 + $0x7] sm:$0x1]  ;;  %v695_v30 = vmax.f32 %v600_v16, 0.0  ;;  %v604_v31 = vpop.f32.mrb[16].mxu0 }
 0x111   : > { %825 = vst.msk [vmem:[#allocation4] sm:$0x1] %vm824_vm7, %v817_v21  ;;  %v902_v29 = vmax.f32 %v888_v27, %v895_v28  ;;  %v750_v35 = vld [vmem:[#allocation2 + $0x24] sm:$0x3f]  ;;  %v605_v36 = vadd.f32 %v3971_v42, %v604_v31  ;;  %v3067_v48 = vpop.f32.mrb[17].mxu0 }
 0x112   : > { %853 = vst.msk [vmem:[#allocation4 + $0x1] sm:$0x1] %vm824_vm7, %v846_v25  ;;  %881 = vst.msk [vmem:[#allocation4 + $0x2] sm:$0x1] %vm824_vm7, %v874_v26  ;;  %v916_v32 = vld [vmem:[#allocation3 + $0x8] sm:$0x1] }
 0x113   : > { %v923_v33 = vld [vmem:[#allocation3 + $0x9] sm:$0x1]  ;;  %v944_v34 = vld [vmem:[#allocation3 + $0xa] sm:$0x1]  ;;  %909 = vst.msk [vmem:[#allocation4 + $0x3] sm:$0x1] %vm824_vm7, %v902_v29 }
 0x114   : > { %v930_v37 = vmax.f32 %v916_v32, %v923_v33  ;;  %v951_v38 = vld [vmem:[#allocation3 + $0xb] sm:$0x1]  ;;  %v972_v39 = vld [vmem:[#allocation3 + $0xc] sm:$0x1]  ;;  %v979_v40 = vld [vmem:[#allocation3 + $0xd] sm:$0x1] }
 0x115   : > { %721 = vst.msk [vmem:[#allocation2 + $0x38] sm:$0xff] %vm713_vm5, %v695_v30  ;;  %v958_v41 = vmax.f32 %v944_v34, %v951_v38  ;;  %v986_v43 = vmax.f32 %v972_v39, %v979_v40  ;;  %v751_v45 = vld [vmem:[#allocation2 + $0x2a] sm:$0xff]  ;;  %v752_v46 = vld [vmem:[#allocation2 + $0x32] sm:$0x3f]  ;;  %v696_v47 = vmax.f32 %v605_v36, 0.0  ;;  %v609_v51 = vpop.f32.mrb[18].mxu0 }
 0x116   : > { %937 = vst.msk [vmem:[#allocation4 + $0x4] sm:$0x1] %vm824_vm7, %v930_v37  ;;  %v753_v49 = vmax.f32 %v749_v44, %v751_v45  ;;  %v754_v50 = vmax.f32 %v750_v35, %v752_v46  ;;  %v610_v52 = vadd.f32 %v3971_v42, %v609_v51  ;;  %v3070_v53 = vpop.f32.mrb[19].mxu0 }
 0x117   : > { %965 = vst.msk [vmem:[#allocation4 + $0x5] sm:$0x1] %vm824_vm7, %v958_v41  ;;  %993 = vst.msk [vmem:[#allocation4 + $0x6] sm:$0x1] %vm824_vm7, %v986_v43 }
 0x118   : > { %722 = vst.msk [vmem:[#allocation2 + $0x40] sm:$0xff] %vm713_vm5, %v696_v47  ;;  %756 = vst.msk [vmem:[#allocation3 + $0x10] sm:$0xff] %vm713_vm5, %v753_v49  ;;  %v697_v54 = vmax.f32 %v610_v52, 0.0  ;;  %v614_v55 = vpop.f32.mrb[20].mxu0 }
 0x119   : > { %757 = vst.msk [vmem:[#allocation3 + $0x18] sm:$0x3f] %vm747_vm6, %v754_v50  ;;  %v615_v56 = vadd.f32 %v3971_v42, %v614_v55  ;;  %v3073_v57 = vpop.f32.mrb[21].mxu0 }
 0x11a   : > { %723 = vst.msk [vmem:[#allocation2 + $0x48] sm:$0xff] %vm713_vm5, %v697_v54 }
 0x11b   : > { %v698_v58 = vmax.f32 %v615_v56, 0.0 }
 0x11c   : > { %v619_v59 = vpop.f32.mrb[22].mxu0  ;;  %v758_v13 = vld [vmem:[#allocation2 + $0x38] sm:$0xff] }
 0x11d   : > { %724 = vst.msk [vmem:[#allocation2 + $0x50] sm:$0xff] %vm713_vm5, %v698_v58  ;;  %v3076_v60 = vpop.f32.mrb[23].mxu0  ;;  %v620_v1 = vadd.f32 %v3971_v42, %v619_v59 }
 0x11e   : > { %v1000_v61 = vld [vmem:[#allocation4] sm:$0x7f] }
 0x11f   : > { %v804_v62 = vld [vmem:[#allocation3 + $0x10] sm:$0x1]  ;;  %v811_v63 = vld [vmem:[#allocation3 + $0x11] sm:$0x1]  ;;  %v833_v0 = vld [vmem:[#allocation3 + $0x12] sm:$0x1] }
 0x120   : > { %1002 = vst.msk [vmem:[#allocation5] sm:$0x7f] %vm1001_vm8, %v1000_v61  ;;  %v818_v3 = vmax.f32 %v804_v62, %v811_v63  ;;  %v840_v5 = vld [vmem:[#allocation3 + $0x13] sm:$0x1]  ;;  %v861_v6 = vld [vmem:[#allocation3 + $0x14] sm:$0x1] }
 0x121   : > { %v868_v7 = vld [vmem:[#allocation3 + $0x15] sm:$0x1]  ;;  %v847_v8 = vmax.f32 %v833_v0, %v840_v5  ;;  %v889_v10 = vld [vmem:[#allocation3 + $0x16] sm:$0x1]  ;;  %v896_v11 = vld [vmem:[#allocation3 + $0x17] sm:$0x1] }
 0x122   : > { %v875_v9 = vmax.f32 %v861_v6, %v868_v7  ;;  %v917_v12 = vld [vmem:[#allocation3 + $0x18] sm:$0x1]  ;;  %826 = vst.msk [vmem:[#allocation4 + $0x8] sm:$0x1] %vm824_vm7, %v818_v3  ;;  %v903_v14 = vmax.f32 %v889_v10, %v896_v11  ;;  %v924_v15 = vld [vmem:[#allocation3 + $0x19] sm:$0x1] }
 0x123   : > { %v945_v16 = vld [vmem:[#allocation3 + $0x1a] sm:$0x1]  ;;  %v952_v17 = vld [vmem:[#allocation3 + $0x1b] sm:$0x1]  ;;  %854 = vst.msk [vmem:[#allocation4 + $0x9] sm:$0x1] %vm824_vm7, %v847_v8  ;;  %v931_v18 = vmax.f32 %v917_v12, %v924_v15 }
 0x124   : > { %882 = vst.msk [vmem:[#allocation4 + $0xa] sm:$0x1] %vm824_vm7, %v875_v9  ;;  %v959_v19 = vmax.f32 %v945_v16, %v952_v17  ;;  %v973_v20 = vld [vmem:[#allocation3 + $0x1c] sm:$0x1]  ;;  %v980_v21 = vld [vmem:[#allocation3 + $0x1d] sm:$0x1] }
 0x125   : > { %v760_v22 = vld [vmem:[#allocation2 + $0x46] sm:$0xff]  ;;  %v699_v23 = vmax.f32 %v620_v1, 0.0  ;;  %910 = vst.msk [vmem:[#allocation4 + $0xb] sm:$0x1] %vm824_vm7, %v903_v14  ;;  %v987_v24 = vmax.f32 %v973_v20, %v980_v21  ;;  %v624_v26 = vpop.f32.mrb[24].mxu0 }
 0x126   : > { %v762_v25 = vmax.f32 %v758_v13, %v760_v22  ;;  %938 = vst.msk [vmem:[#allocation4 + $0xc] sm:$0x1] %vm824_vm7, %v931_v18  ;;  %966 = vst.msk [vmem:[#allocation4 + $0xd] sm:$0x1] %vm824_vm7, %v959_v19  ;;  %v759_v27 = vld [vmem:[#allocation2 + $0x40] sm:$0x3f]  ;;  %v625_v29 = vadd.f32 %v3971_v42, %v624_v26 }
 0x127   : > { %v761_v28 = vld [vmem:[#allocation2 + $0x4e] sm:$0x3f]  ;;  %725 = vst.msk [vmem:[#allocation2 + $0x58] sm:$0xff] %vm713_vm5, %v699_v23  ;;  %v3079_v30 = vpop.f32.mrb[25].mxu0  ;;  %v1025_v15 = vld [vmem:[%s4725_s3 + $0x20] sm:$0xff] }
 0x128   : > { %994 = vst.msk [vmem:[#allocation4 + $0xe] sm:$0x1] %vm824_vm7, %v987_v24  ;;  %v763_v31 = vmax.f32 %v759_v27, %v761_v28  ;;  %v629_v32 = vpop.f32.mrb[26].mxu0  ;;  %v700_v33 = vmax.f32 %v625_v29, 0.0  ;;  %v1026_v17 = vld [vmem:[%s4725_s3 + $0x28] sm:$0xff]  ;;  %v1045_v18 = vld [vmem:[%s4725_s3 + $0xc0] sm:$0xff] }
 0x129   : > { %765 = vst.msk [vmem:[#allocation3 + $0x20] sm:$0xff] %vm713_vm5, %v762_v25  ;;  %v630_v34 = vadd.f32 %v3971_v42, %v629_v32  ;;  %v3082_v35 = vpop.f32.mrb[27].mxu0  ;;  %v1046_v19 = vld [vmem:[%s4725_s3 + $0xc8] sm:$0xff]  ;;  %v3486_v25 = vpack.c.bf16 %v1026_v17, %v1025_v15  ;;  %v1027_v26 = vld [vmem:[%s4725_s3 + $0x30] sm:$0xff]  ;;  %v1028_v27 = vld [vmem:[%s4725_s3 + $0x38] sm:$0xff] }
 0x12a   : > { %766 = vst.msk [vmem:[#allocation3 + $0x28] sm:$0x3f] %vm747_vm6, %v763_v31  ;;  %v634_v37 = vpop.f32.mrb[28].mxu0  ;;  %v3516_v28 = vpack.c.bf16 %v1046_v19, %v1045_v18  ;;  %v1047_v31 = vld [vmem:[%s4725_s3 + $0xd0] sm:$0xff]  ;;  %v1048_v32 = vld [vmem:[%s4725_s3 + $0xd8] sm:$0xff] }
 0x12b   : > { %726 = vst.msk [vmem:[#allocation2 + $0x60] sm:$0xff] %vm713_vm5, %v700_v33  ;;  %v701_v36 = vmax.f32 %v630_v34, 0.0  ;;  %v635_v38 = vadd.f32 %v3971_v42, %v634_v37  ;;  %v3085_v39 = vpop.f32.mrb[29].mxu0  ;;  %v3489_v37 = vpack.c.bf16 %v1028_v27, %v1027_v26 }
 0x12c   : > { %v639_v5 = vpop.f32.mrb[30].mxu0 }
 0x12d   : > { %727 = vst.msk [vmem:[#allocation2 + $0x68] sm:$0xff] %vm713_vm5, %v701_v36  ;;  %v702_v40 = vmax.f32 %v635_v38, 0.0  ;;  %v640_v9 = vadd.f32 %v3971_v42, %v639_v5  ;;  %v3088_v10 = vpop.f32.mrb[31].mxu0 }
 0x12e   : > { %v767_v58 = vld [vmem:[#allocation2 + $0x54] sm:$0xff] }
 0x12f   : > { %728 = vst.msk [vmem:[#allocation2 + $0x70] sm:$0xff] %vm713_vm5, %v702_v40  ;;  %v1004_v6 = vld [vmem:[#allocation4 + $0x8] sm:$0x7f]  ;;  %v703_v12 = vmax.f32 %v640_v9, 0.0 }
 0x130   : > { %v805_v41 = vld [vmem:[#allocation3 + $0x20] sm:$0x1]  ;;  %v812_v43 = vld [vmem:[#allocation3 + $0x21] sm:$0x1]  ;;  %v834_v44 = vld [vmem:[#allocation3 + $0x22] sm:$0x1] }
 0x131   : > { %v819_v45 = vmax.f32 %v805_v41, %v812_v43  ;;  %v841_v46 = vld [vmem:[#allocation3 + $0x23] sm:$0x1]  ;;  %v862_v47 = vld [vmem:[#allocation3 + $0x24] sm:$0x1]  ;;  %v869_v48 = vld [vmem:[#allocation3 + $0x25] sm:$0x1] }
 0x132   : > { %v848_v49 = vmax.f32 %v834_v44, %v841_v46  ;;  %v876_v50 = vmax.f32 %v862_v47, %v869_v48  ;;  %v890_v51 = vld [vmem:[#allocation3 + $0x26] sm:$0x1]  ;;  %v897_v52 = vld [vmem:[#allocation3 + $0x27] sm:$0x1]  ;;  %v918_v53 = vld [vmem:[#allocation3 + $0x28] sm:$0x1]  ;;  %v3519_v44 = vpack.c.bf16 %v1048_v32, %v1047_v31 }
 0x133   : > { %827 = vst.msk [vmem:[#allocation4 + $0x10] sm:$0x1] %vm824_vm7, %v819_v45  ;;  %v904_v54 = vmax.f32 %v890_v51, %v897_v52  ;;  %v925_v55 = vld [vmem:[#allocation3 + $0x29] sm:$0x1]  ;;  %v946_v56 = vld [vmem:[#allocation3 + $0x2a] sm:$0x1] }
 0x134   : > { %v953_v57 = vld [vmem:[#allocation3 + $0x2b] sm:$0x1]  ;;  %855 = vst.msk [vmem:[#allocation4 + $0x11] sm:$0x1] %vm824_vm7, %v848_v49  ;;  %883 = vst.msk [vmem:[#allocation4 + $0x12] sm:$0x1] %vm824_vm7, %v876_v50  ;;  %v932_v59 = vmax.f32 %v918_v53, %v925_v55 }
 0x135   : > { %v960_v60 = vmax.f32 %v946_v56, %v953_v57  ;;  %v974_v61 = vld [vmem:[#allocation3 + $0x2c] sm:$0x1]  ;;  %v981_v62 = vld [vmem:[#allocation3 + $0x2d] sm:$0x1]  ;;  %v768_v63 = vld [vmem:[#allocation2 + $0x5c] sm:$0x3f] }
 0x136   : > { %911 = vst.msk [vmem:[#allocation4 + $0x13] sm:$0x1] %vm824_vm7, %v904_v54  ;;  %v988_v0 = vmax.f32 %v974_v61, %v981_v62  ;;  %v769_v1 = vld [vmem:[#allocation2 + $0x62] sm:$0xff]  ;;  %v770_v3 = vld [vmem:[#allocation2 + $0x6a] sm:$0x3f]  ;;  %v644_v11 = vpop.f32.mrb[32].mxu0 }
 0x137   : > { %939 = vst.msk [vmem:[#allocation4 + $0x14] sm:$0x1] %vm824_vm7, %v932_v59  ;;  %967 = vst.msk [vmem:[#allocation4 + $0x15] sm:$0x1] %vm824_vm7, %v960_v60  ;;  %v771_v7 = vmax.f32 %v767_v58, %v769_v1  ;;  %v772_v8 = vmax.f32 %v768_v63, %v770_v3  ;;  %v645_v13 = vadd.f32 %v3971_v42, %v644_v11  ;;  %v3091_v14 = vpop.f32.mrb[33].mxu0  ;;  %v776_v59 = vld [vmem:[#allocation2 + $0x70] sm:$0xff] }
 0x138   : > { %1005 = vst.msk [vmem:[#allocation5 + $0x7] sm:$0x7f] %vm1001_vm8, %v1004_v6  ;;  %v649_v16 = vpop.f32.mrb[34].mxu0 }
 0x139   : > { %995 = vst.msk [vmem:[#allocation4 + $0x16] sm:$0x1] %vm824_vm7, %v988_v0  ;;  %v704_v20 = vmax.f32 %v645_v13, 0.0  ;;  %v650_v21 = vadd.f32 %v3971_v42, %v649_v16  ;;  %v3094_v22 = vpop.f32.mrb[35].mxu0 }
 0x13a   : > { %774 = vst.msk [vmem:[#allocation3 + $0x30] sm:$0xff] %vm713_vm5, %v771_v7  ;;  %729 = vst.msk [vmem:[#allocation2 + $0x78] sm:$0xff] %vm713_vm5, %v703_v12  ;;  %v654_v24 = vpop.f32.mrb[36].mxu0 }
 0x13b   : > { %775 = vst.msk [vmem:[#allocation3 + $0x38] sm:$0x3f] %vm747_vm6, %v772_v8  ;;  %v705_v23 = vmax.f32 %v650_v21, 0.0  ;;  %v3097_v30 = vpop.f32.mrb[37].mxu0  ;;  %v655_v43 = vadd.f32 %v3971_v42, %v654_v24 }
 0x13c   : > { %730 = vst.msk [vmem:[#allocation2 + $0x80] sm:$0xff] %vm713_vm5, %v704_v20  ;;  %v659_v62 = vpop.f32.mrb[38].mxu0 }
 0x13d   : > { %731 = vst.msk [vmem:[#allocation2 + $0x88] sm:$0xff] %vm713_vm5, %v705_v23  ;;  %v706_v61 = vmax.f32 %v655_v43, 0.0  ;;  %v660_v3 = vadd.f32 %v3971_v42, %v659_v62  ;;  %v3100_v5 = vpop.f32.mrb[39].mxu0 }
 0x13f   : > { %v4057_v29 = vld [vmem:[#allocation5] sm:$0xff]  ;;  %732 = vst.msk [vmem:[#allocation2 + $0x90] sm:$0xff] %vm713_vm5, %v706_v61  ;;  %v707_v9 = vmax.f32 %v660_v3, 0.0 }
 0x140   : > { %3125 = vmatmul.mubr.msk.f32.vlgmr.msra.gmra.mrb[0].mxu1 %vm713_vm5, %v4057_v29  ;;  %3241 = vmatmul.mubr.msk.f32.vlgmr.msra.gmra.mrb[50].mxu0 %vm713_vm5, %v4057_v29  ;;  %v1007_v33 = vld [vmem:[#allocation4 + $0x10] sm:$0x7f]  ;;  %v664_v7 = vpop.f32.mrb[40].mxu0 }
 0x141   : > { %v806_v34 = vld [vmem:[#allocation3 + $0x30] sm:$0x1]  ;;  %v813_v35 = vld [vmem:[#allocation3 + $0x31] sm:$0x1]  ;;  %v835_v36 = vld [vmem:[#allocation3 + $0x32] sm:$0x1]  ;;  %3127 = vmatprep.mubr.msk.f32.mxu1 %vm3709_vm3, %v3710_v4  ;;  %3243 = vmatprep.mubr.msk.f32.mxu0 %vm3709_vm3, %v3710_v4  ;;  %v665_v10 = vadd.f32 %v3971_v42, %v664_v7 }
 0x142   : > { %1008 = vst.msk [vmem:[#allocation5 + $0xe] sm:$0x7f] %vm1001_vm8, %v1007_v33  ;;  %v820_v38 = vmax.f32 %v806_v34, %v813_v35  ;;  %v842_v39 = vld [vmem:[#allocation3 + $0x33] sm:$0x1]  ;;  %v863_v40 = vld [vmem:[#allocation3 + $0x34] sm:$0x1]  ;;  %3487 = vmatpush3.bf16.msra.mxu1 %v3486_v25  ;;  %3517 = vmatpush3.bf16.msra.mxu0 %v3516_v28 }
 0x143   : > { %v870_v41 = vld [vmem:[#allocation3 + $0x35] sm:$0x1]  ;;  %v849_v45 = vmax.f32 %v835_v36, %v842_v39  ;;  %v891_v47 = vld [vmem:[#allocation3 + $0x36] sm:$0x1]  ;;  %v898_v48 = vld [vmem:[#allocation3 + $0x37] sm:$0x1]  ;;  %3488 = vmatprep.subr.bf16.mxu1 %v3707_v2  ;;  %3518 = vmatprep.subr.bf16.mxu0 %v3707_v2 }
 0x144   : > { %v877_v46 = vmax.f32 %v863_v40, %v870_v41  ;;  %v919_v49 = vld [vmem:[#allocation3 + $0x38] sm:$0x1]  ;;  %828 = vst.msk [vmem:[#allocation4 + $0x18] sm:$0x1] %vm824_vm7, %v820_v38  ;;  %v905_v50 = vmax.f32 %v891_v47, %v898_v48  ;;  %v926_v51 = vld [vmem:[#allocation3 + $0x39] sm:$0x1] }
 0x145   : > { %v947_v52 = vld [vmem:[#allocation3 + $0x3a] sm:$0x1]  ;;  %v954_v53 = vld [vmem:[#allocation3 + $0x3b] sm:$0x1]  ;;  %856 = vst.msk [vmem:[#allocation4 + $0x19] sm:$0x1] %vm824_vm7, %v849_v45  ;;  %v933_v54 = vmax.f32 %v919_v49, %v926_v51 }
 0x146   : > { %884 = vst.msk [vmem:[#allocation4 + $0x1a] sm:$0x1] %vm824_vm7, %v877_v46  ;;  %v961_v55 = vmax.f32 %v947_v52, %v954_v53  ;;  %v975_v56 = vld [vmem:[#allocation3 + $0x3c] sm:$0x1]  ;;  %v982_v57 = vld [vmem:[#allocation3 + $0x3d] sm:$0x1]  ;;  %3490 = vmatpush3.bf16.msra.mxu1 %v3489_v37  ;;  %3520 = vmatpush3.bf16.msra.mxu0 %v3519_v44 }
 0x147   : > { %912 = vst.msk [vmem:[#allocation4 + $0x1b] sm:$0x1] %vm824_vm7, %v905_v50  ;;  %v989_v58 = vmax.f32 %v975_v56, %v982_v57  ;;  %v778_v60 = vld [vmem:[#allocation2 + $0x7e] sm:$0xff]  ;;  %940 = vst.msk [vmem:[#allocation4 + $0x1c] sm:$0x1] %vm824_vm7, %v933_v54  ;;  %3491 = vmatprep.subr.bf16.mxu1 %v3707_v2  ;;  %3527 = vmatprep.subr.bf16.mxu0 %v3707_v2  ;;  %v3103_v11 = vpop.f32.mrb[41].mxu0 }
 0x148   : > { %968 = vst.msk [vmem:[#allocation4 + $0x1d] sm:$0x1] %vm824_vm7, %v961_v55  ;;  %v777_v63 = vld [vmem:[#allocation2 + $0x78] sm:$0x3f]  ;;  %v780_v0 = vmax.f32 %v776_v59, %v778_v60  ;;  %v779_v1 = vld [vmem:[#allocation2 + $0x86] sm:$0x3f] }
 0x149   : > { %996 = vst.msk [vmem:[#allocation4 + $0x1e] sm:$0x1] %vm824_vm7, %v989_v58  ;;  %v781_v6 = vmax.f32 %v777_v63, %v779_v1  ;;  %v4089_v8 = vld [vmem:[#allocation5 + $0x8] sm:$0xff]  ;;  %v669_v12 = vpop.f32.mrb[42].mxu0  ;;  %v708_v13 = vmax.f32 %v665_v10, 0.0  ;;  %v785_v45 = vld [vmem:[#allocation2 + $0x8c] sm:$0xff] }
 0x14a   : > { %783 = vst.msk [vmem:[#allocation3 + $0x40] sm:$0xff] %vm713_vm5, %v780_v0  ;;  %3128 = vmatmul.mubr.msk.f32.gmra.mrb[2].mxu1 %vm713_vm5, %v4089_v8  ;;  %3244 = vmatmul.mubr.msk.f32.gmra.mrb[52].mxu0 %vm713_vm5, %v4089_v8  ;;  %733 = vst.msk [vmem:[#allocation2 + $0x98] sm:$0xff] %vm713_vm5, %v707_v9  ;;  %v670_v14 = vadd.f32 %v3971_v42, %v669_v12  ;;  %v3106_v15 = vpop.f32.mrb[43].mxu0 }
 0x14b   : > { %784 = vst.msk [vmem:[#allocation3 + $0x48] sm:$0x3f] %vm747_vm6, %v781_v6  ;;  %3130 = vmatprep.mubr.msk.f32.mxu1 %vm3709_vm3, %v3710_v4  ;;  %3246 = vmatprep.mubr.msk.f32.mxu0 %vm3709_vm3, %v3710_v4  ;;  %v674_v17 = vpop.f32.mrb[44].mxu0 }
 0x14c   : > { %734 = vst.msk [vmem:[#allocation2 + $0xa0] sm:$0xff] %vm713_vm5, %v708_v13  ;;  %v709_v16 = vmax.f32 %v670_v14, 0.0  ;;  %v3109_v18 = vpop.f32.mrb[45].mxu0  ;;  %v675_v27 = vadd.f32 %v3971_v42, %v674_v17 }
 0x14d   : > { %v679_v49 = vpop.f32.mrb[46].mxu0 }
 0x14e   : > { %735 = vst.msk [vmem:[#allocation2 + $0xa8] sm:$0xff] %vm713_vm5, %v709_v16  ;;  %v710_v48 = vmax.f32 %v675_v27, 0.0  ;;  %v680_v52 = vadd.f32 %v3971_v42, %v679_v49  ;;  %v3112_v53 = vpop.f32.mrb[47].mxu0 }
 0x150   : > { %v1010_v19 = vld [vmem:[#allocation4 + $0x18] sm:$0x7f]  ;;  %736 = vst.msk [vmem:[#allocation2 + $0xb0] sm:$0xff] %vm713_vm5, %v710_v48  ;;  %v684_v55 = vpop.f32.mrb[48].mxu0  ;;  %v711_v56 = vmax.f32 %v680_v52, 0.0 }
 0x151   : > { %v807_v20 = vld [vmem:[#allocation3 + $0x40] sm:$0x1]  ;;  %v814_v21 = vld [vmem:[#allocation3 + $0x41] sm:$0x1]  ;;  %v836_v22 = vld [vmem:[#allocation3 + $0x42] sm:$0x1]  ;;  %v685_v57 = vadd.f32 %v3971_v42, %v684_v55 }
 0x152   : > { %1011 = vst.msk [vmem:[#allocation5 + $0x15] sm:$0x7f] %vm1001_vm8, %v1010_v19  ;;  %v821_v23 = vmax.f32 %v807_v20, %v814_v21  ;;  %v843_v24 = vld [vmem:[#allocation3 + $0x43] sm:$0x1]  ;;  %v864_v25 = vld [vmem:[#allocation3 + $0x44] sm:$0x1] }
 0x153   : > { %v871_v26 = vld [vmem:[#allocation3 + $0x45] sm:$0x1]  ;;  %v850_v28 = vmax.f32 %v836_v22, %v843_v24  ;;  %v892_v31 = vld [vmem:[#allocation3 + $0x46] sm:$0x1]  ;;  %v899_v32 = vld [vmem:[#allocation3 + $0x47] sm:$0x1] }
 0x154   : > { %v878_v30 = vmax.f32 %v864_v25, %v871_v26  ;;  %v920_v33 = vld [vmem:[#allocation3 + $0x48] sm:$0x1]  ;;  %829 = vst.msk [vmem:[#allocation4 + $0x20] sm:$0x1] %vm824_vm7, %v821_v23  ;;  %v906_v34 = vmax.f32 %v892_v31, %v899_v32  ;;  %v927_v35 = vld [vmem:[#allocation3 + $0x49] sm:$0x1] }
 0x155   : > { %v948_v36 = vld [vmem:[#allocation3 + $0x4a] sm:$0x1]  ;;  %v955_v37 = vld [vmem:[#allocation3 + $0x4b] sm:$0x1]  ;;  %857 = vst.msk [vmem:[#allocation4 + $0x21] sm:$0x1] %vm824_vm7, %v850_v28  ;;  %v934_v38 = vmax.f32 %v920_v33, %v927_v35 }
 0x156   : > { %885 = vst.msk [vmem:[#allocation4 + $0x22] sm:$0x1] %vm824_vm7, %v878_v30  ;;  %v962_v39 = vmax.f32 %v948_v36, %v955_v37  ;;  %v976_v40 = vld [vmem:[#allocation3 + $0x4c] sm:$0x1]  ;;  %v983_v41 = vld [vmem:[#allocation3 + $0x4d] sm:$0x1] }
 0x157   : > { %v786_v43 = vld [vmem:[#allocation2 + $0x94] sm:$0x3f]  ;;  %913 = vst.msk [vmem:[#allocation4 + $0x23] sm:$0x1] %vm824_vm7, %v906_v34  ;;  %v990_v44 = vmax.f32 %v976_v40, %v983_v41  ;;  %v787_v46 = vld [vmem:[#allocation2 + $0x9a] sm:$0xff]  ;;  %v3115_v58 = vpop.f32.mrb[49].mxu0 }
 0x158   : > { %v788_v47 = vld [vmem:[#allocation2 + $0xa2] sm:$0x3f]  ;;  %941 = vst.msk [vmem:[#allocation4 + $0x24] sm:$0x1] %vm824_vm7, %v934_v38  ;;  %969 = vst.msk [vmem:[#allocation4 + $0x25] sm:$0x1] %vm824_vm7, %v962_v39  ;;  %v789_v50 = vmax.f32 %v785_v45, %v787_v46 }
 0x159   : > { %v790_v51 = vmax.f32 %v786_v43, %v788_v47  ;;  %997 = vst.msk [vmem:[#allocation4 + $0x26] sm:$0x1] %vm824_vm7, %v990_v44  ;;  %v4117_v54 = vld [vmem:[#allocation5 + $0x10] sm:$0xff]  ;;  %v712_v59 = vmax.f32 %v685_v57, 0.0  ;;  %v794_v11 = vld [vmem:[#allocation2 + $0xa8] sm:$0xff] }
 0x15a   : > { %792 = vst.msk [vmem:[#allocation3 + $0x50] sm:$0xff] %vm713_vm5, %v789_v50  ;;  %3131 = vmatmul.mubr.msk.f32.gmra.mrb[4].mxu1 %vm713_vm5, %v4117_v54  ;;  %3247 = vmatmul.mubr.msk.f32.gmra.mrb[54].mxu0 %vm713_vm5, %v4117_v54  ;;  %737 = vst.msk [vmem:[#allocation2 + $0xb8] sm:$0xff] %vm713_vm5, %v711_v56  ;;  %v795_v22 = vld [vmem:[#allocation2 + $0xb0] sm:$0x3f]  ;;  %v1029_v55 = vld [vmem:[%s4725_s3 + $0x40] sm:$0xff] }
 0x15b   : > { %793 = vst.msk [vmem:[#allocation3 + $0x58] sm:$0x3f] %vm747_vm6, %v790_v51  ;;  %3133 = vmatprep.mubr.msk.f32.mxu1 %vm3709_vm3, %v3710_v4  ;;  %3249 = vmatprep.mubr.msk.f32.mxu0 %vm3709_vm3, %v3710_v4  ;;  %v1030_v56 = vld [vmem:[%s4725_s3 + $0x48] sm:$0xff]  ;;  %v1053_v58 = vld [vmem:[%s4725_s3 + $0x100] sm:$0xff] }
 0x15c   : > { %739 = vst.msk [vmem:[#allocation2 + $0xc0] sm:$0xf] %vm738_vm9, %v712_v59  ;;  %v1054_v59 = vld [vmem:[%s4725_s3 + $0x108] sm:$0xff] }
 0x160   : > { %v1013_v60 = vld [vmem:[#allocation4 + $0x20] sm:$0x7f] }
 0x161   : > { %v808_v61 = vld [vmem:[#allocation3 + $0x50] sm:$0x1]  ;;  %v815_v62 = vld [vmem:[#allocation3 + $0x51] sm:$0x1]  ;;  %v837_v63 = vld [vmem:[#allocation3 + $0x52] sm:$0x1] }
 0x162   : > { %1014 = vst.msk [vmem:[#allocation5 + $0x1c] sm:$0x7f] %vm1001_vm8, %v1013_v60  ;;  %v822_v0 = vmax.f32 %v808_v61, %v815_v62  ;;  %v844_v42 = vld [vmem:[#allocation3 + $0x53] sm:$0x1]  ;;  %v865_v1 = vld [vmem:[#allocation3 + $0x54] sm:$0x1]  ;;  %v3492_v60 = vpack.c.bf16 %v1030_v56, %v1029_v55 }
 0x163   : > { %v872_v3 = vld [vmem:[#allocation3 + $0x55] sm:$0x1]  ;;  %v851_v5 = vmax.f32 %v837_v63, %v844_v42  ;;  %v893_v7 = vld [vmem:[#allocation3 + $0x56] sm:$0x1]  ;;  %v900_v9 = vld [vmem:[#allocation3 + $0x57] sm:$0x1]  ;;  %v3528_v63 = vpack.c.bf16 %v1054_v59, %v1053_v58 }
 0x164   : > { %v879_v6 = vmax.f32 %v865_v1, %v872_v3  ;;  %v921_v10 = vld [vmem:[#allocation3 + $0x58] sm:$0x1]  ;;  %830 = vst.msk [vmem:[#allocation4 + $0x28] sm:$0x1] %vm824_vm7, %v822_v0  ;;  %v907_v12 = vmax.f32 %v893_v7, %v900_v9  ;;  %v928_v13 = vld [vmem:[#allocation3 + $0x59] sm:$0x1] }
 0x165   : > { %v949_v14 = vld [vmem:[#allocation3 + $0x5a] sm:$0x1]  ;;  %v956_v15 = vld [vmem:[#allocation3 + $0x5b] sm:$0x1]  ;;  %858 = vst.msk [vmem:[#allocation4 + $0x29] sm:$0x1] %vm824_vm7, %v851_v5  ;;  %v935_v16 = vmax.f32 %v921_v10, %v928_v13 }
 0x166   : > { %886 = vst.msk [vmem:[#allocation4 + $0x2a] sm:$0x1] %vm824_vm7, %v879_v6  ;;  %v963_v17 = vmax.f32 %v949_v14, %v956_v15  ;;  %v977_v18 = vld [vmem:[#allocation3 + $0x5c] sm:$0x1]  ;;  %v984_v19 = vld [vmem:[#allocation3 + $0x5d] sm:$0x1] }
 0x167   : > { %v796_v20 = vld [vmem:[#allocation2 + $0xb6] sm:$0xff]  ;;  %914 = vst.msk [vmem:[#allocation4 + $0x2b] sm:$0x1] %vm824_vm7, %v907_v12  ;;  %v991_v21 = vmax.f32 %v977_v18, %v984_v19  ;;  %v797_v24 = vld [vmem:[#allocation2 + $0xbe] sm:$0x3f]  ;;  %v1034_v6 = vld [vmem:[%s4725_s3 + $0x68] sm:$0xff] }
 0x168   : > { %v798_v23 = vmax.f32 %v794_v11, %v796_v20  ;;  %942 = vst.msk [vmem:[#allocation4 + $0x2c] sm:$0x1] %vm824_vm7, %v935_v16  ;;  %970 = vst.msk [vmem:[#allocation4 + $0x2d] sm:$0x1] %vm824_vm7, %v963_v17  ;;  %v799_v25 = vmax.f32 %v795_v22, %v797_v24  ;;  %v1031_v61 = vld [vmem:[%s4725_s3 + $0x50] sm:$0xff]  ;;  %v1032_v62 = vld [vmem:[%s4725_s3 + $0x58] sm:$0xff] }
 0x169   : > { %998 = vst.msk [vmem:[#allocation4 + $0x2e] sm:$0x1] %vm824_vm7, %v991_v21  ;;  %v4140_v26 = vld [vmem:[#allocation5 + $0x18] sm:$0xff]  ;;  %v1055_v0 = vld [vmem:[%s4725_s3 + $0x110] sm:$0xff]  ;;  %v1056_v42 = vld [vmem:[%s4725_s3 + $0x118] sm:$0xff]  ;;  %v3495_v1 = vpack.c.bf16 %v1032_v62, %v1031_v61 }
 0x16a   : > { %801 = vst.msk [vmem:[#allocation3 + $0x60] sm:$0xff] %vm713_vm5, %v798_v23  ;;  %3134 = vmatmul.mubr.msk.f32.gmra.mrb[6].mxu1 %vm713_vm5, %v4140_v26  ;;  %3250 = vmatmul.mubr.msk.f32.gmra.mrb[56].mxu0 %vm713_vm5, %v4140_v26  ;;  %v3531_v3 = vpack.c.bf16 %v1056_v42, %v1055_v0  ;;  %v1033_v5 = vld [vmem:[%s4725_s3 + $0x60] sm:$0xff]  ;;  %v1035_v9 = vld [vmem:[%s4725_s3 + $0x70] sm:$0xff]  ;;  %v1036_v10 = vld [vmem:[%s4725_s3 + $0x78] sm:$0xff] }
 0x16b   : > { %802 = vst.msk [vmem:[#allocation3 + $0x68] sm:$0x3f] %vm747_vm6, %v799_v25  ;;  %3136 = vmatprep.mubr.msk.f32.mxu1 %vm3709_vm3, %v3710_v4  ;;  %3252 = vmatprep.mubr.msk.f32.mxu0 %vm3709_vm3, %v3710_v4  ;;  %v3498_v7 = vpack.c.bf16 %v1034_v6, %v1033_v5  ;;  %v3501_v11 = vpack.c.bf16 %v1036_v10, %v1035_v9  ;;  %v1041_v12 = vld [vmem:[%s4725_s3 + $0xa0] sm:$0xff]  ;;  %v1042_v13 = vld [vmem:[%s4725_s3 + $0xa8] sm:$0xff]  ;;  %v1043_v15 = vld [vmem:[%s4725_s3 + $0xb0] sm:$0xff] }
 0x16c   : > { %v3510_v14 = vpack.c.bf16 %v1042_v13, %v1041_v12  ;;  %v1044_v16 = vld [vmem:[%s4725_s3 + $0xb8] sm:$0xff]  ;;  %v1049_v18 = vld [vmem:[%s4725_s3 + $0xe0] sm:$0xff]  ;;  %v1050_v19 = vld [vmem:[%s4725_s3 + $0xe8] sm:$0xff] }
 0x16d   : > { %v3513_v17 = vpack.c.bf16 %v1044_v16, %v1043_v15  ;;  %v3522_v20 = vpack.c.bf16 %v1050_v19, %v1049_v18  ;;  %v1051_v21 = vld [vmem:[%s4725_s3 + $0xf0] sm:$0xff]  ;;  %v1052_v22 = vld [vmem:[%s4725_s3 + $0xf8] sm:$0xff] }
 0x16e   : > { %v3525_v23 = vpack.c.bf16 %v1052_v22, %v1051_v21  ;;  %v2200_v22 = vld [vmem:[%s4727_s5] sm:$0xff] }
 0x170   : > { %v1016_v49 = vld [vmem:[#allocation4 + $0x28] sm:$0x7f] }
 0x171   : > { %v809_v27 = vld [vmem:[#allocation3 + $0x60] sm:$0x1]  ;;  %v816_v28 = vld [vmem:[#allocation3 + $0x61] sm:$0x1]  ;;  %v838_v30 = vld [vmem:[#allocation3 + $0x62] sm:$0x1] }
 0x172   : > { %v823_v31 = vmax.f32 %v809_v27, %v816_v28  ;;  %v845_v32 = vld [vmem:[#allocation3 + $0x63] sm:$0x1]  ;;  %v866_v33 = vld [vmem:[#allocation3 + $0x64] sm:$0x1]  ;;  %v873_v34 = vld [vmem:[#allocation3 + $0x65] sm:$0x1] }
 0x173   : > { %v852_v35 = vmax.f32 %v838_v30, %v845_v32  ;;  %v880_v36 = vmax.f32 %v866_v33, %v873_v34  ;;  %v894_v37 = vld [vmem:[#allocation3 + $0x66] sm:$0x1]  ;;  %v901_v38 = vld [vmem:[#allocation3 + $0x67] sm:$0x1]  ;;  %v922_v39 = vld [vmem:[#allocation3 + $0x68] sm:$0x1] }
 0x174   : > { %831 = vst.msk [vmem:[#allocation4 + $0x30] sm:$0x1] %vm824_vm7, %v823_v31  ;;  %v908_v40 = vmax.f32 %v894_v37, %v901_v38  ;;  %v929_v41 = vld [vmem:[#allocation3 + $0x69] sm:$0x1]  ;;  %v950_v43 = vld [vmem:[#allocation3 + $0x6a] sm:$0x1] }
 0x175   : > { %v957_v44 = vld [vmem:[#allocation3 + $0x6b] sm:$0x1]  ;;  %859 = vst.msk [vmem:[#allocation4 + $0x31] sm:$0x1] %vm824_vm7, %v852_v35  ;;  %887 = vst.msk [vmem:[#allocation4 + $0x32] sm:$0x1] %vm824_vm7, %v880_v36  ;;  %v936_v45 = vmax.f32 %v922_v39, %v929_v41 }
 0x176   : > { %v964_v46 = vmax.f32 %v950_v43, %v957_v44  ;;  %v978_v47 = vld [vmem:[#allocation3 + $0x6c] sm:$0x1]  ;;  %v985_v48 = vld [vmem:[#allocation3 + $0x6d] sm:$0x1]  ;;  %915 = vst.msk [vmem:[#allocation4 + $0x33] sm:$0x1] %vm824_vm7, %v908_v40 }
 0x177   : > { %v992_v50 = vmax.f32 %v978_v47, %v985_v48  ;;  %1017 = vst.msk [vmem:[#allocation5 + $0x23] sm:$0x7f] %vm1001_vm8, %v1016_v49 }
 0x178   : > { %943 = vst.msk [vmem:[#allocation4 + $0x34] sm:$0x1] %vm824_vm7, %v936_v45  ;;  %971 = vst.msk [vmem:[#allocation4 + $0x35] sm:$0x1] %vm824_vm7, %v964_v46 }
 0x179   : > { %999 = vst.msk [vmem:[#allocation4 + $0x36] sm:$0x1] %vm824_vm7, %v992_v50 }
 0x17e   : > { %v4159_v51 = vld [vmem:[#allocation5 + $0x20] sm:$0xff] }
 0x17f   : > { %3137 = vmatmul.mubr.msk.f32.gmra.mrb[8].mxu1 %vm713_vm5, %v4159_v51  ;;  %3253 = vmatmul.mubr.msk.f32.gmra.mrb[58].mxu0 %vm713_vm5, %v4159_v51 }
 0x180   : > { %3139 = vmatprep.mubr.msk.f32.mxu1 %vm3709_vm3, %v3710_v4  ;;  %3255 = vmatprep.mubr.msk.f32.mxu0 %vm3709_vm3, %v3710_v4  ;;  %v1019_v52 = vld [vmem:[#allocation4 + $0x30] sm:$0x7f] }
 0x181   : > { %1020 = vst.msk [vmem:[#allocation5 + $0x2a] sm:$0x7f] %vm1001_vm8, %v1019_v52 }
 0x188   : > { %v4170_v53 = vld [vmem:[#allocation5 + $0x28] sm:$0xff]  ;;  %v4186_v57 = vld [vmem:[#allocation5 + $0x30] sm:$0x1] }
 0x189   : > { %3140 = vmatmul.mubr.msk.f32.gmra.mrb[10].mxu1 %vm713_vm5, %v4170_v53  ;;  %3256 = vmatmul.mubr.msk.f32.gmra.mrb[60].mxu0 %vm713_vm5, %v4170_v53 }
 0x18a   : > { %3142 = vmatprep.mubr.msk.f32.mxu1 %vm3709_vm3, %v3710_v4  ;;  %3258 = vmatprep.mubr.msk.f32.mxu0 %vm3709_vm3, %v3710_v4 }
 0x18d   : > { %3143 = vmatmul.mubr.msk.f32.gmra.mrb[12].mxu1 %vm713_vm5, %v4186_v57  ;;  %3259 = vmatmul.mubr.msk.f32.gmra.mrb[62].mxu0 %vm713_vm5, %v4186_v57 }
 0x18e   : > { %3153 = vmatprep.mubr.msk.f32.mxu1 %vm3709_vm3, %v3710_v4  ;;  %3298 = vmatprep.mubr.msk.f32.mxu0 %vm3709_vm3, %v3710_v4 }
 0x191   : > { %3154 = vmatmul.mubr.msk.f32.vlgmr.msra.gmra.mrb[14].mxu1 %vm713_vm5, %v4057_v29  ;;  %3299 = vmatmul.mubr.msk.f32.vlgmr.msra.gmra.mrb[64].mxu0 %vm713_vm5, %v4057_v29 }
 0x192   : > { %3493 = vmatpush3.bf16.msra.mxu1 %v3492_v60  ;;  %3156 = vmatprep.mubr.msk.f32.mxu1 %vm3709_vm3, %v3710_v4 }
 0x193   : > { %3301 = vmatprep.mubr.msk.f32.mxu0 %vm3709_vm3, %v3710_v4  ;;  %3494 = vmatprep.subr.bf16.mxu1 %v3707_v2 }
 0x194   : > { %3529 = vmatpush3.bf16.msra.mxu0 %v3528_v63 }
 0x195   : > { %3157 = vmatmul.mubr.msk.f32.gmra.mrb[16].mxu1 %vm713_vm5, %v4089_v8  ;;  %3302 = vmatmul.mubr.msk.f32.gmra.mrb[66].mxu0 %vm713_vm5, %v4089_v8 }
 0x196   : > { %3159 = vmatprep.mubr.msk.f32.mxu1 %vm3709_vm3, %v3710_v4  ;;  %3304 = vmatprep.mubr.msk.f32.mxu0 %vm3709_vm3, %v3710_v4 }
 0x197   : > { %3496 = vmatpush3.bf16.msra.mxu1 %v3495_v1  ;;  %3530 = vmatprep.subr.bf16.mxu0 %v3707_v2 }
 0x198   : > { %3532 = vmatpush3.bf16.msra.mxu0 %v3531_v3  ;;  %3497 = vmatprep.subr.bf16.mxu1 %v3707_v2 }
 0x199   : > { %3160 = vmatmul.mubr.msk.f32.gmra.mrb[18].mxu1 %vm713_vm5, %v4117_v54  ;;  %3305 = vmatmul.mubr.msk.f32.gmra.mrb[68].mxu0 %vm713_vm5, %v4117_v54 }
 0x19a   : > { %3162 = vmatprep.mubr.msk.f32.mxu1 %vm3709_vm3, %v3710_v4  ;;  %3307 = vmatprep.mubr.msk.f32.mxu0 %vm3709_vm3, %v3710_v4 }
 0x19b   : > { %3533 = vmatprep.subr.bf16.mxu0 %v3707_v2 }
 0x19d   : > { %3163 = vmatmul.mubr.msk.f32.gmra.mrb[20].mxu1 %vm713_vm5, %v4140_v26  ;;  %3308 = vmatmul.mubr.msk.f32.gmra.mrb[70].mxu0 %vm713_vm5, %v4140_v26 }
 0x19e   : > { %3165 = vmatprep.mubr.msk.f32.mxu1 %vm3709_vm3, %v3710_v4  ;;  %3310 = vmatprep.mubr.msk.f32.mxu0 %vm3709_vm3, %v3710_v4 }
 0x1a1   : > { %3166 = vmatmul.mubr.msk.f32.gmra.mrb[22].mxu1 %vm713_vm5, %v4159_v51  ;;  %3311 = vmatmul.mubr.msk.f32.gmra.mrb[72].mxu0 %vm713_vm5, %v4159_v51 }
 0x1a2   : > { %3168 = vmatprep.mubr.msk.f32.mxu1 %vm3709_vm3, %v3710_v4  ;;  %3313 = vmatprep.mubr.msk.f32.mxu0 %vm3709_vm3, %v3710_v4 }
 0x1a5   : > { %3169 = vmatmul.mubr.msk.f32.gmra.mrb[24].mxu1 %vm713_vm5, %v4170_v53  ;;  %3314 = vmatmul.mubr.msk.f32.gmra.mrb[74].mxu0 %vm713_vm5, %v4170_v53 }
 0x1a6   : > { %3171 = vmatprep.mubr.msk.f32.mxu1 %vm3709_vm3, %v3710_v4  ;;  %3316 = vmatprep.mubr.msk.f32.mxu0 %vm3709_vm3, %v3710_v4 }
 0x1a9   : > { %3172 = vmatmul.mubr.msk.f32.gmra.mrb[26].mxu1 %vm713_vm5, %v4186_v57  ;;  %3317 = vmatmul.mubr.msk.f32.gmra.mrb[76].mxu0 %vm713_vm5, %v4186_v57 }
 0x1aa   : > { %3182 = vmatprep.mubr.msk.f32.mxu1 %vm3709_vm3, %v3710_v4  ;;  %3356 = vmatprep.mubr.msk.f32.mxu0 %vm3709_vm3, %v3710_v4 }
 0x1ad   : > { %3183 = vmatmul.mubr.msk.f32.vlgmr.msra.gmra.mrb[28].mxu1 %vm713_vm5, %v4057_v29  ;;  %3357 = vmatmul.mubr.msk.f32.vlgmr.msra.gmra.mrb[78].mxu0 %vm713_vm5, %v4057_v29 }
 0x1ae   : > { %3499 = vmatpush3.bf16.msra.mxu1 %v3498_v7  ;;  %3185 = vmatprep.mubr.msk.f32.mxu1 %vm3709_vm3, %v3710_v4 }
 0x1af   : > { %3359 = vmatprep.mubr.msk.f32.mxu0 %vm3709_vm3, %v3710_v4  ;;  %3500 = vmatprep.subr.bf16.mxu1 %v3707_v2 }
 0x1b1   : > { %3186 = vmatmul.mubr.msk.f32.gmra.mrb[30].mxu1 %vm713_vm5, %v4089_v8  ;;  %3360 = vmatmul.mubr.msk.f32.gmra.mrb[80].mxu0 %vm713_vm5, %v4089_v8 }
 0x1b2   : > { %3188 = vmatprep.mubr.msk.f32.mxu1 %vm3709_vm3, %v3710_v4  ;;  %3362 = vmatprep.mubr.msk.f32.mxu0 %vm3709_vm3, %v3710_v4 }
 0x1b3   : > { %3502 = vmatpush3.bf16.msra.mxu1 %v3501_v11 }
 0x1b4   : > { %3509 = vmatprep.subr.bf16.mxu1 %v3707_v2 }
 0x1b5   : > { %3189 = vmatmul.mubr.msk.f32.gmra.mrb[32].mxu1 %vm713_vm5, %v4117_v54  ;;  %3363 = vmatmul.mubr.msk.f32.gmra.mrb[82].mxu0 %vm713_vm5, %v4117_v54 }
 0x1b6   : > { %3191 = vmatprep.mubr.msk.f32.mxu1 %vm3709_vm3, %v3710_v4  ;;  %3365 = vmatprep.mubr.msk.f32.mxu0 %vm3709_vm3, %v3710_v4 }
 0x1b9   : > { %3192 = vmatmul.mubr.msk.f32.gmra.mrb[34].mxu1 %vm713_vm5, %v4140_v26  ;;  %3366 = vmatmul.mubr.msk.f32.gmra.mrb[84].mxu0 %vm713_vm5, %v4140_v26 }
 0x1ba   : > { %3194 = vmatprep.mubr.msk.f32.mxu1 %vm3709_vm3, %v3710_v4  ;;  %3368 = vmatprep.mubr.msk.f32.mxu0 %vm3709_vm3, %v3710_v4 }
 0x1bd   : > { %3195 = vmatmul.mubr.msk.f32.gmra.mrb[36].mxu1 %vm713_vm5, %v4159_v51  ;;  %3369 = vmatmul.mubr.msk.f32.gmra.mrb[86].mxu0 %vm713_vm5, %v4159_v51 }
 0x1be   : > { %3197 = vmatprep.mubr.msk.f32.mxu1 %vm3709_vm3, %v3710_v4  ;;  %3371 = vmatprep.mubr.msk.f32.mxu0 %vm3709_vm3, %v3710_v4 }
 0x1c1   : > { %3198 = vmatmul.mubr.msk.f32.gmra.mrb[38].mxu1 %vm713_vm5, %v4170_v53  ;;  %3372 = vmatmul.mubr.msk.f32.gmra.mrb[88].mxu0 %vm713_vm5, %v4170_v53 }
 0x1c2   : > { %3200 = vmatprep.mubr.msk.f32.mxu1 %vm3709_vm3, %v3710_v4  ;;  %3374 = vmatprep.mubr.msk.f32.mxu0 %vm3709_vm3, %v3710_v4 }
 0x1c5   : > { %3201 = vmatmul.mubr.msk.f32.gmra.mrb[40].mxu1 %vm713_vm5, %v4186_v57  ;;  %3375 = vmatmul.mubr.msk.f32.gmra.mrb[90].mxu0 %vm713_vm5, %v4186_v57 }
 0x1c6   : > { %3211 = vmatprep.mubr.msk.f32.mxu1 %vm3709_vm3, %v3710_v4  ;;  %3393 = vmatprep.mubr.msk.f32.mxu0 %vm3709_vm3, %v3710_v4 }
 0x1c9   : > { %3212 = vmatmul.mubr.msk.f32.vlgmr.msra.gmra.mrb[42].mxu1 %vm713_vm5, %v4057_v29 }
 0x1ca   : > { %3511 = vmatpush3.bf16.msra.mxu1 %v3510_v14  ;;  %3214 = vmatprep.mubr.msk.f32.mxu1 %vm3709_vm3, %v3710_v4 }
 0x1cb   : > { %3512 = vmatprep.subr.bf16.mxu1 %v3707_v2 }
 0x1cd   : > { %3215 = vmatmul.mubr.msk.f32.gmra.mrb[44].mxu1 %vm713_vm5, %v4089_v8 }
 0x1ce   : > { %3217 = vmatprep.mubr.msk.f32.mxu1 %vm3709_vm3, %v3710_v4  ;;  %3514 = vmatpush3.bf16.msra.mxu1 %v3513_v17 }
 0x1cf   : > { %3521 = vmatprep.subr.bf16.mxu1 %v3707_v2 }
 0x1d1   : > { %3218 = vmatmul.mubr.msk.f32.gmra.mrb[46].mxu1 %vm713_vm5, %v4117_v54 }
 0x1d2   : > { %3220 = vmatprep.mubr.msk.f32.mxu1 %vm3709_vm3, %v3710_v4 }
 0x1d5   : > { %3221 = vmatmul.mubr.msk.f32.gmra.mrb[48].mxu1 %vm713_vm5, %v4140_v26 }
 0x1d6   : > { %3223 = vmatprep.mubr.msk.f32.mxu1 %vm3709_vm3, %v3710_v4 }
 0x1d9   : > { %3224 = vmatmul.mubr.msk.f32.gmra.mrb[50].mxu1 %vm713_vm5, %v4159_v51 }
 0x1da   : > { %3226 = vmatprep.mubr.msk.f32.mxu1 %vm3709_vm3, %v3710_v4 }
 0x1dd   : > { %3227 = vmatmul.mubr.msk.f32.gmra.mrb[52].mxu1 %vm713_vm5, %v4170_v53 }
 0x1de   : > { %3229 = vmatprep.mubr.msk.f32.mxu1 %vm3709_vm3, %v3710_v4 }
 0x1e1   : > { %3230 = vmatmul.mubr.msk.f32.gmra.mrb[54].mxu1 %vm713_vm5, %v4186_v57 }
 0x1e2   : > { %3269 = vmatprep.mubr.msk.f32.mxu1 %vm3709_vm3, %v3710_v4 }
 0x1e5   : > { %3270 = vmatmul.mubr.msk.f32.vlgmr.msra.gmra.mrb[56].mxu1 %vm713_vm5, %v4057_v29 }
 0x1e6   : > { %3523 = vmatpush3.bf16.msra.mxu1 %v3522_v20  ;;  %3272 = vmatprep.mubr.msk.f32.mxu1 %vm3709_vm3, %v3710_v4 }
 0x1e7   : > { %3524 = vmatprep.subr.bf16.mxu1 %v3707_v2 }
 0x1e9   : > { %3273 = vmatmul.mubr.msk.f32.gmra.mrb[58].mxu1 %vm713_vm5, %v4089_v8 }
 0x1ea   : > { %3275 = vmatprep.mubr.msk.f32.mxu1 %vm3709_vm3, %v3710_v4  ;;  %3526 = vmatpush3.bf16.msra.mxu1 %v3525_v23  ;;  %v2201_v23 = vld [vmem:[%s4727_s5 + $0x8] sm:$0xff] }
 0x1eb   : > { %3545 = vmatprep.subr.bf16.mxu1 %v3707_v2 }
 0x1ed   : > { %3276 = vmatmul.mubr.msk.f32.gmra.mrb[60].mxu1 %vm713_vm5, %v4117_v54 }
 0x1ee   : > { %3278 = vmatprep.mubr.msk.f32.mxu1 %vm3709_vm3, %v3710_v4 }
 0x1f1   : > { %3279 = vmatmul.mubr.msk.f32.gmra.mrb[62].mxu1 %vm713_vm5, %v4140_v26 }
 0x1f2   : > { %3281 = vmatprep.mubr.msk.f32.mxu1 %vm3709_vm3, %v3710_v4 }
 0x1f5   : > { %3282 = vmatmul.mubr.msk.f32.gmra.mrb[64].mxu1 %vm713_vm5, %v4159_v51 }
 0x1f6   : > { %3284 = vmatprep.mubr.msk.f32.mxu1 %vm3709_vm3, %v3710_v4 }
 0x1f9   : > { %3285 = vmatmul.mubr.msk.f32.gmra.mrb[66].mxu1 %vm713_vm5, %v4170_v53 }
 0x1fa   : > { %3287 = vmatprep.mubr.msk.f32.mxu1 %vm3709_vm3, %v3710_v4 }
 0x1fd   : > { %3288 = vmatmul.mubr.msk.f32.gmra.mrb[68].mxu1 %vm713_vm5, %v4186_v57 }
 0x1fe   : > { %3327 = vmatprep.mubr.msk.f32.mxu1 %vm3709_vm3, %v3710_v4 }
 0x201   : > { %3328 = vmatmul.mubr.msk.f32.vlgmr.msra.gmra.mrb[70].mxu1 %vm713_vm5, %v4057_v29 }
 0x202   : > { %3330 = vmatprep.mubr.msk.f32.mxu1 %vm3709_vm3, %v3710_v4 }
 0x205   : > { %3331 = vmatmul.mubr.msk.f32.gmra.mrb[72].mxu1 %vm713_vm5, %v4089_v8 }
 0x206   : > { %3333 = vmatprep.mubr.msk.f32.mxu1 %vm3709_vm3, %v3710_v4 }
 0x209   : > { %3334 = vmatmul.mubr.msk.f32.gmra.mrb[74].mxu1 %vm713_vm5, %v4117_v54 }
 0x20a   : > { %3336 = vmatprep.mubr.msk.f32.mxu1 %vm3709_vm3, %v3710_v4 }
 0x20d   : > { %3337 = vmatmul.mubr.msk.f32.gmra.mrb[76].mxu1 %vm713_vm5, %v4140_v26 }
 0x20e   : > { %3339 = vmatprep.mubr.msk.f32.mxu1 %vm3709_vm3, %v3710_v4 }
 0x211   : > { %3340 = vmatmul.mubr.msk.f32.gmra.mrb[78].mxu1 %vm713_vm5, %v4159_v51 }
 0x212   : > { %3342 = vmatprep.mubr.msk.f32.mxu1 %vm3709_vm3, %v3710_v4 }
 0x213   : > { %v1152_v29 = vpop.f32.mrb[0].mxu1  ;;  %v1585_v8 = vpop.f32.mrb[50].mxu0 }
 0x214   : > { %1187 = vst.msk [vmem:[#allocation6] sm:$0xff] %vm1186_vm10, %v1152_v29  ;;  %v3126_v54 = vpop.f32.mrb[1].mxu1  ;;  %v3242_v24 = vpop.f32.mrb[51].mxu0  ;;  %v2208_v29 = vld [vmem:[%s4727_s5 + $0x40] sm:$0xff]  ;;  %v2209_v8 = vld [vmem:[%s4727_s5 + $0x48] sm:$0xff] }
 0x215   : > { %3343 = vmatmul.mubr.msk.f32.gmra.mrb[80].mxu1 %vm713_vm5, %v4170_v53  ;;  %v3534_v54 = vpack.c.bf16 %v2201_v23, %v2200_v22  ;;  %v3546_v24 = vpack.c.bf16 %v2209_v8, %v2208_v29 }
 0x216   : > { %3345 = vmatprep.mubr.msk.f32.mxu1 %vm3709_vm3, %v3710_v4 }
 0x217   : > { %3535 = vmatpush3.bf16.msra.mxu0 %v3534_v54  ;;  %3547 = vmatpush3.bf16.msra.mxu1 %v3546_v24 }
 0x218   : > { %3536 = vmatprep.subr.bf16.mxu0 %v3707_v2  ;;  %3548 = vmatprep.subr.bf16.mxu1 %v3707_v2 }
 0x219   : > { %3346 = vmatmul.mubr.msk.f32.gmra.mrb[82].mxu1 %vm713_vm5, %v4186_v57 }
 0x21a   : > { %3412 = vmatprep.mubr.msk.f32.mxu1 %vm3709_vm3, %v3710_v4 }
 0x21d   : > { %v1157_v25 = vpop.f32.mrb[2].mxu1  ;;  %v1590_v26 = vpop.f32.mrb[52].mxu0 }
 0x21e   : > { %1188 = vst.msk [vmem:[#allocation6 + $0x8] sm:$0xff] %vm1186_vm10, %v1157_v25  ;;  %1621 = vst.msk [vmem:[#allocation6 + $0xe8] sm:$0xff] %vm1186_vm10, %v1590_v26  ;;  %v3129_v27 = vpop.f32.mrb[3].mxu1  ;;  %v3245_v28 = vpop.f32.mrb[53].mxu0  ;;  %v2210_v25 = vld [vmem:[%s4727_s5 + $0x50] sm:$0xff]  ;;  %v2211_v26 = vld [vmem:[%s4727_s5 + $0x58] sm:$0xff] }
 0x22d   : > { %v1162_v30 = vpop.f32.mrb[4].mxu1  ;;  %v1595_v31 = vpop.f32.mrb[54].mxu0 }
 0x22e   : > { %1189 = vst.msk [vmem:[#allocation6 + $0x10] sm:$0xff] %vm1186_vm10, %v1162_v30  ;;  %1622 = vst.msk [vmem:[#allocation6 + $0xf0] sm:$0xff] %vm1186_vm10, %v1595_v31  ;;  %v3132_v32 = vpop.f32.mrb[5].mxu1  ;;  %v3248_v33 = vpop.f32.mrb[55].mxu0  ;;  %v2202_v30 = vld [vmem:[%s4727_s5 + $0x10] sm:$0xff]  ;;  %v2203_v31 = vld [vmem:[%s4727_s5 + $0x18] sm:$0xff] }
 0x23d   : > { %v1167_v34 = vpop.f32.mrb[6].mxu1  ;;  %v1600_v35 = vpop.f32.mrb[56].mxu0 }
 0x23e   : > { %1190 = vst.msk [vmem:[#allocation6 + $0x18] sm:$0xff] %vm1186_vm10, %v1167_v34  ;;  %1623 = vst.msk [vmem:[#allocation6 + $0xf8] sm:$0xff] %vm1186_vm10, %v1600_v35  ;;  %v3135_v36 = vpop.f32.mrb[7].mxu1  ;;  %v3251_v37 = vpop.f32.mrb[57].mxu0  ;;  %v3549_v34 = vpack.c.bf16 %v2211_v26, %v2210_v25  ;;  %v3537_v35 = vpack.c.bf16 %v2203_v31, %v2202_v30 }
 0x23f   : > { %v2204_v36 = vld [vmem:[%s4727_s5 + $0x20] sm:$0xff]  ;;  %v2205_v37 = vld [vmem:[%s4727_s5 + $0x28] sm:$0xff] }
 0x240   : > { %3538 = vmatpush3.bf16.msra.mxu0 %v3537_v35  ;;  %3550 = vmatpush3.bf16.msra.mxu1 %v3549_v34  ;;  %v2059_v35 = vld [vmem:[#allocation6] sm:$0x1f] }
 0x241   : > { %3539 = vmatprep.subr.bf16.mxu0 %v3707_v2  ;;  %3551 = vmatprep.subr.bf16.mxu1 %v3707_v2 }
 0x252   : > { %v1172_v38 = vpop.f32.mrb[8].mxu1  ;;  %v1605_v39 = vpop.f32.mrb[58].mxu0 }
 0x253   : > { %1191 = vst.msk [vmem:[#allocation6 + $0x20] sm:$0xff] %vm1186_vm10, %v1172_v38  ;;  %1624 = vst.msk [vmem:[#allocation6 + $0x100] sm:$0xff] %vm1186_vm10, %v1605_v39  ;;  %v3138_v40 = vpop.f32.mrb[9].mxu1  ;;  %v3254_v41 = vpop.f32.mrb[59].mxu0  ;;  %v2212_v38 = vld [vmem:[%s4727_s5 + $0x60] sm:$0xff]  ;;  %v2213_v39 = vld [vmem:[%s4727_s5 + $0x68] sm:$0xff] }
 0x25c   : > { %v1177_v43 = vpop.f32.mrb[10].mxu1  ;;  %v1610_v44 = vpop.f32.mrb[60].mxu0 }
 0x25d   : > { %1625 = vst.msk [vmem:[#allocation6 + $0x108] sm:$0xff] %vm1186_vm10, %v1610_v44  ;;  %v3141_v45 = vpop.f32.mrb[11].mxu1  ;;  %v3257_v46 = vpop.f32.mrb[61].mxu0  ;;  %v3540_v43 = vpack.c.bf16 %v2205_v37, %v2204_v36 }
 0x25e   : > { %v3552_v46 = vpack.c.bf16 %v2213_v39, %v2212_v38 }
 0x25f   : > { %3541 = vmatpush3.bf16.msra.mxu0 %v3540_v43 }
 0x260   : > { %v1182_v47 = vpop.f32.mrb[12].mxu1  ;;  %v1615_v48 = vpop.f32.mrb[62].mxu0  ;;  %3553 = vmatpush3.bf16.msra.mxu1 %v3552_v46  ;;  %3542 = vmatprep.subr.bf16.mxu0 %v3707_v2 }
 0x261   : > { %v3144_v49 = vpop.f32.mrb[13].mxu1  ;;  %v3260_v50 = vpop.f32.mrb[63].mxu0  ;;  %v2206_v47 = vld [vmem:[%s4727_s5 + $0x30] sm:$0xff]  ;;  %v2207_v48 = vld [vmem:[%s4727_s5 + $0x38] sm:$0xff]  ;;  %3554 = vmatprep.subr.bf16.mxu1 %v3707_v2 }
 0x262   : > { %v2214_v49 = vld [vmem:[%s4727_s5 + $0x70] sm:$0xff]  ;;  %v2215_v50 = vld [vmem:[%s4727_s5 + $0x78] sm:$0xff] }
 0x264   : > { %v1261_v51 = vpop.f32.mrb[14].mxu1  ;;  %v1801_v52 = vpop.f32.mrb[64].mxu0 }
 0x265   : > { %1296 = vst.msk [vmem:[#allocation6 + $0x38] sm:$0xff] %vm1186_vm10, %v1261_v51  ;;  %v3155_v53 = vpop.f32.mrb[15].mxu1  ;;  %v3300_v55 = vpop.f32.mrb[65].mxu0 }
 0x266   : > { %v3543_v53 = vpack.c.bf16 %v2207_v48, %v2206_v47 }
 0x268   : > { %v1266_v56 = vpop.f32.mrb[16].mxu1  ;;  %v1806_v57 = vpop.f32.mrb[66].mxu0  ;;  %3544 = vmatpush3.bf16.msra.mxu0 %v3543_v53 }
 0x269   : > { %1297 = vst.msk [vmem:[#allocation6 + $0x40] sm:$0xff] %vm1186_vm10, %v1266_v56  ;;  %1837 = vst.msk [vmem:[#allocation6 + $0x158] sm:$0xff] %vm1186_vm10, %v1806_v57  ;;  %v3158_v58 = vpop.f32.mrb[17].mxu1  ;;  %v3303_v59 = vpop.f32.mrb[67].mxu0  ;;  %v3555_v57 = vpack.c.bf16 %v2215_v50, %v2214_v49  ;;  %3581 = vmatprep.subr.bf16.mxu0 %v3707_v2 }
 0x26b   : > { %3556 = vmatpush3.bf16.msra.mxu1 %v3555_v57 }
 0x26c   : > { %v1271_v60 = vpop.f32.mrb[18].mxu1  ;;  %v1811_v61 = vpop.f32.mrb[68].mxu0  ;;  %3557 = vmatprep.subr.bf16.mxu1 %v3707_v2  ;;  %v2061_v34 = vld [vmem:[#allocation6 + $0x39] sm:$0x1f] }
 0x26d   : > { %1298 = vst.msk [vmem:[#allocation6 + $0x48] sm:$0xff] %vm1186_vm10, %v1271_v60  ;;  %1838 = vst.msk [vmem:[#allocation6 + $0x160] sm:$0xff] %vm1186_vm10, %v1811_v61  ;;  %v3161_v62 = vpop.f32.mrb[19].mxu1  ;;  %v3306_v63 = vpop.f32.mrb[69].mxu0  ;;  %v2062_v38 = vadd.f32 %v2061_v34, %v2059_v35 }
 0x270   : > { %v1276_v0 = vpop.f32.mrb[20].mxu1  ;;  %v1816_v42 = vpop.f32.mrb[70].mxu0 }
 0x271   : > { %1299 = vst.msk [vmem:[#allocation6 + $0x50] sm:$0xff] %vm1186_vm10, %v1276_v0  ;;  %1839 = vst.msk [vmem:[#allocation6 + $0x168] sm:$0xff] %vm1186_vm10, %v1816_v42  ;;  %v3164_v1 = vpop.f32.mrb[21].mxu1  ;;  %v3309_v3 = vpop.f32.mrb[71].mxu0 }
 0x274   : > { %v1281_v5 = vpop.f32.mrb[22].mxu1  ;;  %v1821_v6 = vpop.f32.mrb[72].mxu0  ;;  %v2111_v48 = vld [vmem:[#allocation6 + $0x47] sm:$0x1f] }
 0x275   : > { %1300 = vst.msk [vmem:[#allocation6 + $0x58] sm:$0xff] %vm1186_vm10, %v1281_v5  ;;  %1840 = vst.msk [vmem:[#allocation6 + $0x170] sm:$0xff] %vm1186_vm10, %v1821_v6  ;;  %v3167_v7 = vpop.f32.mrb[23].mxu1  ;;  %v3312_v9 = vpop.f32.mrb[73].mxu0 }
 0x278   : > { %v1286_v10 = vpop.f32.mrb[24].mxu1  ;;  %v1826_v11 = vpop.f32.mrb[74].mxu0 }
 0x279   : > { %1841 = vst.msk [vmem:[#allocation6 + $0x178] sm:$0xff] %vm1186_vm10, %v1826_v11  ;;  %v3170_v12 = vpop.f32.mrb[25].mxu1  ;;  %v3315_v13 = vpop.f32.mrb[75].mxu0 }
 0x27c   : > { %v1291_v14 = vpop.f32.mrb[26].mxu1  ;;  %v1831_v15 = vpop.f32.mrb[76].mxu0  ;;  %v2121_v35 = vld [vmem:[#allocation6 + $0x16c] sm:$0x1f] }
 0x27d   : > { %v3173_v16 = vpop.f32.mrb[27].mxu1  ;;  %v3318_v17 = vpop.f32.mrb[77].mxu0 }
 0x280   : > { %v1369_v18 = vpop.f32.mrb[28].mxu1  ;;  %v2017_v19 = vpop.f32.mrb[78].mxu0 }
 0x281   : > { %1404 = vst.msk [vmem:[#allocation6 + $0x70] sm:$0xff] %vm1186_vm10, %v1369_v18  ;;  %v3184_v20 = vpop.f32.mrb[29].mxu1  ;;  %v3358_v21 = vpop.f32.mrb[79].mxu0 }
 0x284   : > { %v1374_v27 = vpop.f32.mrb[30].mxu1  ;;  %v2022_v28 = vpop.f32.mrb[80].mxu0 }
 0x285   : > { %1405 = vst.msk [vmem:[#allocation6 + $0x78] sm:$0xff] %vm1186_vm10, %v1374_v27  ;;  %v3187_v32 = vpop.f32.mrb[31].mxu1  ;;  %v3361_v33 = vpop.f32.mrb[81].mxu0 }
 0x288   : > { %v1379_v40 = vpop.f32.mrb[32].mxu1  ;;  %v2027_v41 = vpop.f32.mrb[82].mxu0  ;;  %v2063_v36 = vld [vmem:[#allocation6 + $0x72] sm:$0x1f] }
 0x289   : > { %1406 = vst.msk [vmem:[#allocation6 + $0x80] sm:$0xff] %vm1186_vm10, %v1379_v40  ;;  %2054 = vst.msk [vmem:[#allocation6 + $0x1d0] sm:$0xff] %vm1186_vm10, %v2027_v41  ;;  %v3190_v44 = vpop.f32.mrb[33].mxu1  ;;  %v3364_v45 = vpop.f32.mrb[83].mxu0  ;;  %v2089_v40 = vld [vmem:[#allocation6 + $0x40] sm:$0x1f]  ;;  %v2064_v43 = vadd.f32 %v2063_v36, %v2062_v38 }
 0x28a   : > { %v2087_v44 = vld [vmem:[#allocation6 + $0x7] sm:$0x1f] }
 0x28b   : > { %v2090_v47 = vadd.f32 %v2089_v40, %v2087_v44 }
 0x28c   : > { %v1384_v51 = vpop.f32.mrb[34].mxu1  ;;  %v2032_v52 = vpop.f32.mrb[84].mxu0  ;;  %v2091_v45 = vld [vmem:[#allocation6 + $0x79] sm:$0x1f] }
 0x28d   : > { %1407 = vst.msk [vmem:[#allocation6 + $0x88] sm:$0xff] %vm1186_vm10, %v1384_v51  ;;  %2055 = vst.msk [vmem:[#allocation6 + $0x1d8] sm:$0xff] %vm1186_vm10, %v2032_v52  ;;  %v3193_v55 = vpop.f32.mrb[35].mxu1  ;;  %v3367_v56 = vpop.f32.mrb[85].mxu0  ;;  %v2109_v52 = vld [vmem:[#allocation6 + $0xe] sm:$0x1f]  ;;  %v2092_v53 = vadd.f32 %v2091_v45, %v2090_v47 }
 0x28e   : > { %v2067_v56 = vld [vmem:[#allocation6 + $0xe8] sm:$0x1f]  ;;  %v2112_v57 = vadd.f32 %v2111_v48, %v2109_v52 }
 0x290   : > { %v1389_v58 = vpop.f32.mrb[36].mxu1  ;;  %v2037_v59 = vpop.f32.mrb[86].mxu0  ;;  %v2113_v55 = vld [vmem:[#allocation6 + $0x80] sm:$0x1f] }
 0x291   : > { %1408 = vst.msk [vmem:[#allocation6 + $0x90] sm:$0xff] %vm1186_vm10, %v1389_v58  ;;  %2056 = vst.msk [vmem:[#allocation6 + $0x1e0] sm:$0xff] %vm1186_vm10, %v2037_v59  ;;  %v3196_v60 = vpop.f32.mrb[37].mxu1  ;;  %v3370_v61 = vpop.f32.mrb[87].mxu0 }
 0x294   : > { %v1394_v62 = vpop.f32.mrb[38].mxu1  ;;  %v2042_v63 = vpop.f32.mrb[88].mxu0  ;;  %v2103_v40 = vld [vmem:[#allocation6 + $0x1d7] sm:$0x1f] }
 0x295   : > { %2057 = vst.msk [vmem:[#allocation6 + $0x1e8] sm:$0xff] %vm1186_vm10, %v2042_v63  ;;  %v3199_v0 = vpop.f32.mrb[39].mxu1  ;;  %v3373_v42 = vpop.f32.mrb[89].mxu0 }
 0x296   : > { %v2095_v0 = vld [vmem:[#allocation6 + $0xef] sm:$0x1f] }
 0x297   : > { %v2133_v42 = vld [vmem:[#allocation6 + $0x4e] sm:$0x1f] }
 0x298   : > { %v1399_v1 = vpop.f32.mrb[40].mxu1  ;;  %v2047_v3 = vpop.f32.mrb[90].mxu0  ;;  %v2125_v52 = vld [vmem:[#allocation6 + $0x1de] sm:$0x1f] }
 0x299   : > { %2058 = vst.msk [vmem:[#allocation6 + $0x1f0] sm:$0x1] %vm1193_vm11, %v2047_v3  ;;  %v3202_v5 = vpop.f32.mrb[41].mxu1  ;;  %v3376_v6 = vpop.f32.mrb[91].mxu0  ;;  %v2114_v1 = vadd.f32 %v2113_v55, %v2112_v57  ;;  %v2131_v3 = vld [vmem:[#allocation6 + $0x15] sm:$0x1f] }
 0x29a   : > { %v2135_v5 = vld [vmem:[#allocation6 + $0x87] sm:$0x1f] }
 0x29c   : > { %v1477_v7 = vpop.f32.mrb[42].mxu1 }
 0x29d   : > { %1512 = vst.msk [vmem:[#allocation6 + $0xa8] sm:$0xff] %vm1186_vm10, %v1477_v7  ;;  %v3213_v9 = vpop.f32.mrb[43].mxu1 }
 0x2a0   : > { %v1482_v10 = vpop.f32.mrb[44].mxu1 }
 0x2a1   : > { %1513 = vst.msk [vmem:[#allocation6 + $0xb0] sm:$0xff] %vm1186_vm10, %v1482_v10  ;;  %v3216_v11 = vpop.f32.mrb[45].mxu1 }
 0x2a2   : > { %v2134_v11 = vadd.f32 %v2133_v42, %v2131_v3 }
 0x2a4   : > { %v1487_v12 = vpop.f32.mrb[46].mxu1 }
 0x2a5   : > { %1514 = vst.msk [vmem:[#allocation6 + $0xb8] sm:$0xff] %vm1186_vm10, %v1487_v12  ;;  %v3219_v13 = vpop.f32.mrb[47].mxu1 }
 0x2a8   : > { %v1492_v14 = vpop.f32.mrb[48].mxu1  ;;  %v2065_v41 = vld [vmem:[#allocation6 + $0xaf] sm:$0x1f] }
 0x2a9   : > { %1515 = vst.msk [vmem:[#allocation6 + $0xc0] sm:$0xff] %vm1186_vm10, %v1492_v14  ;;  %v3222_v15 = vpop.f32.mrb[49].mxu1  ;;  %v2066_v49 = vadd.f32 %v2065_v41, %v2064_v43  ;;  %v2071_v14 = vld [vmem:[#allocation6 + $0x15e] sm:$0x1f] }
 0x2ab   : > { %v2068_v62 = vadd.f32 %v2067_v56, %v2066_v49 }
 0x2ac   : > { %v1497_v16 = vpop.f32.mrb[50].mxu1  ;;  %v2093_v51 = vld [vmem:[#allocation6 + $0xb6] sm:$0x1f] }
 0x2ad   : > { %1516 = vst.msk [vmem:[#allocation6 + $0xc8] sm:$0xff] %vm1186_vm10, %v1497_v16  ;;  %v3225_v17 = vpop.f32.mrb[51].mxu1  ;;  %v2094_v60 = vadd.f32 %v2093_v51, %v2092_v53  ;;  %v2117_v16 = vld [vmem:[#allocation6 + $0xf6] sm:$0x1f] }
 0x2ae   : > { %v2136_v17 = vadd.f32 %v2135_v5, %v2134_v11  ;;  %v2143_v51 = vld [vmem:[#allocation6 + $0x173] sm:$0x1f] }
 0x2af   : > { %v2096_v12 = vadd.f32 %v2095_v0, %v2094_v60  ;;  %v2147_v60 = vld [vmem:[#allocation6 + $0x1e5] sm:$0x1f] }
 0x2b0   : > { %v1502_v18 = vpop.f32.mrb[52].mxu1  ;;  %v2115_v61 = vld [vmem:[#allocation6 + $0xbd] sm:$0x1f] }
 0x2b1   : > { %v3228_v19 = vpop.f32.mrb[53].mxu1  ;;  %v2116_v7 = vadd.f32 %v2115_v61, %v2114_v1 }
 0x2b4   : > { %v1507_v20 = vpop.f32.mrb[54].mxu1  ;;  %v2137_v15 = vld [vmem:[#allocation6 + $0xc4] sm:$0x1f] }
 0x2b5   : > { %v3231_v21 = vpop.f32.mrb[55].mxu1 }
 0x2b6   : > { %v2118_v21 = vadd.f32 %v2117_v16, %v2116_v7  ;;  %v2217_v16 = vld [vmem:[%s4727_s5 + $0x88] sm:$0xff] }
 0x2b8   : > { %v1693_v22 = vpop.f32.mrb[56].mxu1 }
 0x2b9   : > { %v3271_v23 = vpop.f32.mrb[57].mxu1 }
 0x2bc   : > { %v1698_v29 = vpop.f32.mrb[58].mxu1 }
 0x2bd   : > { %1729 = vst.msk [vmem:[#allocation6 + $0x120] sm:$0xff] %vm1186_vm10, %v1698_v29  ;;  %v3274_v8 = vpop.f32.mrb[59].mxu1  ;;  %v2138_v29 = vadd.f32 %v2137_v15, %v2136_v17  ;;  %v2216_v15 = vld [vmem:[%s4727_s5 + $0x80] sm:$0xff] }
 0x2c0   : > { %v1703_v54 = vpop.f32.mrb[60].mxu1 }
 0x2c1   : > { %1730 = vst.msk [vmem:[#allocation6 + $0x128] sm:$0xff] %vm1186_vm10, %v1703_v54  ;;  %v3277_v24 = vpop.f32.mrb[61].mxu1 }
 0x2c2   : > { %v2099_v24 = vld [vmem:[#allocation6 + $0x165] sm:$0x1f] }
 0x2c4   : > { %v1708_v25 = vpop.f32.mrb[62].mxu1  ;;  %v2069_v58 = vld [vmem:[#allocation6 + $0x121] sm:$0x1f] }
 0x2c5   : > { %1731 = vst.msk [vmem:[#allocation6 + $0x130] sm:$0xff] %vm1186_vm10, %v1708_v25  ;;  %v3280_v26 = vpop.f32.mrb[63].mxu1  ;;  %v2070_v6 = vadd.f32 %v2069_v58, %v2068_v62  ;;  %v2075_v25 = vld [vmem:[#allocation6 + $0x1d0] sm:$0x1f] }
 0x2c7   : > { %v2072_v20 = vadd.f32 %v2071_v14, %v2070_v6 }
 0x2c8   : > { %v1713_v27 = vpop.f32.mrb[64].mxu1  ;;  %v2097_v9 = vld [vmem:[#allocation6 + $0x128] sm:$0x1f] }
 0x2c9   : > { %1732 = vst.msk [vmem:[#allocation6 + $0x138] sm:$0xff] %vm1186_vm10, %v1713_v27  ;;  %v3283_v28 = vpop.f32.mrb[65].mxu1  ;;  %v2098_v18 = vadd.f32 %v2097_v9, %v2096_v12  ;;  %v2855_v27 = vld [vmem:[%s4726_s4] ss:$0 sm:$0xff] }
 0x2ca   : > { %v2139_v28 = vld [vmem:[#allocation6 + $0xfd] sm:$0x1f] }
 0x2cb   : > { %v2140_v36 = vadd.f32 %v2139_v28, %v2138_v29  ;;  %v3558_v29 = vpack.c.bf16 %v2217_v16, %v2216_v15 }
 0x2cc   : > { %v1718_v30 = vpop.f32.mrb[66].mxu1  ;;  %v2119_v19 = vld [vmem:[#allocation6 + $0x12f] sm:$0x1f] }
 0x2cd   : > { %1733 = vst.msk [vmem:[#allocation6 + $0x140] sm:$0xff] %vm1186_vm10, %v1718_v30  ;;  %v3286_v31 = vpop.f32.mrb[67].mxu1  ;;  %v2120_v26 = vadd.f32 %v2119_v19, %v2118_v21 }
 0x2cf   : > { %v2122_v41 = vadd.f32 %v2121_v35, %v2120_v26  ;;  %v2220_v26 = vld [vmem:[%s4727_s5 + $0xa0] sm:$0xff] }
 0x2d0   : > { %v1723_v32 = vpop.f32.mrb[68].mxu1  ;;  %v2141_v30 = vld [vmem:[#allocation6 + $0x136] sm:$0x1f] }
 0x2d1   : > { %v3289_v33 = vpop.f32.mrb[69].mxu1  ;;  %v2100_v32 = vadd.f32 %v2099_v24, %v2098_v18  ;;  %v2142_v43 = vadd.f32 %v2141_v30, %v2140_v36  ;;  %v2219_v24 = vld [vmem:[%s4727_s5 + $0x98] sm:$0xff]  ;;  %v2222_v30 = vld [vmem:[%s4727_s5 + $0xb0] sm:$0xff] }
 0x2d2   : > { %v2226_v36 = vld [vmem:[%s4727_s5 + $0xd0] sm:$0xff] }
 0x2d3   : > { %v2144_v56 = vadd.f32 %v2143_v51, %v2142_v43  ;;  %v2535_v51 = vld [vmem:[%s4729_s7 + $0x10] sm:$0xff] }
 0x2d4   : > { %v1909_v37 = vpop.f32.mrb[70].mxu1 }
 0x2d5   : > { %v3329_v39 = vpop.f32.mrb[71].mxu1 }
 0x2d8   : > { %v1914_v46 = vpop.f32.mrb[72].mxu1 }
 0x2d9   : > { %1945 = vst.msk [vmem:[#allocation6 + $0x190] sm:$0xff] %vm1186_vm10, %v1914_v46  ;;  %v3332_v50 = vpop.f32.mrb[73].mxu1 }
 0x2dc   : > { %v1919_v59 = vpop.f32.mrb[74].mxu1 }
 0x2dd   : > { %1946 = vst.msk [vmem:[#allocation6 + $0x198] sm:$0xff] %vm1186_vm10, %v1919_v59  ;;  %v3335_v63 = vpop.f32.mrb[75].mxu1 }
 0x2e0   : > { %v1924_v10 = vpop.f32.mrb[76].mxu1 }
 0x2e1   : > { %1947 = vst.msk [vmem:[#allocation6 + $0x1a0] sm:$0xff] %vm1186_vm10, %v1924_v10  ;;  %v3338_v13 = vpop.f32.mrb[77].mxu1 }
 0x2e4   : > { %v2073_v22 = vld [vmem:[#allocation6 + $0x197] sm:$0x1f]  ;;  %v1929_v23 = vpop.f32.mrb[78].mxu1 }
 0x2e5   : > { %v2074_v8 = vadd.f32 %v2073_v22, %v2072_v20  ;;  %1948 = vst.msk [vmem:[#allocation6 + $0x1a8] sm:$0xff] %vm1186_vm10, %v1929_v23  ;;  %v3341_v54 = vpop.f32.mrb[79].mxu1 }
 0x2e6   : > { %v2218_v54 = vld [vmem:[%s4727_s5 + $0x90] sm:$0xff] }
 0x2e7   : > { %v2076_v31 = vadd.f32 %v2075_v25, %v2074_v8  ;;  %v3561_v25 = vpack.c.bf16 %v2219_v24, %v2218_v54 }
 0x2e8   : > { %v2101_v33 = vld [vmem:[#allocation6 + $0x19e] sm:$0x1f]  ;;  %v1934_v34 = vpop.f32.mrb[80].mxu1 }
 0x2e9   : > { %v2083_v37 = vadd.f32 %v2855_v27, %v2076_v31  ;;  %v2102_v38 = vadd.f32 %v2101_v33, %v2100_v32  ;;  %1949 = vst.msk [vmem:[#allocation6 + $0x1b0] sm:$0xff] %vm1186_vm10, %v1934_v34  ;;  %v3344_v39 = vpop.f32.mrb[81].mxu1  ;;  %v2223_v31 = vld [vmem:[%s4727_s5 + $0xb8] sm:$0xff]  ;;  %v2224_v33 = vld [vmem:[%s4727_s5 + $0xc0] sm:$0xff]  ;;  %v2225_v34 = vld [vmem:[%s4727_s5 + $0xc8] sm:$0xff] }
 0x2ea   : > { %v3567_v32 = vpack.c.bf16 %v2223_v31, %v2222_v30  ;;  %v3570_v35 = vpack.c.bf16 %v2225_v34, %v2224_v33 }
 0x2eb   : > { %v2084_v44 = vmax.f32 %v2083_v37, 0.0  ;;  %v2104_v45 = vadd.f32 %v2103_v40, %v2102_v38  ;;  %v2227_v37 = vld [vmem:[%s4727_s5 + $0xd8] sm:$0xff]  ;;  %v2228_v40 = vld [vmem:[%s4727_s5 + $0xe0] sm:$0xff] }
 0x2ec   : > { %v2123_v46 = vld [vmem:[#allocation6 + $0x1a5] sm:$0x1f]  ;;  %v1939_v47 = vpop.f32.mrb[82].mxu1  ;;  %v3573_v39 = vpack.c.bf16 %v2227_v37, %v2226_v36 }
 0x2ed   : > { %2086 = vst.msk [vmem:[#allocation7] sm:$0x1f] %vm2085_vm12, %v2084_v44  ;;  %v2105_v48 = vadd.f32 %v2855_v27, %v2104_v45  ;;  %v2124_v49 = vadd.f32 %v2123_v46, %v2122_v41  ;;  %v3347_v50 = vpop.f32.mrb[83].mxu1  ;;  %v2229_v41 = vld [vmem:[%s4727_s5 + $0xe8] sm:$0xff]  ;;  %v2230_v44 = vld [vmem:[%s4727_s5 + $0xf0] sm:$0xff]  ;;  %v2231_v45 = vld [vmem:[%s4727_s5 + $0xf8] sm:$0xff] }
 0x2ee   : > { %v3576_v43 = vpack.c.bf16 %v2229_v41, %v2228_v40  ;;  %v3579_v46 = vpack.c.bf16 %v2231_v45, %v2230_v44 }
 0x2ef   : > { %v2106_v53 = vmax.f32 %v2105_v48, 0.0  ;;  %v2126_v55 = vadd.f32 %v2125_v52, %v2124_v49  ;;  %v2533_v48 = vld [vmem:[%s4729_s7] sm:$0xff]  ;;  %v2534_v49 = vld [vmem:[%s4729_s7 + $0x8] sm:$0xff]  ;;  %v2536_v52 = vld [vmem:[%s4729_s7 + $0x18] sm:$0xff] }
 0x2f0   : > { %v2145_v57 = vld [vmem:[#allocation6 + $0x1ac] sm:$0x1f]  ;;  %v3582_v50 = vpack.c.bf16 %v2534_v49, %v2533_v48 }
 0x2f1   : > { %2108 = vst.msk [vmem:[#allocation7 + $0x8] sm:$0x1f] %vm2085_vm12, %v2106_v53  ;;  %v2127_v58 = vadd.f32 %v2855_v27, %v2126_v55  ;;  %v2146_v59 = vadd.f32 %v2145_v57, %v2144_v56  ;;  %v3585_v53 = vpack.c.bf16 %v2536_v52, %v2535_v51  ;;  %v2232_v57 = vld [vmem:[%s4728_s6] sm:$0x1] }
 0x2f3   : > { %v2128_v61 = vmax.f32 %v2127_v58, 0.0  ;;  %v2148_v62 = vadd.f32 %v2147_v60, %v2146_v59  ;;  %v2612_v59 = vld [vmem:[%s4731_s9] sm:$0xff]  ;;  %v2613_v60 = vld [vmem:[%s4731_s9 + $0x8] sm:$0xff] }
 0x2f4   : > { %v2175_v42 = vld [vmem:[#allocation7] sm:$0x1f] }
 0x2f5   : > { %2130 = vst.msk [vmem:[#allocation7 + $0x10] sm:$0x1f] %vm2085_vm12, %v2128_v61  ;;  %v2149_v63 = vadd.f32 %v2855_v27, %v2148_v62  ;;  %v2221_v27 = vld [vmem:[%s4727_s5 + $0xa8] sm:$0xff] }
 0x2f6   : > { %v3564_v28 = vpack.c.bf16 %v2221_v27, %v2220_v26 }
 0x2f7   : > { %v2150_v0 = vmax.f32 %v2149_v63, 0.0 }
 0x2f8   : > { %v2176_v1 = vld [vmem:[#allocation7 + $0x8] sm:$0x1f] }
 0x2f9   : > { %v2177_v3 = vmax.f32 %v2175_v42, %v2176_v1  ;;  %2152 = vst.msk [vmem:[#allocation7 + $0x18] sm:$0x1f] %vm2085_vm12, %v2150_v0  ;;  %v3588_v0 = vpack.c.bf16 %v2613_v60, %v2612_v59  ;;  %v2614_v1 = vld [vmem:[%s4731_s9 + $0x10] sm:$0xff] }
 0x2fb   : > { %2178 = vst.msk [vmem:[#allocation8] sm:$0x1f] %vm2085_vm12, %v2177_v3  ;;  %v2615_v3 = vld [vmem:[%s4731_s9 + $0x18] sm:$0xff] }
 0x2fc   : > { %v2179_v5 = vld [vmem:[#allocation7 + $0x10] sm:$0x1f] }
 0x300   : > { %v2180_v6 = vld [vmem:[#allocation7 + $0x18] sm:$0x1f] }
 0x301   : > { %v2181_v7 = vmax.f32 %v2179_v5, %v2180_v6  ;;  %v3591_v5 = vpack.c.bf16 %v2615_v3, %v2614_v1  ;;  %v2537_v6 = vld [vmem:[%s4730_s8] sm:$0x1] }
 0x302   : > { %v2184_v9 = vld [vmem:[#allocation8] sm:$0x1]  ;;  %v2186_v10 = vld [vmem:[#allocation8 + $0x1] sm:$0x1]  ;;  %v2192_v11 = vld [vmem:[#allocation8 + $0x2] sm:$0x1] }
 0x303   : > { %2183 = vst.msk [vmem:[#allocation8 + $0x8] sm:$0x1f] %vm2085_vm12, %v2181_v7  ;;  %v2188_v12 = vmax.f32 %v2184_v9, %v2186_v10  ;;  %v2194_v13 = vld [vmem:[#allocation8 + $0x3] sm:$0x1] }
 0x304   : > { %v2196_v14 = vmax.f32 %v2192_v11, %v2194_v13 }
 0x305   : > { %2190 = vst.msk [vmem:[#allocation9] sm:$0x1] %vm1193_vm11, %v2188_v12 }
 0x306   : > { %2198 = vst.msk [vmem:[#allocation9 + $0x1] sm:$0x1] %vm1193_vm11, %v2196_v14 }
 0x30a   : > { %v2185_v17 = vld [vmem:[#allocation8 + $0x8] sm:$0x1]  ;;  %v2187_v18 = vld [vmem:[#allocation8 + $0x9] sm:$0x1]  ;;  %v2193_v19 = vld [vmem:[#allocation8 + $0xa] sm:$0x1] }
 0x30b   : > { %v2189_v20 = vmax.f32 %v2185_v17, %v2187_v18  ;;  %v2195_v21 = vld [vmem:[#allocation8 + $0xb] sm:$0x1] }
 0x30c   : > { %v2197_v22 = vmax.f32 %v2193_v19, %v2195_v21 }
 0x30d   : > { %v2233_v23 = vld [vmem:[#allocation9] sm:$0x3]  ;;  %2191 = vst.msk [vmem:[#allocation9 + $0x2] sm:$0x1] %vm1193_vm11, %v2189_v20 }
 0x30e   : > { %3394 = vmatmul.mubr.msk.f32.vlgmr.msra.gmra.mrb[92].mxu0 %vm1186_vm10, %v2233_v23  ;;  %v2308_v8 = vrot.slane %v2233_v23, 1  ;;  %2199 = vst.msk [vmem:[#allocation9 + $0x3] sm:$0x1] %vm1193_vm11, %v2197_v22 }
 0x30f   : > { %3461 = vmatprep.mubr.msk.f32.mxu0 %vm3709_vm3, %v3710_v4  ;;  %3583 = vmatpush3.bf16.msra.mxu0 %v3582_v50 }
 0x310   : > { %3413 = vmatmul.mubr.msk.f32.vlgmr.msra.gmra.mrb[84].mxu1 %vm1186_vm10, %v2308_v8  ;;  %3584 = vmatprep.subr.bf16.mxu0 %v3707_v2 }
 0x311   : > { %3559 = vmatpush3.bf16.msra.mxu1 %v3558_v29  ;;  %3431 = vmatprep.mubr.msk.f32.mxu1 %vm3709_vm3, %v3710_v4 }
 0x312   : > { %3560 = vmatprep.subr.bf16.mxu1 %v3707_v2 }
 0x313   : > { %3586 = vmatpush3.bf16.msra.mxu0 %v3585_v53 }
 0x314   : > { %3587 = vmatprep.subr.bf16.mxu0 %v3707_v2 }
 0x315   : > { %3562 = vmatpush3.bf16.msra.mxu1 %v3561_v25  ;;  %v2383_v38 = vld [vmem:[#allocation9 + $0x2] sm:$0x3] }
 0x316   : > { %3563 = vmatprep.subr.bf16.mxu1 %v3707_v2  ;;  %v2458_v47 = vrot.slane %v2383_v38, 1 }
 0x319   : > { %3565 = vmatpush3.bf16.msra.mxu1 %v3564_v28 }
 0x31a   : > { %3566 = vmatprep.subr.bf16.mxu1 %v3707_v2 }
 0x31d   : > { %3568 = vmatpush3.bf16.msra.mxu1 %v3567_v32 }
 0x31e   : > { %3569 = vmatprep.subr.bf16.mxu1 %v3707_v2 }
 0x320   : > { %3432 = vmatmul.mubr.msk.f32.vlgmr.msra.gmra.mrb[84].mxu1 %vm1186_vm10, %v2383_v38 }
 0x321   : > { %3571 = vmatpush3.bf16.msra.mxu1 %v3570_v35  ;;  %3450 = vmatprep.mubr.msk.f32.mxu1 %vm3709_vm3, %v3710_v4 }
 0x322   : > { %3572 = vmatprep.subr.bf16.mxu1 %v3707_v2 }
 0x325   : > { %3574 = vmatpush3.bf16.msra.mxu1 %v3573_v39 }
 0x326   : > { %3575 = vmatprep.subr.bf16.mxu1 %v3707_v2 }
 0x329   : > { %3577 = vmatpush3.bf16.msra.mxu1 %v3576_v43 }
 0x32a   : > { %3578 = vmatprep.subr.bf16.mxu1 %v3707_v2 }
 0x32d   : > { %3580 = vmatpush3.bf16.msra.mxu1 %v3579_v46 }
 0x330   : > { %3451 = vmatmul.mubr.msk.f32.vlgmr.msra.gmra.mrb[84].mxu1 %vm1186_vm10, %v2458_v47 }
 0x3e1   : > { %v2303_v55 = vpop.f32.mrb[92].mxu0 }
 0x3e2   : > { %v3395_v56 = vpop.f32.mrb[93].mxu0  ;;  %v2307_v58 = vadd.f32 %v2303_v55, %v2232_v57 }
 0x403   : > { %v2527_v61 = vpop.f32.mrb[84].mxu1 }
 0x404   : > { %v3594_v62 = vadd.f32 %v2527_v61, %v2307_v58  ;;  %v3452_v63 = vpop.f32.mrb[85].mxu1 }
 0x406   : > { %v2532_v42 = vmax.f32 %v3594_v62, 0.0 }
 0x408   : > { %3462 = vmatmul.mubr.msk.f32.vlgmr.msra.gmra.mrb[94].mxu0 %vm713_vm5, %v2532_v42 }
 0x409   : > { %3589 = vmatpush3.bf16.msra.mxu0 %v3588_v0  ;;  %3472 = vmatprep.mubr.msk.f32.mxu0 %vm3709_vm3, %v3710_v4 }
 0x40a   : > { %3590 = vmatprep.subr.bf16.mxu0 %v3707_v2  ;;  %v2616_v2 = vld [vmem:[%s4732_s10] sm:$0x1] }
 0x40d   : > { %3592 = vmatpush3.bf16.msra.mxu0 %v3591_v5 }
 0x4db   : > { %v2607_v7 = vpop.f32.mrb[94].mxu0 }
 0x4dc   : > { %v2608_v9 = vadd.f32 %v2607_v7, %v2537_v6  ;;  %v3463_v10 = vpop.f32.mrb[95].mxu0 }
 0x4de   : > { %v2611_v4 = vmax.f32 %v2608_v9, 0.0 }
 0x4e0   : > { %3473 = vmatmul.mubr.msk.f32.vlgmr.msra.gmra.mrb[96].mxu0 %vm713_vm5, %v2611_v4 }
 0x5b3   : > { %v2686_v11 = vpop.f32.mrb[96].mxu0 }
 0x5b4   : > { %v2687_v12 = vadd.f32 %v2686_v11, %v2616_v2  ;;  %v3474_v13 = vpop.f32.mrb[97].mxu0 }
 0x5b6   : > { %2691 = vst.msk [vmem:[%s378_s13] sm:$0x1] %vm2690_vm13, %v2687_v12 }
 0x5b7   : > { %3656 = shalt.err (!%p3653_p3)
}
 0x5b8   : > { %s3657_s25 = scalar_lea.hbm %s4680_s22, 16  ;;  %s3661_s15 = scalar_lea.hbm %s4733_s11, 32 }
 0x5b9   : > { %p3658_p4 = scmp.ne.s32.totalorder %s4680_s22, %s3657_s25  ;;  %p3662_p9 = scmp.lt.u32.totalorder %s4680_s22, %s4733_s11 }
 0x5ba   : > { %p3663_p10 = scmp.lt.u32.totalorder %s3661_s15, %s3657_s25  ;;  %p3665_p12 = scmp.lt.u32.totalorder %s3657_s25, %s4680_s22 }
 0x5bb   : > { %p3659_p7 = pnand %p3658_p4, %p3810_p5 }
 0x5bc   : > { %p3664_p11 = por %p3663_p10, %p3662_p9 }
 0x5bd   : > { %p3660_p8 = pneg %p3659_p7 }
 0x5be   : > { %p3666_p13 = por %p3665_p12, %p3664_p11 }
 0x5c0   : > { %p3667_p0 = pnand %p3666_p13, %p3660_p8 }
 0x5c2   : > { %3670 = shalt.err (!%p3667_p0)
}
 0x5c3   : > { %3600 = dma.vmem_to_hbm [thread:$0]  (%p3810_p5), %s4682_s14, 16, %s4680_s22, %s2693_s24  }
 0x5c4 PF: > { %p3606_p1 = scmp.ge.s32.totalorder %s3705_s20, 2  ;;  %s2717_s0 = sand.u32 1, %s3693_s17  }
 0x5c5   : > { %s2718_s29 = scalar_lea.sflag [#allocation11], %s2717_s0 }
 0x5c6   : > { %p3603_p2 = pnand %p3606_p1, %p3814_p6 }
 0x5c8   : > { %3688 = dma.done.wait (!%p3603_p2), %s2718_s29, 16  }
 0x5c9   : > { %3690 = vsyncadd (!%p3603_p2), %s2718_s29, 4294967280  ;;  %p21_p3 = scmp.ge.s32.totalorder %s3797_s23, 4   ;;  %s4738_s17 = smov %s3697_s18 }
 0x5ca   : > { %s4739_s18 = smov %s3701_s19  ;;  %s4740_s19 = smov %s3808_s26 }
 0x5cb   : > { %s4741_s20 = smov %s3797_s23  ;;  %23 = sbr.rel (!%p21_p3) target bundleno = 5 (0x5), region = 125 }
 0x5d2   :  { %2722 = vsyncpa [#allocation11], 1 }
 0x5d3   :  { %2724 = vsyncpa [#allocation11 + $0x1], 1 }

</bundles_post_ra>
